<compile_context>
chip_gen: v6e
topology: v6e:2x2x1
jax: 0.10.0
libtpu: 0.0.40
codegen_flags: <defaults>
</compile_context>

<pallas_src>
import jax
import jax.numpy as jnp
from jax.experimental import pallas as pl
from jax.experimental.pallas import tpu as pltpu

# ---------------- small synthetic Falcon-style config ----------------
VOCAB = 256
HIDDEN = 256
N_HEAD = 4
HEAD_DIM = HIDDEN // N_HEAD          # 64 (matches real Falcon-7B head_dim)
FFN = 4 * HIDDEN                     # 1024
N_LAYER = 2
LN_EPS = 1e-5
NEG_INF = -1e9


def _vmem_limit_bytes():
    # Raise the scoped-VMEM cap above the 32 MiB default (v5e/v6e have 128 MiB
    # physical); on v7x (64 MiB physical) leave ~16 MiB headroom for
    # double-buffering and compiler scratch.
    try:
        phys = pltpu.get_tpu_info().vmem_capacity_bytes
    except Exception:
        phys = 128 * 1024 * 1024
    return int(min(phys - 16 * 1024 * 1024, 100 * 1024 * 1024))


VMEM_LIMIT = _vmem_limit_bytes()


def _row_tile(m, preferred=256):
    # 256-512 row tiles at real sizes (>=85% of HBM roofline); fall back to the
    # full (small) extent for this synthetic config.
    return preferred if (m % preferred == 0 and m > preferred) else m


# ======================================================================
# Kernel 1: per-batch LayerNorm + QKV projection.
# q is emitted already head-split as [B, nH, S, hd] (no lane slicing later);
# the shared LayerNorm output is also emitted (bf16) for the FFN kernel,
# so the [M, 4H] MLP hidden never has to exist in HBM.
# ======================================================================
def _ln_qkv_kernel(x_ref, g_ref, b_ref, wq_ref, wk_ref, wv_ref,
                   ln_ref, q_ref, k_ref, v_ref):
    x = x_ref[0]                                             # [S, H] f32
    mean = jnp.mean(x, axis=-1, keepdims=True)
    xc = x - mean
    var = jnp.mean(xc * xc, axis=-1, keepdims=True)
    ln = xc * jax.lax.rsqrt(var + LN_EPS) * g_ref[...] + b_ref[...]
    ln_bf = ln.astype(jnp.bfloat16)
    ln_ref[0] = ln_bf

    k_ref[0] = jnp.dot(ln_bf, wk_ref[...],
                       preferred_element_type=jnp.float32).astype(jnp.bfloat16)
    v_ref[0] = jnp.dot(ln_bf, wv_ref[...],
                       preferred_element_type=jnp.float32).astype(jnp.bfloat16)
    # Per-head q dots write directly into the head-split layout -- no unaligned
    # 64-lane slices / concats anywhere downstream.  (At real Falcon sizes the
    # K=hidden depth keeps the MXU filled even with the narrow N=hd output.)
    for h in range(N_HEAD):
        q_ref[0, h] = jnp.dot(ln_bf, wq_ref[h],
                              preferred_element_type=jnp.float32
                              ).astype(jnp.bfloat16)


def pallas_ln_qkv(x, gamma, beta, wq, wk, wv):
    """x: [B,S,H] f32 -> (ln [B,S,H] bf16, q [B,nH,S,hd] bf16, k,v [B,S,hd] bf16)."""
    B, S, H = x.shape
    g = gamma.reshape(1, H)
    b = beta.reshape(1, H)
    return pl.pallas_call(
        _ln_qkv_kernel,
        out_shape=(jax.ShapeDtypeStruct((B, S, H), jnp.bfloat16),
                   jax.ShapeDtypeStruct((B, N_HEAD, S, HEAD_DIM), jnp.bfloat16),
                   jax.ShapeDtypeStruct((B, S, HEAD_DIM), jnp.bfloat16),
                   jax.ShapeDtypeStruct((B, S, HEAD_DIM), jnp.bfloat16)),
        grid=(B,),
        in_specs=[pl.BlockSpec((1, S, H), lambda i: (i, 0, 0)),
                  pl.BlockSpec((1, H), lambda i: (0, 0)),
                  pl.BlockSpec((1, H), lambda i: (0, 0)),
                  # TODO(synk): at real Falcon sizes these weights are tiled
                  # through the accumulator pattern (kernel 5) instead of a
                  # single full-weight block.
                  pl.BlockSpec((N_HEAD, H, HEAD_DIM), lambda i: (0, 0, 0)),
                  pl.BlockSpec((H, HEAD_DIM), lambda i: (0, 0)),
                  pl.BlockSpec((H, HEAD_DIM), lambda i: (0, 0))],
        out_specs=(pl.BlockSpec((1, S, H), lambda i: (i, 0, 0)),
                   pl.BlockSpec((1, N_HEAD, S, HEAD_DIM), lambda i: (i, 0, 0, 0)),
                   pl.BlockSpec((1, S, HEAD_DIM), lambda i: (i, 0, 0)),
                   pl.BlockSpec((1, S, HEAD_DIM), lambda i: (i, 0, 0))),
        compiler_params=pltpu.CompilerParams(
            dimension_semantics=("parallel",),
            vmem_limit_bytes=VMEM_LIMIT),
    )(x, g, b, wq, wk, wv)


# ======================================================================
# Kernel 2: multi-query attention + fused dense output projection.
# grid = (batch, head); the head axis is a reduction into a [S, H] f32
# accumulator (per-head PV result is immediately projected through its slice
# of w_dense), so the output is a lane-dense [B, S, H] bf16 slab and no
# head->lane regroup or [B,S,nH*hd] intermediate ever exists.
# ======================================================================
def _mqa_attn_dense_kernel(q_ref, k_ref, v_ref, amask_ref,
                           cosq_ref, sinq_ref, cosk_ref, sink_ref,
                           wd_ref, o_ref, acc_ref):
    h = pl.program_id(1)
    S = q_ref.shape[2]
    half = HEAD_DIM // 2

    @pl.when(h == 0)
    def _():
        acc_ref[...] = jnp.zeros_like(acc_ref)

    q = q_ref[0, 0].astype(jnp.float32)                      # [S, hd]
    k = k_ref[0].astype(jnp.float32)                         # [S, hd] shared K

    # rotate_half(x) == pltpu.roll(x, hd/2) * sign; sign folded into sin tables,
    # 1/sqrt(hd) folded into the q tables.  roll uses the XLU slot (no copies).
    qr = q * cosq_ref[...] + pltpu.roll(q, shift=half, axis=1) * sinq_ref[...]
    kr = k * cosk_ref[...] + pltpu.roll(k, shift=half, axis=1) * sink_ref[...]

    scores = jax.lax.dot_general(
        qr.astype(jnp.bfloat16), kr.astype(jnp.bfloat16),
        (((1,), (1,)), ((), ())),
        preferred_element_type=jnp.float32)                  # [S, S]

    # causal + padding mask built in-kernel; a single [S, S] where per head,
    # never materialized per-head.
    rows = jax.lax.broadcasted_iota(jnp.int32, (S, S), 0)
    cols = jax.lax.broadcasted_iota(jnp.int32, (S, S), 1)
    keep = (cols <= rows) & (amask_ref[0] > 0.0)             # [S, S]
    scores = jnp.where(keep, scores, NEG_INF)

    m = jnp.max(scores, axis=-1, keepdims=True)
    e = jnp.exp(scores - m)  # TODO(synk): cast to bf16 before exp on v6e/v7x (bf16 EUP)
    probs = e * pl.reciprocal(jnp.sum(e, axis=-1, keepdims=True), approx=True)

    pv = jnp.dot(probs.astype(jnp.bfloat16), v_ref[0],
                 preferred_element_type=jnp.float32)         # [S, hd]
    # fused per-head slice of the attention output projection
    acc_ref[...] += jnp.dot(pv.astype(jnp.bfloat16), wd_ref[0],
                            preferred_element_type=jnp.float32)   # [S, H]

    @pl.when(h == pl.num_programs(1) - 1)
    def _():
        o_ref[0] = acc_ref[...].astype(o_ref.dtype)


def pallas_mqa_attn_dense(q, k, v, amask, cos_q, sin_q, cos_k, sin_k, wd):
    """q: [B,nH,S,hd]; k,v: [B,S,hd]; amask: [B,1,S]; wd: [nH,hd,H] -> [B,S,H] bf16."""
    B, nH, S, hd = q.shape
    H = wd.shape[-1]
    # TODO(synk): for real sequence lengths add a KV-tile grid axis
    # (flash-style online softmax with VMEM m/l scratch) instead of whole-S blocks.
    return pl.pallas_call(
        _mqa_attn_dense_kernel,
        out_shape=jax.ShapeDtypeStruct((B, S, H), jnp.bfloat16),
        grid=(B, nH),
        in_specs=[pl.BlockSpec((1, 1, S, hd), lambda b, h: (b, h, 0, 0)),
                  pl.BlockSpec((1, S, hd), lambda b, h: (b, 0, 0)),
                  pl.BlockSpec((1, S, hd), lambda b, h: (b, 0, 0)),
                  pl.BlockSpec((1, 1, S), lambda b, h: (b, 0, 0)),
                  # single [S, hd] rotary tables, broadcast over heads in-kernel
                  pl.BlockSpec((S, hd), lambda b, h: (0, 0)),
                  pl.BlockSpec((S, hd), lambda b, h: (0, 0)),
                  pl.BlockSpec((S, hd), lambda b, h: (0, 0)),
                  pl.BlockSpec((S, hd), lambda b, h: (0, 0)),
                  pl.BlockSpec((1, hd, H), lambda b, h: (h, 0, 0))],
        out_specs=pl.BlockSpec((1, S, H), lambda b, h: (b, 0, 0)),
        scratch_shapes=[pltpu.VMEM((S, H), jnp.float32)],
        compiler_params=pltpu.CompilerParams(
            dimension_semantics=("parallel", "arbitrary"),
            vmem_limit_bytes=VMEM_LIMIT),
    )(q, k, v, amask, cos_q, sin_q, cos_k, sin_k, wd)


# ======================================================================
# Kernel 3: fused FFN tiled over the FFN axis:
#   out = residual + attn + sum_f  gelu(ln @ W1[:, f]) @ W2[f, :]
# The [tm, 4H] hidden lives only in VMEM (never written to HBM).
# ======================================================================
def _ffn_kernel(ln_ref, attn_ref, res_ref, w1_ref, w2_ref, o_ref, acc_ref):
    f = pl.program_id(1)

    @pl.when(f == 0)
    def _():
        acc_ref[...] = res_ref[...] + attn_ref[...].astype(jnp.float32)

    h4 = jnp.dot(ln_ref[...], w1_ref[...],
                 preferred_element_type=jnp.float32)          # [tm, tf]
    # TODO(synk): Falcon uses exact erf GELU; tanh approximation used in-kernel.
    g = jax.nn.gelu(h4, approximate=True)
    acc_ref[...] += jnp.dot(g.astype(jnp.bfloat16), w2_ref[...],
                            preferred_element_type=jnp.float32)

    @pl.when(f == pl.num_programs(1) - 1)
    def _():
        o_ref[...] = acc_ref[...]


def pallas_ffn(ln, attn, res, w1, w2, tf=512):
    """ln, attn: [M,H] bf16; res: [M,H] f32; w1: [H,4H] bf16; w2: [4H,H] bf16 -> [M,H] f32."""
    M, H = res.shape
    F = w1.shape[1]
    tm = _row_tile(M)
    tf = tf if (F % tf == 0 and F > tf) else F
    return pl.pallas_call(
        _ffn_kernel,
        out_shape=jax.ShapeDtypeStruct((M, H), jnp.float32),
        grid=(M // tm, F // tf),
        in_specs=[pl.BlockSpec((tm, H), lambda i, f: (i, 0)),
                  pl.BlockSpec((tm, H), lambda i, f: (i, 0)),
                  pl.BlockSpec((tm, H), lambda i, f: (i, 0)),
                  pl.BlockSpec((H, tf), lambda i, f: (0, f)),
                  pl.BlockSpec((tf, H), lambda i, f: (f, 0))],
        out_specs=pl.BlockSpec((tm, H), lambda i, f: (i, 0)),
        scratch_shapes=[pltpu.VMEM((tm, H), jnp.float32)],
        compiler_params=pltpu.CompilerParams(
            dimension_semantics=("parallel", "arbitrary"),
            vmem_limit_bytes=VMEM_LIMIT),
    )(ln, attn, res, w1, w2)


# ======================================================================
# Kernel 4: final LayerNorm (only on the B last-token rows)
# ======================================================================
def _layernorm_kernel(x_ref, g_ref, b_ref, o_ref):
    x = x_ref[...]
    mean = jnp.mean(x, axis=-1, keepdims=True)
    xc = x - mean
    var = jnp.mean(xc * xc, axis=-1, keepdims=True)
    o_ref[...] = xc * jax.lax.rsqrt(var + LN_EPS) * g_ref[...] + b_ref[...]


def pallas_layernorm(x, gamma, beta):
    M, H = x.shape
    g = gamma.reshape(1, H)
    b = beta.reshape(1, H)
    return pl.pallas_call(
        _layernorm_kernel,
        out_shape=jax.ShapeDtypeStruct((M, H), jnp.float32),
        grid=(1,),
        in_specs=[pl.BlockSpec((M, H), lambda i: (0, 0)),
                  pl.BlockSpec((1, H), lambda i: (0, 0)),
                  pl.BlockSpec((1, H), lambda i: (0, 0))],
        out_specs=pl.BlockSpec((M, H), lambda i: (0, 0)),
        compiler_params=pltpu.CompilerParams(
            dimension_semantics=("arbitrary",),
            vmem_limit_bytes=VMEM_LIMIT),
    )(x, g, b)


# ======================================================================
# Kernel 5: generic tiled matmul (bf16 MXU inputs, f32 VMEM accumulator,
# pl.when init/finalize) -- used for the last-token-only lm_head.
# ======================================================================
def _matmul_kernel(x_ref, w_ref, o_ref, acc_ref):
    @pl.when(pl.program_id(2) == 0)
    def _():
        acc_ref[...] = jnp.zeros_like(acc_ref)

    acc_ref[...] += jnp.dot(x_ref[...].astype(jnp.bfloat16), w_ref[...],
                            preferred_element_type=jnp.float32)

    @pl.when(pl.program_id(2) == pl.num_programs(2) - 1)
    def _():
        o_ref[...] = acc_ref[...]


def pallas_matmul(x, w, tm, tn, tk):
    """x: [M, K] f32; w: [K, N] bf16 -> [M, N] f32."""
    M, K = x.shape
    _, N = w.shape
    return pl.pallas_call(
        _matmul_kernel,
        out_shape=jax.ShapeDtypeStruct((M, N), jnp.float32),
        grid=(M // tm, N // tn, K // tk),
        in_specs=[pl.BlockSpec((tm, tk), lambda i, j, k: (i, k)),
                  pl.BlockSpec((tk, tn), lambda i, j, k: (k, j))],
        out_specs=pl.BlockSpec((tm, tn), lambda i, j, k: (i, j)),
        scratch_shapes=[pltpu.VMEM((tm, tn), jnp.float32)],
        compiler_params=pltpu.CompilerParams(
            dimension_semantics=("parallel", "parallel", "arbitrary"),
            vmem_limit_bytes=VMEM_LIMIT),
    )(x, w)


# ---------------------------- model glue ----------------------------
def rotary_tables(seq_len, dim, q_scale):
    inv_freq = 1.0 / (10000.0 ** (jnp.arange(0, dim, 2, dtype=jnp.float32) / dim))
    t = jnp.arange(seq_len, dtype=jnp.float32)
    freqs = jnp.outer(t, inv_freq)                       # [S, dim/2]
    emb = jnp.concatenate([freqs, freqs], axis=-1)       # [S, dim]
    cos, sin = jnp.cos(emb), jnp.sin(emb)
    # rotate_half(x) == pltpu.roll(x, dim//2, axis=-1) * sign ; fold sign into sin.
    sign = jnp.concatenate([-jnp.ones((dim // 2,), jnp.float32),
                            jnp.ones((dim // 2,), jnp.float32)])
    return cos * q_scale, sin * sign * q_scale, cos, sin * sign


def init_params(key):
    def nrm(k, shape, scale=0.02):
        return scale * jax.random.normal(k, shape, dtype=jnp.float32)

    keys = iter(jax.random.split(key, 6 * N_LAYER + 2))
    params = {
        "wte": nrm(next(keys), (VOCAB, HIDDEN)),
        "layers": [],
        "ln_f_g": jnp.ones((HIDDEN,), jnp.float32),
        "ln_f_b": jnp.zeros((HIDDEN,), jnp.float32),
        "lm_head": nrm(next(keys), (HIDDEN, VOCAB)).astype(jnp.bfloat16),
    }
    for _ in range(N_LAYER):
        params["layers"].append({
            "ln_g": jnp.ones((HIDDEN,), jnp.float32),
            "ln_b": jnp.zeros((HIDDEN,), jnp.float32),
            # query projection stored per-head [nH, H, hd] (MQA: 1 shared K/V head)
            "w_q": nrm(next(keys), (N_HEAD, HIDDEN, HEAD_DIM)).astype(jnp.bfloat16),
            "w_k": nrm(next(keys), (HIDDEN, HEAD_DIM)).astype(jnp.bfloat16),
            "w_v": nrm(next(keys), (HIDDEN, HEAD_DIM)).astype(jnp.bfloat16),
            # attention output projection pre-split per head: [nH, hd, H]
            "w_dense": nrm(next(keys), (N_HEAD, HEAD_DIM, HIDDEN)).astype(jnp.bfloat16),
            "w_h_to_4h": nrm(next(keys), (HIDDEN, FFN)).astype(jnp.bfloat16),
            "w_4h_to_h": nrm(next(keys), (FFN, HIDDEN)).astype(jnp.bfloat16),
        })
    return params


def falcon_forward(params, input_ids, attention_mask):
    """Returns logits[:, -1, :] (last-token logits), matching H2OGPTModel.forward."""
    B, S = input_ids.shape
    h = jnp.take(params["wte"], input_ids, axis=0)        # [B, S, H] (XLA gather glue)
    amask = attention_mask.astype(jnp.float32).reshape(B, 1, S)
    cos_q, sin_q, cos_k, sin_k = rotary_tables(S, HEAD_DIM, 1.0 / (HEAD_DIM ** 0.5))

    # TODO(synk): past_key_values / use_cache KV-cache plumbing is not modeled;
    # it does not affect the returned last-token logits for a fresh forward.
    for layer in params["layers"]:
        res = h.reshape(B * S, HIDDEN)                    # residual stream (f32)
        ln, q, k, v = pallas_ln_qkv(h, layer["ln_g"], layer["ln_b"],
                                    layer["w_q"], layer["w_k"], layer["w_v"])
        attn = pallas_mqa_attn_dense(q, k, v, amask, cos_q, sin_q, cos_k, sin_k,
                                     layer["w_dense"])    # [B, S, H] bf16
        h = pallas_ffn(ln.reshape(B * S, HIDDEN), attn.reshape(B * S, HIDDEN),
                       res, layer["w_h_to_4h"], layer["w_4h_to_h"]
                       ).reshape(B, S, HIDDEN)

    # last-token-only lm_head: slice BEFORE the big matmul (S-fold FLOP/byte cut).
    # TODO(synk): with right-padded masks HF would gather the last non-padded
    # token per row; the literal last position is used here (all-ones mask).
    h_last = h[:, -1, :]                                  # [B, H]
    ln_f = pallas_layernorm(h_last, params["ln_f_g"], params["ln_f_b"])
    # Pad M up to a multiple of 8 sublanes so the lm_head MXU tile is not
    # degenerate; slice the padding back off afterwards.
    m_pad = ((B + 7) // 8) * 8
    ln_f = jnp.pad(ln_f, ((0, m_pad - B), (0, 0)))
    # tk >= 256 fills the 256-deep v6e/v7x MXU; tn grows to 512-1024 at real
    # vocab sizes so each bf16 weight block is ~1-2 MB.
    tn = 512 if (VOCAB % 512 == 0 and VOCAB > 512) else VOCAB
    tk = 256 if (HIDDEN % 256 == 0 and HIDDEN > 256) else HIDDEN
    logits = pallas_matmul(ln_f, params["lm_head"], tm=m_pad, tn=tn, tk=tk)
    return logits[:B]                                     # [B, VOCAB]


if __name__ == "__main__":
    key = jax.random.PRNGKey(0)
    pkey, ikey = jax.random.split(key)
    params = init_params(pkey)

    B, S = 2, 16
    input_ids = jax.random.randint(ikey, (B, S), 0, VOCAB, dtype=jnp.int32)
    attention_mask = jnp.ones((B, S), dtype=jnp.int32)

    out = jax.jit(falcon_forward)(params, input_ids, attention_mask)
    out = jax.block_until_ready(out)
    assert out.shape == (B, VOCAB) and out.dtype == jnp.float32
    assert bool(jnp.all(jnp.isfinite(out)))
    print("KERNEL_OK")
</pallas_src>

<mosaic_0001>
module attributes {stable_mosaic.version = 11 : i64} {
  func.func @_ln_qkv_kernel(%arg0: i32, %arg1: memref<1x16x256xf32, #tpu.memory_space<vmem>>, %arg2: memref<1x256xf32, #tpu.memory_space<vmem>>, %arg3: memref<1x256xf32, #tpu.memory_space<vmem>>, %arg4: memref<4x256x64xbf16, #tpu.memory_space<vmem>>, %arg5: memref<256x64xbf16, #tpu.memory_space<vmem>>, %arg6: memref<256x64xbf16, #tpu.memory_space<vmem>>, %arg7: memref<1x16x256xbf16, #tpu.memory_space<vmem>>, %arg8: memref<1x4x16x64xbf16, #tpu.memory_space<vmem>>, %arg9: memref<1x16x64xbf16, #tpu.memory_space<vmem>>, %arg10: memref<1x16x64xbf16, #tpu.memory_space<vmem>>) attributes {dimension_semantics = [#tpu.dimension_semantics<parallel>], iteration_bounds = array<i64: 2>, scalar_prefetch = 0 : i64, scratch_operands = 0 : i64, tpu.core_type = #tpu.core_type<tc>, window_params = [{transform_indices = @transform_0, window_bounds = array<i64: 1, 16, 256>}, {pipeline_mode = #tpu.pipeline_mode<synchronous>, transform_indices = @transform_1, window_bounds = array<i64: 1, 256>}, {pipeline_mode = #tpu.pipeline_mode<synchronous>, transform_indices = @transform_2, window_bounds = array<i64: 1, 256>}, {pipeline_mode = #tpu.pipeline_mode<synchronous>, transform_indices = @transform_3, window_bounds = array<i64: 4, 256, 64>}, {pipeline_mode = #tpu.pipeline_mode<synchronous>, transform_indices = @transform_4, window_bounds = array<i64: 256, 64>}, {pipeline_mode = #tpu.pipeline_mode<synchronous>, transform_indices = @transform_5, window_bounds = array<i64: 256, 64>}, {transform_indices = @transform_6, window_bounds = array<i64: 1, 16, 256>}, {transform_indices = @transform_7, window_bounds = array<i64: 1, 4, 16, 64>}, {transform_indices = @transform_8, window_bounds = array<i64: 1, 16, 64>}, {transform_indices = @transform_9, window_bounds = array<i64: 1, 16, 64>}]} {
    %c0 = arith.constant 0 : index
    %c0_0 = arith.constant 0 : index
    %c0_1 = arith.constant 0 : index
    %0 = vector.load %arg1[%c0, %c0_0, %c0_1] : memref<1x16x256xf32, #tpu.memory_space<vmem>>, vector<1x16x256xf32>
    %1 = vector.shape_cast %0 : vector<1x16x256xf32> to vector<16x256xf32>
    %cst = arith.constant dense<0.000000e+00> : vector<16xf32>
    %2 = vector.multi_reduction <add>, %1, %cst [1] : vector<16x256xf32> to vector<16xf32>
    %3 = vector.shape_cast %2 : vector<16xf32> to vector<16x1xf32>
    %cst_2 = arith.constant 2.560000e+02 : f32
    %4 = vector.broadcast %cst_2 : f32 to vector<16x1xf32>
    %5 = arith.divf %3, %4 : vector<16x1xf32>
    %6 = vector.broadcast %5 : vector<16x1xf32> to vector<16x256xf32>
    %7 = arith.subf %1, %6 : vector<16x256xf32>
    %8 = arith.mulf %7, %7 : vector<16x256xf32>
    %cst_3 = arith.constant dense<0.000000e+00> : vector<16xf32>
    %9 = vector.multi_reduction <add>, %8, %cst_3 [1] : vector<16x256xf32> to vector<16xf32>
    %10 = vector.shape_cast %9 : vector<16xf32> to vector<16x1xf32>
    %cst_4 = arith.constant 2.560000e+02 : f32
    %11 = vector.broadcast %cst_4 : f32 to vector<16x1xf32>
    %12 = arith.divf %10, %11 : vector<16x1xf32>
    %cst_5 = arith.constant 9.99999974E-6 : f32
    %13 = vector.broadcast %cst_5 : f32 to vector<16x1xf32>
    %14 = arith.addf %12, %13 : vector<16x1xf32>
    %15 = math.rsqrt %14 : vector<16x1xf32>
    %16 = vector.broadcast %15 : vector<16x1xf32> to vector<16x256xf32>
    %17 = arith.mulf %7, %16 : vector<16x256xf32>
    %c0_6 = arith.constant 0 : index
    %c0_7 = arith.constant 0 : index
    %18 = vector.load %arg2[%c0_6, %c0_7] : memref<1x256xf32, #tpu.memory_space<vmem>>, vector<1x256xf32>
    %19 = vector.broadcast %18 : vector<1x256xf32> to vector<16x256xf32>
    %20 = arith.mulf %17, %19 : vector<16x256xf32>
    %c0_8 = arith.constant 0 : index
    %c0_9 = arith.constant 0 : index
    %21 = vector.load %arg3[%c0_8, %c0_9] : memref<1x256xf32, #tpu.memory_space<vmem>>, vector<1x256xf32>
    %22 = vector.broadcast %21 : vector<1x256xf32> to vector<16x256xf32>
    %23 = arith.addf %20, %22 : vector<16x256xf32>
    %24 = arith.truncf %23 : vector<16x256xf32> to vector<16x256xbf16>
    %c0_10 = arith.constant 0 : index
    %c0_11 = arith.constant 0 : index
    %c0_12 = arith.constant 0 : index
    %25 = vector.load %arg7[%c0_10, %c0_11, %c0_12] : memref<1x16x256xbf16, #tpu.memory_space<vmem>>, vector<1x16x256xbf16>
    %26 = vector.shape_cast %25 : vector<1x16x256xbf16> to vector<16x256xbf16>
    %27 = vector.shape_cast %24 : vector<16x256xbf16> to vector<1x16x256xbf16>
    tpu.vector_store %arg7[%c0_10, %c0_11, %c0_12], %27 {strides = array<i32>} : memref<1x16x256xbf16, #tpu.memory_space<vmem>>, vector<1x16x256xbf16>,
    %c0_13 = arith.constant 0 : index
    %c0_14 = arith.constant 0 : index
    %28 = vector.load %arg5[%c0_13, %c0_14] : memref<256x64xbf16, #tpu.memory_space<vmem>>, vector<256x64xbf16>
    %cst_15 = arith.constant dense<0.000000e+00> : vector<16x64xf32>
    %29 = tpu.matmul %24, %28, %cst_15 {dimension_numbers = #tpu.dot_dimension_numbers<[1], [0], [0], [1], [0, 0, 1, 1], [], []>} : vector<16x256xbf16>, vector<256x64xbf16>, vector<16x64xf32> -> vector<16x64xf32>
    %30 = arith.truncf %29 : vector<16x64xf32> to vector<16x64xbf16>
    %c0_16 = arith.constant 0 : index
    %c0_17 = arith.constant 0 : index
    %c0_18 = arith.constant 0 : index
    %31 = vector.load %arg9[%c0_16, %c0_17, %c0_18] : memref<1x16x64xbf16, #tpu.memory_space<vmem>>, vector<1x16x64xbf16>
    %32 = vector.shape_cast %31 : vector<1x16x64xbf16> to vector<16x64xbf16>
    %33 = vector.shape_cast %30 : vector<16x64xbf16> to vector<1x16x64xbf16>
    tpu.vector_store %arg9[%c0_16, %c0_17, %c0_18], %33 {strides = array<i32>} : memref<1x16x64xbf16, #tpu.memory_space<vmem>>, vector<1x16x64xbf16>,
    %c0_19 = arith.constant 0 : index
    %c0_20 = arith.constant 0 : index
    %34 = vector.load %arg6[%c0_19, %c0_20] : memref<256x64xbf16, #tpu.memory_space<vmem>>, vector<256x64xbf16>
    %cst_21 = arith.constant dense<0.000000e+00> : vector<16x64xf32>
    %35 = tpu.matmul %24, %34, %cst_21 {dimension_numbers = #tpu.dot_dimension_numbers<[1], [0], [0], [1], [0, 0, 1, 1], [], []>} : vector<16x256xbf16>, vector<256x64xbf16>, vector<16x64xf32> -> vector<16x64xf32>
    %36 = arith.truncf %35 : vector<16x64xf32> to vector<16x64xbf16>
    %c0_22 = arith.constant 0 : index
    %c0_23 = arith.constant 0 : index
    %c0_24 = arith.constant 0 : index
    %37 = vector.load %arg10[%c0_22, %c0_23, %c0_24] : memref<1x16x64xbf16, #tpu.memory_space<vmem>>, vector<1x16x64xbf16>
    %38 = vector.shape_cast %37 : vector<1x16x64xbf16> to vector<16x64xbf16>
    %39 = vector.shape_cast %36 : vector<16x64xbf16> to vector<1x16x64xbf16>
    tpu.vector_store %arg10[%c0_22, %c0_23, %c0_24], %39 {strides = array<i32>} : memref<1x16x64xbf16, #tpu.memory_space<vmem>>, vector<1x16x64xbf16>,
    %c0_25 = arith.constant 0 : index
    %c0_26 = arith.constant 0 : index
    %c0_27 = arith.constant 0 : index
    %40 = vector.load %arg4[%c0_25, %c0_26, %c0_27] : memref<4x256x64xbf16, #tpu.memory_space<vmem>>, vector<1x256x64xbf16>
    %41 = vector.shape_cast %40 : vector<1x256x64xbf16> to vector<256x64xbf16>
    %cst_28 = arith.constant dense<0.000000e+00> : vector<16x64xf32>
    %42 = tpu.matmul %24, %41, %cst_28 {dimension_numbers = #tpu.dot_dimension_numbers<[1], [0], [0], [1], [0, 0, 1, 1], [], []>} : vector<16x256xbf16>, vector<256x64xbf16>, vector<16x64xf32> -> vector<16x64xf32>
    %43 = arith.truncf %42 : vector<16x64xf32> to vector<16x64xbf16>
    %c0_29 = arith.constant 0 : index
    %c0_30 = arith.constant 0 : index
    %c0_31 = arith.constant 0 : index
    %c0_32 = arith.constant 0 : index
    %44 = vector.load %arg8[%c0_29, %c0_30, %c0_31, %c0_32] : memref<1x4x16x64xbf16, #tpu.memory_space<vmem>>, vector<1x1x16x64xbf16>
    %45 = vector.shape_cast %44 : vector<1x1x16x64xbf16> to vector<16x64xbf16>
    %46 = vector.shape_cast %43 : vector<16x64xbf16> to vector<1x1x16x64xbf16>
    tpu.vector_store %arg8[%c0_29, %c0_30, %c0_31, %c0_32], %46 {strides = array<i32>} : memref<1x4x16x64xbf16, #tpu.memory_space<vmem>>, vector<1x1x16x64xbf16>,
    %c1 = arith.constant 1 : index
    %c0_33 = arith.constant 0 : index
    %c0_34 = arith.constant 0 : index
    %47 = vector.load %arg4[%c1, %c0_33, %c0_34] : memref<4x256x64xbf16, #tpu.memory_space<vmem>>, vector<1x256x64xbf16>
    %48 = vector.shape_cast %47 : vector<1x256x64xbf16> to vector<256x64xbf16>
    %cst_35 = arith.constant dense<0.000000e+00> : vector<16x64xf32>
    %49 = tpu.matmul %24, %48, %cst_35 {dimension_numbers = #tpu.dot_dimension_numbers<[1], [0], [0], [1], [0, 0, 1, 1], [], []>} : vector<16x256xbf16>, vector<256x64xbf16>, vector<16x64xf32> -> vector<16x64xf32>
    %50 = arith.truncf %49 : vector<16x64xf32> to vector<16x64xbf16>
    %c0_36 = arith.constant 0 : index
    %c1_37 = arith.constant 1 : index
    %c0_38 = arith.constant 0 : index
    %c0_39 = arith.constant 0 : index
    %51 = vector.load %arg8[%c0_36, %c1_37, %c0_38, %c0_39] : memref<1x4x16x64xbf16, #tpu.memory_space<vmem>>, vector<1x1x16x64xbf16>
    %52 = vector.shape_cast %51 : vector<1x1x16x64xbf16> to vector<16x64xbf16>
    %53 = vector.shape_cast %50 : vector<16x64xbf16> to vector<1x1x16x64xbf16>
    tpu.vector_store %arg8[%c0_36, %c1_37, %c0_38, %c0_39], %53 {strides = array<i32>} : memref<1x4x16x64xbf16, #tpu.memory_space<vmem>>, vector<1x1x16x64xbf16>,
    %c2 = arith.constant 2 : index
    %c0_40 = arith.constant 0 : index
    %c0_41 = arith.constant 0 : index
    %54 = vector.load %arg4[%c2, %c0_40, %c0_41] : memref<4x256x64xbf16, #tpu.memory_space<vmem>>, vector<1x256x64xbf16>
    %55 = vector.shape_cast %54 : vector<1x256x64xbf16> to vector<256x64xbf16>
    %cst_42 = arith.constant dense<0.000000e+00> : vector<16x64xf32>
    %56 = tpu.matmul %24, %55, %cst_42 {dimension_numbers = #tpu.dot_dimension_numbers<[1], [0], [0], [1], [0, 0, 1, 1], [], []>} : vector<16x256xbf16>, vector<256x64xbf16>, vector<16x64xf32> -> vector<16x64xf32>
    %57 = arith.truncf %56 : vector<16x64xf32> to vector<16x64xbf16>
    %c0_43 = arith.constant 0 : index
    %c2_44 = arith.constant 2 : index
    %c0_45 = arith.constant 0 : index
    %c0_46 = arith.constant 0 : index
    %58 = vector.load %arg8[%c0_43, %c2_44, %c0_45, %c0_46] : memref<1x4x16x64xbf16, #tpu.memory_space<vmem>>, vector<1x1x16x64xbf16>
    %59 = vector.shape_cast %58 : vector<1x1x16x64xbf16> to vector<16x64xbf16>
    %60 = vector.shape_cast %57 : vector<16x64xbf16> to vector<1x1x16x64xbf16>
    tpu.vector_store %arg8[%c0_43, %c2_44, %c0_45, %c0_46], %60 {strides = array<i32>} : memref<1x4x16x64xbf16, #tpu.memory_space<vmem>>, vector<1x1x16x64xbf16>,
    %c3 = arith.constant 3 : index
    %c0_47 = arith.constant 0 : index
    %c0_48 = arith.constant 0 : index
    %61 = vector.load %arg4[%c3, %c0_47, %c0_48] : memref<4x256x64xbf16, #tpu.memory_space<vmem>>, vector<1x256x64xbf16>
    %62 = vector.shape_cast %61 : vector<1x256x64xbf16> to vector<256x64xbf16>
    %cst_49 = arith.constant dense<0.000000e+00> : vector<16x64xf32>
    %63 = tpu.matmul %24, %62, %cst_49 {dimension_numbers = #tpu.dot_dimension_numbers<[1], [0], [0], [1], [0, 0, 1, 1], [], []>} : vector<16x256xbf16>, vector<256x64xbf16>, vector<16x64xf32> -> vector<16x64xf32>
    %64 = arith.truncf %63 : vector<16x64xf32> to vector<16x64xbf16>
    %c0_50 = arith.constant 0 : index
    %c3_51 = arith.constant 3 : index
    %c0_52 = arith.constant 0 : index
    %c0_53 = arith.constant 0 : index
    %65 = vector.load %arg8[%c0_50, %c3_51, %c0_52, %c0_53] : memref<1x4x16x64xbf16, #tpu.memory_space<vmem>>, vector<1x1x16x64xbf16>
    %66 = vector.shape_cast %65 : vector<1x1x16x64xbf16> to vector<16x64xbf16>
    %67 = vector.shape_cast %64 : vector<16x64xbf16> to vector<1x1x16x64xbf16>
    tpu.vector_store %arg8[%c0_50, %c3_51, %c0_52, %c0_53], %67 {strides = array<i32>} : memref<1x4x16x64xbf16, #tpu.memory_space<vmem>>, vector<1x1x16x64xbf16>,
    return
  }
  func.func @transform_0(%arg0: i32) -> (i32, i32, i32) {
    %c0_i32 = arith.constant 0 : i32
    %c0_i32_0 = arith.constant 0 : i32
    %c0_i32_1 = arith.constant 0 : i32
    return %arg0, %c0_i32, %c0_i32_0 : i32, i32, i32
  }
  func.func @transform_1(%arg0: i32) -> (i32, i32) {
    %c0_i32 = arith.constant 0 : i32
    %c0_i32_0 = arith.constant 0 : i32
    %c0_i32_1 = arith.constant 0 : i32
    return %c0_i32, %c0_i32_0 : i32, i32
  }
  func.func @transform_2(%arg0: i32) -> (i32, i32) {
    %c0_i32 = arith.constant 0 : i32
    %c0_i32_0 = arith.constant 0 : i32
    %c0_i32_1 = arith.constant 0 : i32
    return %c0_i32, %c0_i32_0 : i32, i32
  }
  func.func @transform_3(%arg0: i32) -> (i32, i32, i32) {
    %c0_i32 = arith.constant 0 : i32
    %c0_i32_0 = arith.constant 0 : i32
    %c0_i32_1 = arith.constant 0 : i32
    %c0_i32_2 = arith.constant 0 : i32
    return %c0_i32, %c0_i32_0, %c0_i32_1 : i32, i32, i32
  }
  func.func @transform_4(%arg0: i32) -> (i32, i32) {
    %c0_i32 = arith.constant 0 : i32
    %c0_i32_0 = arith.constant 0 : i32
    %c0_i32_1 = arith.constant 0 : i32
    return %c0_i32, %c0_i32_0 : i32, i32
  }
  func.func @transform_5(%arg0: i32) -> (i32, i32) {
    %c0_i32 = arith.constant 0 : i32
    %c0_i32_0 = arith.constant 0 : i32
    %c0_i32_1 = arith.constant 0 : i32
    return %c0_i32, %c0_i32_0 : i32, i32
  }
  func.func @transform_6(%arg0: i32) -> (i32, i32, i32) {
    %c0_i32 = arith.constant 0 : i32
    %c0_i32_0 = arith.constant 0 : i32
    %c0_i32_1 = arith.constant 0 : i32
    return %arg0, %c0_i32, %c0_i32_0 : i32, i32, i32
  }
  func.func @transform_7(%arg0: i32) -> (i32, i32, i32, i32) {
    %c0_i32 = arith.constant 0 : i32
    %c0_i32_0 = arith.constant 0 : i32
    %c0_i32_1 = arith.constant 0 : i32
    %c0_i32_2 = arith.constant 0 : i32
    return %arg0, %c0_i32, %c0_i32_0, %c0_i32_1 : i32, i32, i32, i32
  }
  func.func @transform_8(%arg0: i32) -> (i32, i32, i32) {
    %c0_i32 = arith.constant 0 : i32
    %c0_i32_0 = arith.constant 0 : i32
    %c0_i32_1 = arith.constant 0 : i32
    return %arg0, %c0_i32, %c0_i32_0 : i32, i32, i32
  }
  func.func @transform_9(%arg0: i32) -> (i32, i32, i32) {
    %c0_i32 = arith.constant 0 : i32
    %c0_i32_0 = arith.constant 0 : i32
    %c0_i32_1 = arith.constant 0 : i32
    return %arg0, %c0_i32, %c0_i32_0 : i32, i32, i32
  }
}

module attributes {stable_mosaic.version = 11 : i64} {
  func.func @_mqa_attn_dense_kernel(%arg0: i32, %arg1: i32, %arg2: memref<1x1x16x64xbf16, #tpu.memory_space<vmem>>, %arg3: memref<1x16x64xbf16, #tpu.memory_space<vmem>>, %arg4: memref<1x16x64xbf16, #tpu.memory_space<vmem>>, %arg5: memref<1x1x16xf32, #tpu.memory_space<vmem>>, %arg6: memref<16x64xf32, #tpu.memory_space<vmem>>, %arg7: memref<16x64xf32, #tpu.memory_space<vmem>>, %arg8: memref<16x64xf32, #tpu.memory_space<vmem>>, %arg9: memref<16x64xf32, #tpu.memory_space<vmem>>, %arg10: memref<1x64x256xbf16, #tpu.memory_space<vmem>>, %arg11: memref<1x16x256xbf16, #tpu.memory_space<vmem>>, %arg12: memref<16x256xf32, #tpu.memory_space<vmem>>) attributes {dimension_semantics = [#tpu.dimension_semantics<parallel>, #tpu.dimension_semantics<arbitrary>], iteration_bounds = array<i64: 2, 4>, scalar_prefetch = 0 : i64, scratch_operands = 1 : i64, tpu.core_type = #tpu.core_type<tc>, window_params = [{transform_indices = @transform_0, window_bounds = array<i64: 1, 1, 16, 64>}, {transform_indices = @transform_1, window_bounds = array<i64: 1, 16, 64>}, {transform_indices = @transform_2, window_bounds = array<i64: 1, 16, 64>}, {transform_indices = @transform_3, window_bounds = array<i64: 1, 1, 16>}, {pipeline_mode = #tpu.pipeline_mode<synchronous>, transform_indices = @transform_4, window_bounds = array<i64: 16, 64>}, {pipeline_mode = #tpu.pipeline_mode<synchronous>, transform_indices = @transform_5, window_bounds = array<i64: 16, 64>}, {pipeline_mode = #tpu.pipeline_mode<synchronous>, transform_indices = @transform_6, window_bounds = array<i64: 16, 64>}, {pipeline_mode = #tpu.pipeline_mode<synchronous>, transform_indices = @transform_7, window_bounds = array<i64: 16, 64>}, {transform_indices = @transform_8, window_bounds = array<i64: 1, 64, 256>}, {transform_indices = @transform_9, window_bounds = array<i64: 1, 16, 256>}]} {
    %c0_i32 = arith.constant 0 : i32
    %0 = arith.cmpi eq, %arg1, %c0_i32 : i32
    %1 = arith.extui %0 : i1 to i32
    %c0_i32_0 = arith.constant 0 : i32
    %2 = arith.cmpi ne, %1, %c0_i32_0 : i32
    scf.if %2 {
      %cst_36 = arith.constant 0.000000e+00 : f32
      %59 = vector.broadcast %cst_36 : f32 to vector<16x256xf32>
      %c0_37 = arith.constant 0 : index
      %c0_38 = arith.constant 0 : index
      %60 = vector.load %arg12[%c0_37, %c0_38] : memref<16x256xf32, #tpu.memory_space<vmem>>, vector<16x256xf32>
      tpu.vector_store %arg12[%c0_37, %c0_38], %59 {strides = array<i32>} : memref<16x256xf32, #tpu.memory_space<vmem>>, vector<16x256xf32>,
    } else {
    }
    %c0 = arith.constant 0 : index
    %c0_1 = arith.constant 0 : index
    %c0_2 = arith.constant 0 : index
    %c0_3 = arith.constant 0 : index
    %3 = vector.load %arg2[%c0, %c0_1, %c0_2, %c0_3] : memref<1x1x16x64xbf16, #tpu.memory_space<vmem>>, vector<1x1x16x64xbf16>
    %4 = vector.shape_cast %3 : vector<1x1x16x64xbf16> to vector<16x64xbf16>
    %5 = arith.extf %4 : vector<16x64xbf16> to vector<16x64xf32>
    %c0_4 = arith.constant 0 : index
    %c0_5 = arith.constant 0 : index
    %c0_6 = arith.constant 0 : index
    %6 = vector.load %arg3[%c0_4, %c0_5, %c0_6] : memref<1x16x64xbf16, #tpu.memory_space<vmem>>, vector<1x16x64xbf16>
    %7 = vector.shape_cast %6 : vector<1x16x64xbf16> to vector<16x64xbf16>
    %8 = arith.extf %7 : vector<16x64xbf16> to vector<16x64xf32>
    %c0_7 = arith.constant 0 : index
    %c0_8 = arith.constant 0 : index
    %9 = vector.load %arg6[%c0_7, %c0_8] : memref<16x64xf32, #tpu.memory_space<vmem>>, vector<16x64xf32>
    %10 = arith.mulf %5, %9 : vector<16x64xf32>
    %c32_i32 = arith.constant 32 : i32
    %11 = tpu.dynamic_rotate %5 by %c32_i32 dim 1 : vector<16x64xf32>, i32 -> vector<16x64xf32>
    %c0_9 = arith.constant 0 : index
    %c0_10 = arith.constant 0 : index
    %12 = vector.load %arg7[%c0_9, %c0_10] : memref<16x64xf32, #tpu.memory_space<vmem>>, vector<16x64xf32>
    %13 = arith.mulf %11, %12 : vector<16x64xf32>
    %14 = arith.addf %10, %13 : vector<16x64xf32>
    %c0_11 = arith.constant 0 : index
    %c0_12 = arith.constant 0 : index
    %15 = vector.load %arg8[%c0_11, %c0_12] : memref<16x64xf32, #tpu.memory_space<vmem>>, vector<16x64xf32>
    %16 = arith.mulf %8, %15 : vector<16x64xf32>
    %c32_i32_13 = arith.constant 32 : i32
    %17 = tpu.dynamic_rotate %8 by %c32_i32_13 dim 1 : vector<16x64xf32>, i32 -> vector<16x64xf32>
    %c0_14 = arith.constant 0 : index
    %c0_15 = arith.constant 0 : index
    %18 = vector.load %arg9[%c0_14, %c0_15] : memref<16x64xf32, #tpu.memory_space<vmem>>, vector<16x64xf32>
    %19 = arith.mulf %17, %18 : vector<16x64xf32>
    %20 = arith.addf %16, %19 : vector<16x64xf32>
    %21 = arith.truncf %14 : vector<16x64xf32> to vector<16x64xbf16>
    %22 = arith.truncf %20 : vector<16x64xf32> to vector<16x64xbf16>
    %cst = arith.constant dense<0.000000e+00> : vector<16x16xf32>
    %23 = tpu.matmul %21, %22, %cst {dimension_numbers = #tpu.dot_dimension_numbers<[1], [1], [0], [0], [0, 0, 1, 0], [], []>} : vector<16x64xbf16>, vector<16x64xbf16>, vector<16x16xf32> -> vector<16x16xf32>
    %24 = tpu.iota {dimensions = array<i32: 0>} : vector<16x16xi32>
    %25 = tpu.iota {dimensions = array<i32: 1>} : vector<16x16xi32>
    %26 = arith.cmpi sle, %25, %24 : vector<16x16xi32>
    %c0_16 = arith.constant 0 : index
    %c0_17 = arith.constant 0 : index
    %c0_18 = arith.constant 0 : index
    %27 = vector.load %arg5[%c0_16, %c0_17, %c0_18] : memref<1x1x16xf32, #tpu.memory_space<vmem>>, vector<1x1x16xf32>
    %28 = vector.shape_cast %27 : vector<1x1x16xf32> to vector<1x16xf32>
    %cst_19 = arith.constant 0.000000e+00 : f32
    %29 = vector.broadcast %cst_19 : f32 to vector<1x16xf32>
    %30 = arith.cmpf ogt, %28, %29 : vector<1x16xf32>
    %31 = vector.broadcast %30 : vector<1x16xi1> to vector<16x16xi1>
    %32 = arith.andi %26, %31 : vector<16x16xi1>
    %cst_20 = arith.constant -1.000000e+09 : f32
    %33 = vector.broadcast %cst_20 : f32 to vector<16x16xf32>
    %34 = arith.select %32, %23, %33 : vector<16x16xi1>, vector<16x16xf32>
    %cst_21 = arith.constant dense<0xFF800000> : vector<16xf32>
    %35 = vector.multi_reduction <maximumf>, %34, %cst_21 [1] : vector<16x16xf32> to vector<16xf32>
    %36 = vector.shape_cast %35 : vector<16xf32> to vector<16x1xf32>
    %37 = vector.broadcast %36 : vector<16x1xf32> to vector<16x16xf32>
    %38 = arith.subf %34, %37 : vector<16x16xf32>
    %39 = math.exp %38 : vector<16x16xf32>
    %cst_22 = arith.constant dense<0.000000e+00> : vector<16xf32>
    %40 = vector.multi_reduction <add>, %39, %cst_22 [1] : vector<16x16xf32> to vector<16xf32>
    %41 = vector.shape_cast %40 : vector<16xf32> to vector<16x1xf32>
    %42 = tpu.reciprocal %41 {approx = true} : vector<16x1xf32> -> vector<16x1xf32>
    %43 = vector.broadcast %42 : vector<16x1xf32> to vector<16x16xf32>
    %44 = arith.mulf %39, %43 : vector<16x16xf32>
    %45 = arith.truncf %44 : vector<16x16xf32> to vector<16x16xbf16>
    %c0_23 = arith.constant 0 : index
    %c0_24 = arith.constant 0 : index
    %c0_25 = arith.constant 0 : index
    %46 = vector.load %arg4[%c0_23, %c0_24, %c0_25] : memref<1x16x64xbf16, #tpu.memory_space<vmem>>, vector<1x16x64xbf16>
    %47 = vector.shape_cast %46 : vector<1x16x64xbf16> to vector<16x64xbf16>
    %cst_26 = arith.constant dense<0.000000e+00> : vector<16x64xf32>
    %48 = tpu.matmul %45, %47, %cst_26 {dimension_numbers = #tpu.dot_dimension_numbers<[1], [0], [0], [1], [0, 0, 1, 1], [], []>} : vector<16x16xbf16>, vector<16x64xbf16>, vector<16x64xf32> -> vector<16x64xf32>
    %c0_27 = arith.constant 0 : index
    %c0_28 = arith.constant 0 : index
    %49 = vector.load %arg12[%c0_27, %c0_28] : memref<16x256xf32, #tpu.memory_space<vmem>>, vector<16x256xf32>
    %50 = arith.truncf %48 : vector<16x64xf32> to vector<16x64xbf16>
    %c0_29 = arith.constant 0 : index
    %c0_30 = arith.constant 0 : index
    %c0_31 = arith.constant 0 : index
    %51 = vector.load %arg10[%c0_29, %c0_30, %c0_31] : memref<1x64x256xbf16, #tpu.memory_space<vmem>>, vector<1x64x256xbf16>
    %52 = vector.shape_cast %51 : vector<1x64x256xbf16> to vector<64x256xbf16>
    %cst_32 = arith.constant dense<0.000000e+00> : vector<16x256xf32>
    %53 = tpu.matmul %50, %52, %cst_32 {dimension_numbers = #tpu.dot_dimension_numbers<[1], [0], [0], [1], [0, 0, 1, 1], [], []>} : vector<16x64xbf16>, vector<64x256xbf16>, vector<16x256xf32> -> vector<16x256xf32>
    %54 = arith.addf %49, %53 : vector<16x256xf32>
    %c0_33 = arith.constant 0 : index
    %c0_34 = arith.constant 0 : index
    %55 = vector.load %arg12[%c0_33, %c0_34] : memref<16x256xf32, #tpu.memory_space<vmem>>, vector<16x256xf32>
    tpu.vector_store %arg12[%c0_33, %c0_34], %54 {strides = array<i32>} : memref<16x256xf32, #tpu.memory_space<vmem>>, vector<16x256xf32>,
    %c3_i32 = arith.constant 3 : i32
    %56 = arith.cmpi eq, %arg1, %c3_i32 : i32
    %57 = arith.extui %56 : i1 to i32
    %c0_i32_35 = arith.constant 0 : i32
    %58 = arith.cmpi ne, %57, %c0_i32_35 : i32
    scf.if %58 {
      %c0_36 = arith.constant 0 : index
      %c0_37 = arith.constant 0 : index
      %59 = vector.load %arg12[%c0_36, %c0_37] : memref<16x256xf32, #tpu.memory_space<vmem>>, vector<16x256xf32>
      %60 = arith.truncf %59 : vector<16x256xf32> to vector<16x256xbf16>
      %c0_38 = arith.constant 0 : index
      %c0_39 = arith.constant 0 : index
      %c0_40 = arith.constant 0 : index
      %61 = vector.load %arg11[%c0_38, %c0_39, %c0_40] : memref<1x16x256xbf16, #tpu.memory_space<vmem>>, vector<1x16x256xbf16>
      %62 = vector.shape_cast %61 : vector<1x16x256xbf16> to vector<16x256xbf16>
      %63 = vector.shape_cast %60 : vector<16x256xbf16> to vector<1x16x256xbf16>
      tpu.vector_store %arg11[%c0_38, %c0_39, %c0_40], %63 {strides = array<i32>} : memref<1x16x256xbf16, #tpu.memory_space<vmem>>, vector<1x16x256xbf16>,
    } else {
    }
    return
  }
  func.func @transform_0(%arg0: i32, %arg1: i32) -> (i32, i32, i32, i32) {
    %c0_i32 = arith.constant 0 : i32
    %c0_i32_0 = arith.constant 0 : i32
    %c0_i32_1 = arith.constant 0 : i32
    return %arg0, %arg1, %c0_i32, %c0_i32_0 : i32, i32, i32, i32
  }
  func.func @transform_1(%arg0: i32, %arg1: i32) -> (i32, i32, i32) {
    %c0_i32 = arith.constant 0 : i32
    %c0_i32_0 = arith.constant 0 : i32
    %c0_i32_1 = arith.constant 0 : i32
    return %arg0, %c0_i32, %c0_i32_0 : i32, i32, i32
  }
  func.func @transform_2(%arg0: i32, %arg1: i32) -> (i32, i32, i32) {
    %c0_i32 = arith.constant 0 : i32
    %c0_i32_0 = arith.constant 0 : i32
    %c0_i32_1 = arith.constant 0 : i32
    return %arg0, %c0_i32, %c0_i32_0 : i32, i32, i32
  }
  func.func @transform_3(%arg0: i32, %arg1: i32) -> (i32, i32, i32) {
    %c0_i32 = arith.constant 0 : i32
    %c0_i32_0 = arith.constant 0 : i32
    %c0_i32_1 = arith.constant 0 : i32
    return %arg0, %c0_i32, %c0_i32_0 : i32, i32, i32
  }
  func.func @transform_4(%arg0: i32, %arg1: i32) -> (i32, i32) {
    %c0_i32 = arith.constant 0 : i32
    %c0_i32_0 = arith.constant 0 : i32
    %c0_i32_1 = arith.constant 0 : i32
    return %c0_i32, %c0_i32_0 : i32, i32
  }
  func.func @transform_5(%arg0: i32, %arg1: i32) -> (i32, i32) {
    %c0_i32 = arith.constant 0 : i32
    %c0_i32_0 = arith.constant 0 : i32
    %c0_i32_1 = arith.constant 0 : i32
    return %c0_i32, %c0_i32_0 : i32, i32
  }
  func.func @transform_6(%arg0: i32, %arg1: i32) -> (i32, i32) {
    %c0_i32 = arith.constant 0 : i32
    %c0_i32_0 = arith.constant 0 : i32
    %c0_i32_1 = arith.constant 0 : i32
    return %c0_i32, %c0_i32_0 : i32, i32
  }
  func.func @transform_7(%arg0: i32, %arg1: i32) -> (i32, i32) {
    %c0_i32 = arith.constant 0 : i32
    %c0_i32_0 = arith.constant 0 : i32
    %c0_i32_1 = arith.constant 0 : i32
    return %c0_i32, %c0_i32_0 : i32, i32
  }
  func.func @transform_8(%arg0: i32, %arg1: i32) -> (i32, i32, i32) {
    %c0_i32 = arith.constant 0 : i32
    %c0_i32_0 = arith.constant 0 : i32
    %c0_i32_1 = arith.constant 0 : i32
    return %arg1, %c0_i32, %c0_i32_0 : i32, i32, i32
  }
  func.func @transform_9(%arg0: i32, %arg1: i32) -> (i32, i32, i32) {
    %c0_i32 = arith.constant 0 : i32
    %c0_i32_0 = arith.constant 0 : i32
    %c0_i32_1 = arith.constant 0 : i32
    return %arg0, %c0_i32, %c0_i32_0 : i32, i32, i32
  }
}

module attributes {stable_mosaic.version = 11 : i64} {
  func.func @_ffn_kernel(%arg0: i32, %arg1: i32, %arg2: memref<32x256xbf16, #tpu.memory_space<vmem>>, %arg3: memref<32x256xbf16, #tpu.memory_space<vmem>>, %arg4: memref<32x256xf32, #tpu.memory_space<vmem>>, %arg5: memref<256x512xbf16, #tpu.memory_space<vmem>>, %arg6: memref<512x256xbf16, #tpu.memory_space<vmem>>, %arg7: memref<32x256xf32, #tpu.memory_space<vmem>>, %arg8: memref<32x256xf32, #tpu.memory_space<vmem>>) attributes {dimension_semantics = [#tpu.dimension_semantics<parallel>, #tpu.dimension_semantics<arbitrary>], iteration_bounds = array<i64: 1, 2>, scalar_prefetch = 0 : i64, scratch_operands = 1 : i64, tpu.core_type = #tpu.core_type<tc>, window_params = [{transform_indices = @transform_0, window_bounds = array<i64: 32, 256>}, {transform_indices = @transform_1, window_bounds = array<i64: 32, 256>}, {transform_indices = @transform_2, window_bounds = array<i64: 32, 256>}, {transform_indices = @transform_3, window_bounds = array<i64: 256, 512>}, {transform_indices = @transform_4, window_bounds = array<i64: 512, 256>}, {transform_indices = @transform_5, window_bounds = array<i64: 32, 256>}]} {
    %c0_i32 = arith.constant 0 : i32
    %0 = arith.cmpi eq, %arg1, %c0_i32 : i32
    %1 = arith.extui %0 : i1 to i32
    %c0_i32_0 = arith.constant 0 : i32
    %2 = arith.cmpi ne, %1, %c0_i32_0 : i32
    scf.if %2 {
      %c0_16 = arith.constant 0 : index
      %c0_17 = arith.constant 0 : index
      %28 = vector.load %arg4[%c0_16, %c0_17] : memref<32x256xf32, #tpu.memory_space<vmem>>, vector<32x256xf32>
      %c0_18 = arith.constant 0 : index
      %c0_19 = arith.constant 0 : index
      %29 = vector.load %arg3[%c0_18, %c0_19] : memref<32x256xbf16, #tpu.memory_space<vmem>>, vector<32x256xbf16>
      %30 = arith.extf %29 : vector<32x256xbf16> to vector<32x256xf32>
      %31 = arith.addf %28, %30 : vector<32x256xf32>
      %c0_20 = arith.constant 0 : index
      %c0_21 = arith.constant 0 : index
      %32 = vector.load %arg8[%c0_20, %c0_21] : memref<32x256xf32, #tpu.memory_space<vmem>>, vector<32x256xf32>
      tpu.vector_store %arg8[%c0_20, %c0_21], %31 {strides = array<i32>} : memref<32x256xf32, #tpu.memory_space<vmem>>, vector<32x256xf32>,
    } else {
    }
    %c0 = arith.constant 0 : index
    %c0_1 = arith.constant 0 : index
    %3 = vector.load %arg2[%c0, %c0_1] : memref<32x256xbf16, #tpu.memory_space<vmem>>, vector<32x256xbf16>
    %c0_2 = arith.constant 0 : index
    %c0_3 = arith.constant 0 : index
    %4 = vector.load %arg5[%c0_2, %c0_3] : memref<256x512xbf16, #tpu.memory_space<vmem>>, vector<256x512xbf16>
    %cst = arith.constant dense<0.000000e+00> : vector<32x512xf32>
    %5 = tpu.matmul %3, %4, %cst {dimension_numbers = #tpu.dot_dimension_numbers<[1], [0], [0], [1], [0, 0, 1, 1], [], []>} : vector<32x256xbf16>, vector<256x512xbf16>, vector<32x512xf32> -> vector<32x512xf32>
    %6 = arith.mulf %5, %5 : vector<32x512xf32>
    %7 = arith.mulf %5, %6 : vector<32x512xf32>
    %cst_4 = arith.constant 4.471500e-02 : f32
    %8 = vector.broadcast %cst_4 : f32 to vector<32x512xf32>
    %9 = arith.mulf %8, %7 : vector<32x512xf32>
    %10 = arith.addf %5, %9 : vector<32x512xf32>
    %cst_5 = arith.constant 0.797884583 : f32
    %11 = vector.broadcast %cst_5 : f32 to vector<32x512xf32>
    %12 = arith.mulf %11, %10 : vector<32x512xf32>
    %13 = math.tanh %12 : vector<32x512xf32>
    %cst_6 = arith.constant 1.000000e+00 : f32
    %14 = vector.broadcast %cst_6 : f32 to vector<32x512xf32>
    %15 = arith.addf %14, %13 : vector<32x512xf32>
    %cst_7 = arith.constant 5.000000e-01 : f32
    %16 = vector.broadcast %cst_7 : f32 to vector<32x512xf32>
    %17 = arith.mulf %16, %15 : vector<32x512xf32>
    %18 = arith.mulf %5, %17 : vector<32x512xf32>
    %c0_8 = arith.constant 0 : index
    %c0_9 = arith.constant 0 : index
    %19 = vector.load %arg8[%c0_8, %c0_9] : memref<32x256xf32, #tpu.memory_space<vmem>>, vector<32x256xf32>
    %20 = arith.truncf %18 : vector<32x512xf32> to vector<32x512xbf16>
    %c0_10 = arith.constant 0 : index
    %c0_11 = arith.constant 0 : index
    %21 = vector.load %arg6[%c0_10, %c0_11] : memref<512x256xbf16, #tpu.memory_space<vmem>>, vector<512x256xbf16>
    %cst_12 = arith.constant dense<0.000000e+00> : vector<32x256xf32>
    %22 = tpu.matmul %20, %21, %cst_12 {dimension_numbers = #tpu.dot_dimension_numbers<[1], [0], [0], [1], [0, 0, 1, 1], [], []>} : vector<32x512xbf16>, vector<512x256xbf16>, vector<32x256xf32> -> vector<32x256xf32>
    %23 = arith.addf %19, %22 : vector<32x256xf32>
    %c0_13 = arith.constant 0 : index
    %c0_14 = arith.constant 0 : index
    %24 = vector.load %arg8[%c0_13, %c0_14] : memref<32x256xf32, #tpu.memory_space<vmem>>, vector<32x256xf32>
    tpu.vector_store %arg8[%c0_13, %c0_14], %23 {strides = array<i32>} : memref<32x256xf32, #tpu.memory_space<vmem>>, vector<32x256xf32>,
    %c1_i32 = arith.constant 1 : i32
    %25 = arith.cmpi eq, %arg1, %c1_i32 : i32
    %26 = arith.extui %25 : i1 to i32
    %c0_i32_15 = arith.constant 0 : i32
    %27 = arith.cmpi ne, %26, %c0_i32_15 : i32
    scf.if %27 {
      %c0_16 = arith.constant 0 : index
      %c0_17 = arith.constant 0 : index
      %28 = vector.load %arg8[%c0_16, %c0_17] : memref<32x256xf32, #tpu.memory_space<vmem>>, vector<32x256xf32>
      %c0_18 = arith.constant 0 : index
      %c0_19 = arith.constant 0 : index
      %29 = vector.load %arg7[%c0_18, %c0_19] : memref<32x256xf32, #tpu.memory_space<vmem>>, vector<32x256xf32>
      tpu.vector_store %arg7[%c0_18, %c0_19], %28 {strides = array<i32>} : memref<32x256xf32, #tpu.memory_space<vmem>>, vector<32x256xf32>,
    } else {
    }
    return
  }
  func.func @transform_0(%arg0: i32, %arg1: i32) -> (i32, i32) {
    %c0_i32 = arith.constant 0 : i32
    %c0_i32_0 = arith.constant 0 : i32
    return %arg0, %c0_i32 : i32, i32
  }
  func.func @transform_1(%arg0: i32, %arg1: i32) -> (i32, i32) {
    %c0_i32 = arith.constant 0 : i32
    %c0_i32_0 = arith.constant 0 : i32
    return %arg0, %c0_i32 : i32, i32
  }
  func.func @transform_2(%arg0: i32, %arg1: i32) -> (i32, i32) {
    %c0_i32 = arith.constant 0 : i32
    %c0_i32_0 = arith.constant 0 : i32
    return %arg0, %c0_i32 : i32, i32
  }
  func.func @transform_3(%arg0: i32, %arg1: i32) -> (i32, i32) {
    %c0_i32 = arith.constant 0 : i32
    %c0_i32_0 = arith.constant 0 : i32
    return %c0_i32, %arg1 : i32, i32
  }
  func.func @transform_4(%arg0: i32, %arg1: i32) -> (i32, i32) {
    %c0_i32 = arith.constant 0 : i32
    %c0_i32_0 = arith.constant 0 : i32
    return %arg1, %c0_i32 : i32, i32
  }
  func.func @transform_5(%arg0: i32, %arg1: i32) -> (i32, i32) {
    %c0_i32 = arith.constant 0 : i32
    %c0_i32_0 = arith.constant 0 : i32
    return %arg0, %c0_i32 : i32, i32
  }
}

module attributes {stable_mosaic.version = 11 : i64} {
  func.func @_layernorm_kernel(%arg0: i32, %arg1: memref<2x256xf32, #tpu.memory_space<vmem>>, %arg2: memref<1x256xf32, #tpu.memory_space<vmem>>, %arg3: memref<1x256xf32, #tpu.memory_space<vmem>>, %arg4: memref<2x256xf32, #tpu.memory_space<vmem>>) attributes {dimension_semantics = [#tpu.dimension_semantics<arbitrary>], iteration_bounds = array<i64: 1>, scalar_prefetch = 0 : i64, scratch_operands = 0 : i64, tpu.core_type = #tpu.core_type<tc>, window_params = [{pipeline_mode = #tpu.pipeline_mode<synchronous>, transform_indices = @transform_0, window_bounds = array<i64: 2, 256>}, {pipeline_mode = #tpu.pipeline_mode<synchronous>, transform_indices = @transform_1, window_bounds = array<i64: 1, 256>}, {pipeline_mode = #tpu.pipeline_mode<synchronous>, transform_indices = @transform_2, window_bounds = array<i64: 1, 256>}, {pipeline_mode = #tpu.pipeline_mode<synchronous>, transform_indices = @transform_3, window_bounds = array<i64: 2, 256>}]} {
    %c0 = arith.constant 0 : index
    %c0_0 = arith.constant 0 : index
    %0 = vector.load %arg1[%c0, %c0_0] : memref<2x256xf32, #tpu.memory_space<vmem>>, vector<2x256xf32>
    %cst = arith.constant dense<0.000000e+00> : vector<2xf32>
    %1 = vector.multi_reduction <add>, %0, %cst [1] : vector<2x256xf32> to vector<2xf32>
    %2 = vector.shape_cast %1 : vector<2xf32> to vector<2x1xf32>
    %cst_1 = arith.constant 2.560000e+02 : f32
    %3 = vector.broadcast %cst_1 : f32 to vector<2x1xf32>
    %4 = arith.divf %2, %3 : vector<2x1xf32>
    %5 = vector.broadcast %4 : vector<2x1xf32> to vector<2x256xf32>
    %6 = arith.subf %0, %5 : vector<2x256xf32>
    %7 = arith.mulf %6, %6 : vector<2x256xf32>
    %cst_2 = arith.constant dense<0.000000e+00> : vector<2xf32>
    %8 = vector.multi_reduction <add>, %7, %cst_2 [1] : vector<2x256xf32> to vector<2xf32>
    %9 = vector.shape_cast %8 : vector<2xf32> to vector<2x1xf32>
    %cst_3 = arith.constant 2.560000e+02 : f32
    %10 = vector.broadcast %cst_3 : f32 to vector<2x1xf32>
    %11 = arith.divf %9, %10 : vector<2x1xf32>
    %cst_4 = arith.constant 9.99999974E-6 : f32
    %12 = vector.broadcast %cst_4 : f32 to vector<2x1xf32>
    %13 = arith.addf %11, %12 : vector<2x1xf32>
    %14 = math.rsqrt %13 : vector<2x1xf32>
    %15 = vector.broadcast %14 : vector<2x1xf32> to vector<2x256xf32>
    %16 = arith.mulf %6, %15 : vector<2x256xf32>
    %c0_5 = arith.constant 0 : index
    %c0_6 = arith.constant 0 : index
    %17 = vector.load %arg2[%c0_5, %c0_6] : memref<1x256xf32, #tpu.memory_space<vmem>>, vector<1x256xf32>
    %18 = vector.broadcast %17 : vector<1x256xf32> to vector<2x256xf32>
    %19 = arith.mulf %16, %18 : vector<2x256xf32>
    %c0_7 = arith.constant 0 : index
    %c0_8 = arith.constant 0 : index
    %20 = vector.load %arg3[%c0_7, %c0_8] : memref<1x256xf32, #tpu.memory_space<vmem>>, vector<1x256xf32>
    %21 = vector.broadcast %20 : vector<1x256xf32> to vector<2x256xf32>
    %22 = arith.addf %19, %21 : vector<2x256xf32>
    %c0_9 = arith.constant 0 : index
    %c0_10 = arith.constant 0 : index
    %23 = vector.load %arg4[%c0_9, %c0_10] : memref<2x256xf32, #tpu.memory_space<vmem>>, vector<2x256xf32>
    tpu.vector_store %arg4[%c0_9, %c0_10], %22 {strides = array<i32>} : memref<2x256xf32, #tpu.memory_space<vmem>>, vector<2x256xf32>,
    return
  }
  func.func @transform_0(%arg0: i32) -> (i32, i32) {
    %c0_i32 = arith.constant 0 : i32
    %c0_i32_0 = arith.constant 0 : i32
    %c0_i32_1 = arith.constant 0 : i32
    return %c0_i32, %c0_i32_0 : i32, i32
  }
  func.func @transform_1(%arg0: i32) -> (i32, i32) {
    %c0_i32 = arith.constant 0 : i32
    %c0_i32_0 = arith.constant 0 : i32
    %c0_i32_1 = arith.constant 0 : i32
    return %c0_i32, %c0_i32_0 : i32, i32
  }
  func.func @transform_2(%arg0: i32) -> (i32, i32) {
    %c0_i32 = arith.constant 0 : i32
    %c0_i32_0 = arith.constant 0 : i32
    %c0_i32_1 = arith.constant 0 : i32
    return %c0_i32, %c0_i32_0 : i32, i32
  }
  func.func @transform_3(%arg0: i32) -> (i32, i32) {
    %c0_i32 = arith.constant 0 : i32
    %c0_i32_0 = arith.constant 0 : i32
    %c0_i32_1 = arith.constant 0 : i32
    return %c0_i32, %c0_i32_0 : i32, i32
  }
}

module attributes {stable_mosaic.version = 11 : i64} {
  func.func @_matmul_kernel(%arg0: i32, %arg1: i32, %arg2: i32, %arg3: memref<8x256xf32, #tpu.memory_space<vmem>>, %arg4: memref<256x256xbf16, #tpu.memory_space<vmem>>, %arg5: memref<8x256xf32, #tpu.memory_space<vmem>>, %arg6: memref<8x256xf32, #tpu.memory_space<vmem>>) attributes {dimension_semantics = [#tpu.dimension_semantics<parallel>, #tpu.dimension_semantics<parallel>, #tpu.dimension_semantics<arbitrary>], iteration_bounds = array<i64: 1, 1, 1>, scalar_prefetch = 0 : i64, scratch_operands = 1 : i64, tpu.core_type = #tpu.core_type<tc>, window_params = [{transform_indices = @transform_0, window_bounds = array<i64: 8, 256>}, {transform_indices = @transform_1, window_bounds = array<i64: 256, 256>}, {transform_indices = @transform_2, window_bounds = array<i64: 8, 256>}]} {
    %c0_i32 = arith.constant 0 : i32
    %0 = arith.cmpi eq, %arg2, %c0_i32 : i32
    %1 = arith.extui %0 : i1 to i32
    %c0_i32_0 = arith.constant 0 : i32
    %2 = arith.cmpi ne, %1, %c0_i32_0 : i32
    scf.if %2 {
      %cst_10 = arith.constant 0.000000e+00 : f32
      %13 = vector.broadcast %cst_10 : f32 to vector<8x256xf32>
      %c0_11 = arith.constant 0 : index
      %c0_12 = arith.constant 0 : index
      %14 = vector.load %arg6[%c0_11, %c0_12] : memref<8x256xf32, #tpu.memory_space<vmem>>, vector<8x256xf32>
      tpu.vector_store %arg6[%c0_11, %c0_12], %13 {strides = array<i32>} : memref<8x256xf32, #tpu.memory_space<vmem>>, vector<8x256xf32>,
    } else {
    }
    %c0 = arith.constant 0 : index
    %c0_1 = arith.constant 0 : index
    %3 = vector.load %arg6[%c0, %c0_1] : memref<8x256xf32, #tpu.memory_space<vmem>>, vector<8x256xf32>
    %c0_2 = arith.constant 0 : index
    %c0_3 = arith.constant 0 : index
    %4 = vector.load %arg3[%c0_2, %c0_3] : memref<8x256xf32, #tpu.memory_space<vmem>>, vector<8x256xf32>
    %5 = arith.truncf %4 : vector<8x256xf32> to vector<8x256xbf16>
    %c0_4 = arith.constant 0 : index
    %c0_5 = arith.constant 0 : index
    %6 = vector.load %arg4[%c0_4, %c0_5] : memref<256x256xbf16, #tpu.memory_space<vmem>>, vector<256x256xbf16>
    %cst = arith.constant dense<0.000000e+00> : vector<8x256xf32>
    %7 = tpu.matmul %5, %6, %cst {dimension_numbers = #tpu.dot_dimension_numbers<[1], [0], [0], [1], [0, 0, 1, 1], [], []>} : vector<8x256xbf16>, vector<256x256xbf16>, vector<8x256xf32> -> vector<8x256xf32>
    %8 = arith.addf %3, %7 : vector<8x256xf32>
    %c0_6 = arith.constant 0 : index
    %c0_7 = arith.constant 0 : index
    %9 = vector.load %arg6[%c0_6, %c0_7] : memref<8x256xf32, #tpu.memory_space<vmem>>, vector<8x256xf32>
    tpu.vector_store %arg6[%c0_6, %c0_7], %8 {strides = array<i32>} : memref<8x256xf32, #tpu.memory_space<vmem>>, vector<8x256xf32>,
    %c0_i32_8 = arith.constant 0 : i32
    %10 = arith.cmpi eq, %arg2, %c0_i32_8 : i32
    %11 = arith.extui %10 : i1 to i32
    %c0_i32_9 = arith.constant 0 : i32
    %12 = arith.cmpi ne, %11, %c0_i32_9 : i32
    scf.if %12 {
      %c0_10 = arith.constant 0 : index
      %c0_11 = arith.constant 0 : index
      %13 = vector.load %arg6[%c0_10, %c0_11] : memref<8x256xf32, #tpu.memory_space<vmem>>, vector<8x256xf32>
      %c0_12 = arith.constant 0 : index
      %c0_13 = arith.constant 0 : index
      %14 = vector.load %arg5[%c0_12, %c0_13] : memref<8x256xf32, #tpu.memory_space<vmem>>, vector<8x256xf32>
      tpu.vector_store %arg5[%c0_12, %c0_13], %13 {strides = array<i32>} : memref<8x256xf32, #tpu.memory_space<vmem>>, vector<8x256xf32>,
    } else {
    }
    return
  }
  func.func @transform_0(%arg0: i32, %arg1: i32, %arg2: i32) -> (i32, i32) {
    %c0_i32 = arith.constant 0 : i32
    return %arg0, %arg2 : i32, i32
  }
  func.func @transform_1(%arg0: i32, %arg1: i32, %arg2: i32) -> (i32, i32) {
    %c0_i32 = arith.constant 0 : i32
    return %arg2, %arg1 : i32, i32
  }
  func.func @transform_2(%arg0: i32, %arg1: i32, %arg2: i32) -> (i32, i32) {
    %c0_i32 = arith.constant 0 : i32
    return %arg0, %arg1 : i32, i32
  }
}

</mosaic_0001>

<bundles_post_ra>
// kernel: falcon_forward.14
= control target key start
LH: loop header
LB: loop body
LE: loop exit
PB: predicated region body
PF: predicated region fallthrough
CT: control target
= control target key end

     0   :  { %v19_v0 = vlaneseq  ;;  %v123_v1 = vmov 1983009808   ;;  %vm26_vm0 = vcmask 1041408   ;;  %v124_v12 = vmov 269488144   ;;  %s161_s0 = inlined_call_operand.vmem [shape: f32[2,256], index: 0, kind: input, shape index: {}]   ;;  %s162_s1 = inlined_call_operand.vmem [shape: f32[1,256], index: 1, kind: input, shape index: {}]   ;;  %s163_s2 = inlined_call_operand.vmem [shape: f32[1,256], index: 2, kind: input, shape index: {}]   ;;  %s164_s3 = inlined_call_operand.vmem [shape: f32[2,256], index: 3, kind: output, shape index: {}]  }
   0x1   :  { %v17_v2 = vunpack.c.l.s4 %v123_v1  ;;  %v14_v5 = vld [vmem:[%s161_s0] sm:$0xf]  ;;  %v36_v13 = vunpack.c.l.s4 %v124_v12 }
   0x2   :  { %v20_v3 = vshrl.u32 %v19_v0, 7  ;;  %v74_v31 = vld [vmem:[%s162_s1] sm:$0x3] }
   0x3   :  { %v18_v4 = vunpack.c.0.s8 %v17_v2  ;;  %v37_v14 = vunpack.c.0.s8 %v36_v13  ;;  %v94_v32 = vld [vmem:[%s163_s2] sm:$0x3] }
   0x4   :  { %v78_v29 = vsub.s32 0, %v20_v3  ;;  %v82_v30 = vsub.s32 1, %v20_v3 }
   0x5   :  { %v21_v6 = vsub.s32 %v18_v4, %v20_v3  ;;  %v40_v15 = vsub.s32 %v37_v14, %v20_v3 }
   0x6   :  { %v79_v33 = vrot.slane %v74_v31, %v78_v29  ;;  %v83_v34 = vrot.slane %v74_v31, %v82_v30  ;;  %v99_v35 = vrot.slane %v94_v32, %v78_v29  ;;  %v103_v36 = vrot.slane %v94_v32, %v82_v30 }
   0x7   :  { %v22_v7 = vrot.slane %v14_v5, %v21_v6 }
   0x8   :  { %v84_v37 = vcombine.low %v79_v33, %v83_v34  ;;  %v104_v38 = vcombine.low %v99_v35, %v103_v36 }
   0x9   :  { %v23_v8 = vcombine.high %v22_v7, %v22_v7  ;;  %v27_v9 = vsel %vm26_vm0, %v22_v7, 0.0 }
   0xa   :  { %v91_v40 = vrot.slane %v84_v37, %v21_v6  ;;  %v111_v42 = vrot.slane %v104_v38, %v21_v6 }
   0xb   :  { %v28_v10 = vsel %vm26_vm0, %v23_v8, 0.0 }
   0xc   :  { %v29_v11 = vadd.f32 %v28_v10, %v27_v9 }
   0xe   :  { %30 = vadd.xlane.f32.xlu0 %v29_v11 }
  0x97   :  { %v31_v16 = vpop.xlane.xlu0 %30 }
  0x98   :  { %v33_v17 = vmul.f32 0.00390625, %v31_v16 }
  0x9a   :  { %v41_v18 = vrot.slane %v33_v17, %v40_v15 }
  0x9c   :  { %v43_v19 = vsub.f32 %v14_v5, %v41_v18 }
  0x9e   :  { %v44_v20 = vmul.f32 %v43_v19, %v43_v19 }
  0xa0   :  { %v52_v21 = vrot.slane %v44_v20, %v21_v6 }
  0xa2   :  { %v53_v22 = vcombine.high %v52_v21, %v52_v21  ;;  %v56_v23 = vsel %vm26_vm0, %v52_v21, 0.0 }
  0xa4   :  { %v57_v24 = vsel %vm26_vm0, %v53_v22, 0.0 }
  0xa5   :  { %v58_v25 = vadd.f32 %v57_v24, %v56_v23 }
  0xa7   :  { %59 = vadd.xlane.f32.xlu0 %v58_v25 }
 0x130   :  { %v60_v26 = vpop.xlane.xlu0 %59 }
 0x131   :  { %v61_v27 = vmul.f32 0.00390625, %v60_v26 }
 0x133   :  { %v62_v28 = vadd.f32 1e-05, %v61_v27 }
 0x135   :  { %121 = vrsqrt.f32 %v62_v28 }
 0x142   :  { %v122_v39 = vpop.eup %121 }
 0x143   :  { %v71_v41 = vrot.slane %v122_v39, %v40_v15 }
 0x145   :  { %v73_v43 = vmul.f32 %v71_v41, %v43_v19 }
 0x147   :  { %v93_v44 = vmul.f32 %v91_v40, %v73_v43 }
 0x149   :  { %v113_v45 = vadd.f32 %v111_v42, %v93_v44 }
 0x14b   :  { %114 = vst [vmem:[%s164_s3] sm:$0xf] %v113_v45 }

// kernel: falcon_forward.9
= control target key start
LH: loop header
LB: loop body
LE: loop exit
PB: predicated region body
PF: predicated region fallthrough
CT: control target
= control target key end

     0   :  { %s1170_s30 = smov 0   ;;  %s1172_s10 = smov 0   ;;  %s1333_s0 = inlined_call_operand.vmem [shape: bf16[2,4,16,64], index: 0, kind: input, shape index: {}]   ;;  %s1334_s1 = inlined_call_operand.vmem [shape: bf16[2,16,64], index: 1, kind: input, shape index: {}]   ;;  %s1335_s2 = inlined_call_operand.vmem [shape: bf16[2,16,64], index: 2, kind: input, shape index: {}]   ;;  %s1336_s3 = inlined_call_operand.vmem [shape: f32[2,1,16], index: 3, kind: input, shape index: {}]   ;;  %s1337_s4 = inlined_call_operand.vmem [shape: f32[16,64], index: 4, kind: input, shape index: {}]   ;;  %s1338_s5 = inlined_call_operand.vmem [shape: f32[16,64], index: 5, kind: input, shape index: {}]   ;;  %s1339_s6 = inlined_call_operand.vmem [shape: f32[16,64], index: 6, kind: input, shape index: {}]   ;;  %s1340_s7 = inlined_call_operand.vmem [shape: f32[16,64], index: 7, kind: input, shape index: {}]   ;;  %s1341_s8 = inlined_call_operand.vmem [shape: bf16[4,64,256], index: 8, kind: input, shape index: {}]   ;;  %s1342_s9 = inlined_call_operand.vmem [shape: bf16[2,16,256], index: 9, kind: output, shape index: {}]  }
   0x1   :  { %1346 = sst [smem:[#allocation8_spill]] %s1336_s3  ;;  %s1174_s11 = smov 0  }
   0x2   :  { %s1176_s12 = smov 0   ;;  %s1178_s13 = smov 0  }
   0x3 LB: > { %1347 = sst [smem:[#allocation3_spill]] %s1103_s11  ;;  %s28_s14 = sadd.s32 1, %s1103_s11  ;;  %s1111_s13 = sphi %s1178_s13, %s19_s13   ;;  %s1107_s12 = sphi %s1176_s12, %s1359_s12   ;;  %s1103_s11 = sphi %s1174_s11, %s1358_s11   ;;  %s1099_s10 = sphi %s1172_s10, %s1357_s10   ;;  %s1095_s30 = sphi %s1170_s30, %s1356_s30  }
   0x4   : > { %1348 = sst [smem:[#allocation4_spill]] %s1107_s12  ;;  %s31_s15 = sadd.s32 1, %s1107_s12 }
   0x5   : > { %1349 = sst [smem:[#allocation5_spill]] %s1111_s13  ;;  %p29_p0 = scmp.ge.s32.totalorder %s28_s14, 4 }
   0x6   : > { %p925_p1 = scmp.ge.s32.totalorder %s1111_s13, 1  ;;  %p343_p2 = scmp.lt.s32.totalorder %s1111_s13, 9 }
   0x7   : > { %s1361_s14 = smov (%p29_p0, %s28_s14), 0  ;;  %s1363_s15 = smov (!%p29_p0, %s31_s15), %s1107_s12 }
   0x8   : > { %1350 = sst [smem:[#allocation6_spill]] %s1361_s14  ;;  %p344_p3 = pnand %p925_p1, %p343_p2 }
   0x9   : > { %p33_p4 = scmp.ge.s32.totalorder %s1363_s15, 2  ;;  %p401_p5 = scmp.lt.s32.totalorder (!%p344_p3), %s1099_s10, 1 }
   0xa   : > { %347 = sbr.rel (%p344_p3) target bundleno = 1326 (0x52e), region = 56  ;;  %p403_p6 = scmp.lt.s32.totalorder (!%p344_p3), %s1095_s30, 3 }
   0xb   : > { %s1365_s15 = smov (%p33_p4, %s1363_s15), 0  ;;  %p937_p7 = scmp.ne.s32.totalorder (!%p344_p3), %s1095_s30, 0 }
   0xc   : > { %1351 = sst [smem:[#allocation7_spill]] %s1365_s15 }
   0xf   : > { %s1367_s10 = smov (!%p401_p5, %s1099_s10), 1 }
  0x10   : > { %s404_s16 = scalar_select %p403_p6, %s1095_s30, 3 }
  0x11   : > { %s1207_s17 = sshll.u32 %s1367_s10, 3  ;;  %s958_s13 = sshll.u32 %s1367_s10, 4 }
  0x12   : > { %s926_s21 = sshll.u32 %s404_s16, 1  ;;  %s414_s24 = scalar_lea.vmem %s1334_s1, %s1207_s17 }
  0x13   : > { %s407_s25 = sadd.s32 %s1207_s17, %s926_s21  ;;  %s419_s28 = scalar_lea.vmem %s1335_s2, %s1207_s17 }
  0x14   : > { %s928_s29 = sshll.u32 %s407_s25, 2  ;;  %s957_s15 = sshll.u32 %s404_s16, 6 }
  0x15   : > { %s409_s18 = scalar_lea.vmem %s1333_s0, %s928_s29  ;;  %s1228_s20 = scalar_lea.vmem %s1341_s8, %s957_s15 }
  0x16   : > { %s1234_s21 = scalar_lea.vmem %s1342_s9, %s958_s13  ;;  %437 = sbr.rel (%p937_p7) target bundleno = 30 (0x1e), region = 60 }
  0x1b   : > { %v1113_v0 = vmov 0.0  }
  0x1c   : > { %438 = vst [vmem:[#allocation2 + $0x10] sm:$0xff] %v1113_v0  ;;  %439 = vst [vmem:[#allocation2] sm:$0xff] %v1113_v0 }
  0x1d   : > { %440 = vst [vmem:[#allocation2 + $0x18] sm:$0xff] %v1113_v0  ;;  %441 = vst [vmem:[#allocation2 + $0x8] sm:$0xff] %v1113_v0 }
  0x1e PF: > { %v966_v1 = vld [vmem:[%s414_s24] sm:$0xff]   ;;  %s1114_s3 = smov 64   ;;  %v506_v9 = vld [vmem:[%s1340_s7 + $0x8] sm:$0xff]  ;;  %s1115_s13 = smov 32   ;;  %vm454_vm0 = vcmask 1048064   ;;  %v1116_v25 = vmov 0.0   ;;  %v577_v0 = vlaneseq }
  0x1f   : > { %v962_v2 = vld [vmem:[%s409_s18] sm:$0xff]   ;;  %v1237_v3 = vunpack.c.l.bf16 %v966_v1  ;;  %v968_v4 = vunpack.c.h.bf16 %v966_v1  ;;  %v468_v24 = vld [vmem:[%s1338_s5 + $0x8] sm:$0xff]  ;;  %973 = vmatprep.subr.bf16.mxu0 %v1116_v25  ;;  %vm1117_vm1 = vmmov 0   ;;  %s1118_s26 = smov 96   ;;  %vm529_vm2 = vcmask 523264   ;;  %s1353_s15 = sld [smem:[#allocation8_spill]] }
  0x20   : > { %v1239_v5 = vunpack.c.l.bf16 %v962_v2  ;;  %v1241_v6 = vunpack.c.h.bf16 %v962_v2  ;;  %v467_v10 = vld [vmem:[%s1338_s5] sm:$0xff]  ;;  %975 = vmatprep.mubr.msk.bf16.mxu0 %vm1117_vm1, %v1116_v25  ;;  %v490_v44 = vld [vmem:[%s1339_s6 + $0x8] sm:$0xff]  ;;  %v1119_v63 = vmov 0   ;;  %v578_v2 = vshrl.u32 %v577_v0, 7  ;;  %p950_p8 = scmp.ne.s32.totalorder %s1095_s30, 3 }
  0x21   : > { %v1032_v7 = vpack.i.bf16 %v968_v4, %v1237_v3  ;;  %v505_v20 = vld [vmem:[%s1340_s7] sm:$0xff]  ;;  %v492_v46 = vmul.f32 %v968_v4, %v490_v44  ;;  %v451_v53 = vld [vmem:[%s1337_s4 + $0x8] sm:$0xff]  ;;  %760 = vmatprep.mubr.bf16.mxu1 %v1119_v63  ;;  %vm596_vm7 = vcmask 130048  }
  0x22   : > { %v1037_v8 = vpack.i.bf16 %v1241_v6, %v1239_v5  ;;  %v489_v45 = vld [vmem:[%s1339_s6] sm:$0xff]  ;;  %v453_v57 = vmul.f32 %v1241_v6, %v451_v53 }
  0x23   : > { %1033 = vrot.lane.b32.xlu0 %v1032_v7, %s1114_s3  ;;  %v491_v47 = vmul.f32 %v1237_v3, %v489_v45  ;;  %v450_v52 = vld [vmem:[%s1337_s4] sm:$0xff]  ;;  %v579_v7 = vadd.s32 8, %v578_v2 }
  0x24   : > { %v452_v55 = vmul.f32 %v1239_v5, %v450_v52  ;;  %v674_v52 = vld [vmem:[#allocation2 + $0x18] sm:$0xff] }
  0x25   : > { %s1354_s16 = scalar_lea.vmem %s1353_s15, %s1367_s10 }
  0x26   : > { %v584_v1 = vld [vmem:[%s1354_s16] sm:$0x1] }
  0x27   : > { %1038 = vrot.lane.b32.xlu0 %v1037_v8, %s1114_s3  ;;  %vm585_vm3 = vcmp.gt.f32.partialorder %v584_v1, 0.0 }
  0x2b   : > { %511 = vrot.lane.b32.xlu0 %v506_v9, %s1115_s13 }
  0x2f   : > { %471 = vrot.lane.b32.xlu0 %v467_v10, %s1115_s13 }
  0x95   : > { %v1034_v11 = vpop.permute.xlu0 %1033 }
  0x96   : > { %v1036_v12 = vunpack.i.h.bf16 %v1034_v11  ;;  %v1035_v13 = vunpack.i.l.bf16 %v1034_v11 }
  0x98   : > { %v495_v14 = vsel %vm454_vm0, %v1035_v13, %v1237_v3  ;;  %v498_v15 = vsel %vm454_vm0, %v1036_v12, %v968_v4 }
  0x99   : > { %v1042_v16 = vpack.i.bf16 %v498_v15, %v495_v14  ;;  %v1039_v17 = vpop.permute.xlu0 %1038 }
  0x9a   : > { %v1041_v18 = vunpack.i.h.bf16 %v1039_v17  ;;  %v1040_v19 = vunpack.i.l.bf16 %v1039_v17 }
  0x9b   : > { %1043 = vrot.lane.b32.xlu1 %v1042_v16, %s1114_s3 }
  0x9c   : > { %v457_v21 = vsel %vm454_vm0, %v1040_v19, %v1239_v5  ;;  %v460_v22 = vsel %vm454_vm0, %v1041_v18, %v1241_v6 }
  0x9d   : > { %v1047_v23 = vpack.i.bf16 %v460_v22, %v457_v21  ;;  %v512_v29 = vpop.permute.xlu0 %511 }
  0x9f   : > { %509 = vrot.lane.b32.xlu1 %v505_v20, %s1115_s13 }
  0xa1   : > { %v472_v38 = vpop.permute.xlu0 %471 }
  0xa3   : > { %1048 = vrot.lane.b32.xlu1 %v1047_v23, %s1114_s3 }
  0xa7   : > { %473 = vrot.lane.b32.xlu1 %v468_v24, %s1115_s13 }
 0x10d   : > { %v1044_v26 = vpop.permute.xlu1 %1043 }
 0x10e   : > { %v1046_v27 = vunpack.i.h.bf16 %v1044_v26  ;;  %v1045_v28 = vunpack.i.l.bf16 %v1044_v26  ;;  %v1052_v26 = vld [vmem:[%s419_s28] sm:$0xff]  }
 0x110   : > { %v504_v30 = vsel %vm454_vm0, %v1046_v27, %v968_v4  ;;  %v503_v31 = vsel %vm454_vm0, %v1045_v28, %v1237_v3  ;;  %v589_v3 = vsub.s32 0, %v578_v2  ;;  %v586_v4 = vsel %vm585_vm3, 1, %v1119_v63  ;;  %v1053_v27 = vld [vmem:[%s1228_s20 + $0x34] ss:$8 sps:$4 sm:$0xff]   ;;  %v1055_v28 = vld [vmem:[%s1228_s20 + $0x30] ss:$8 sps:$4 sm:$0xff]  }
 0x111   : > { %v516_v32 = vmul.f32 %v512_v29, %v504_v30  ;;  %v510_v33 = vpop.permute.xlu1 %509  ;;  %v1056_v29 = vld [vmem:[%s1228_s20 + $0x24] ss:$8 sps:$4 sm:$0xff]   ;;  %736 = vmatprep.subr.bf16.mxu1 %v1053_v27  ;;  %v1058_v30 = vld [vmem:[%s1228_s20 + $0x20] ss:$8 sps:$4 sm:$0xff]  }
 0x112   : > { %v515_v34 = vmul.f32 %v510_v33, %v503_v31  ;;  %737 = vmatpush1.bf16.msra.mxu1 %v1055_v28  ;;  %v1059_v31 = vld [vmem:[%s1228_s20 + $0x14] ss:$8 sps:$4 sm:$0xff]  }
 0x113   : > { %521 = vrot.lane.b32.xlu1 %v516_v32, %s1118_s26  ;;  %738 = vmatprep.subr.bf16.mxu1 %v1056_v29 }
 0x114   : > { %519 = vrot.lane.b32.xlu0 %v515_v34, %s1118_s26 }
 0x115   : > { %v1049_v35 = vpop.permute.xlu1 %1048 }
 0x116   : > { %v1051_v36 = vunpack.i.h.bf16 %v1049_v35  ;;  %v1050_v37 = vunpack.i.l.bf16 %v1049_v35  ;;  %739 = vmatpush1.bf16.msra.mxu1 %v1058_v30 }
 0x117   : > { %740 = vmatprep.subr.bf16.mxu1 %v1059_v31 }
 0x118   : > { %v465_v39 = vsel %vm454_vm0, %v1050_v37, %v1239_v5  ;;  %v466_v40 = vsel %vm454_vm0, %v1051_v36, %v1241_v6  ;;  %v581_v5 = vand.u32 127, %v577_v0  ;;  %v590_v6 = vrot.slane %v586_v4, %v589_v3 }
 0x119   : > { %v477_v41 = vmul.f32 %v472_v38, %v465_v39  ;;  %v474_v42 = vpop.permute.xlu1 %473  ;;  %v1061_v39 = vld [vmem:[%s1228_s20 + $0x10] ss:$8 sps:$4 sm:$0xff]  }
 0x11a   : > { %v478_v43 = vmul.f32 %v474_v42, %v466_v40  ;;  %vm582_vm4 = vcmp.le.s32.totalorder %v581_v5, %v578_v2  ;;  %vm591_vm5 = vcmp.eq.s32.totalorder %v590_v6, 1  ;;  %vm583_vm8 = vcmp.le.s32.totalorder %v581_v5, %v579_v7  ;;  %741 = vmatpush1.bf16.msra.mxu1 %v1061_v39  ;;  %v1062_v40 = vld [vmem:[%s1228_s20 + $0x4] ss:$8 sps:$4 sm:$0xff]  }
 0x11b   : > { %481 = vrot.lane.b32.xlu0 %v477_v41, %s1118_s26  ;;  %vm592_vm6 = vmand %vm582_vm4, %vm591_vm5  ;;  %v1064_v41 = vld [vmem:[%s1228_s20] ss:$8 sps:$4 sm:$0xff]   ;;  %742 = vmatprep.subr.bf16.mxu1 %v1062_v40 }
 0x11c   : > { %483 = vrot.lane.b32.xlu1 %v478_v43, %s1118_s26  ;;  %vm593_vm9 = vmand %vm583_vm8, %vm591_vm5 }
 0x11e   : > { %743 = vmatpush1.bf16.msra.mxu1 %v1064_v41 }
 0x185   : > { %v522_v48 = vpop.permute.xlu1 %521 }
 0x186   : > { %v526_v49 = vadd.f32 %v522_v48, %v492_v46  ;;  %v520_v50 = vpop.permute.xlu0 %519 }
 0x187   : > { %v525_v51 = vadd.f32 %v520_v50, %v491_v47  ;;  %v672_v47 = vld [vmem:[#allocation2 + $0x10] sm:$0xff] }
 0x189   : > { %v528_v54 = vpack.c.bf16 %v526_v49, %v525_v51  ;;  %v673_v49 = vld [vmem:[#allocation2] sm:$0xff] }
 0x18b   : > { %v534_v56 = vsel %vm529_vm2, %v528_v54, 0 }
 0x18c   : > { %974 = vmatpush3.bf16.xpose.msra.mxu0 %v534_v56 }
 0x18d   : > { %v482_v58 = vpop.permute.xlu0 %481  ;;  %979 = vmatprep.subr.bf16.mxu0 %v1116_v25 }
 0x18e   : > { %v487_v59 = vadd.f32 %v482_v58, %v452_v55  ;;  %v484_v60 = vpop.permute.xlu1 %483  ;;  %v675_v55 = vld [vmem:[#allocation2 + $0x8] sm:$0xff] }
 0x18f   : > { %v488_v61 = vadd.f32 %v484_v60, %v453_v57 }
 0x191   : > { %v527_v62 = vpack.c.bf16 %v488_v61, %v487_v59 }
 0x193   : > { %976 = vmatmul.mubr.msk.bf16.vlgmr.msra.gmra.mxu0 %vm529_vm2, %v527_v62 }
 0x194   : > { %981 = vmatprep.mubr.msk.bf16.mxu0 %vm1117_vm1, %v1116_v25  ;;  %980 = vmatpush3.bf16.msra.mxu0 %v1052_v26 }
 0x253   : > { %v570_v8 = vpop.f32.mrf.mxu0 }
 0x254   : > { %v594_v9 = vsel %vm592_vm6, %v570_v8, -1e+09 }
 0x255   : > { %v977_v10 = vpop.f32.mrf.mxu0  ;;  %v597_v11 = vsel %vm596_vm7, %v594_v9, -inf }
 0x256   : > { %598 = vmax.xlane.f32.xlu0 %v597_v11 }
 0x257   : > { %v573_v12 = vpop.f32.mrf.mxu0 }
 0x258   : > { %v595_v13 = vsel %vm593_vm9, %v573_v12, -1e+09 }
 0x259   : > { %v978_v14 = vpop.f32.mrf.mxu0  ;;  %v600_v15 = vsel %vm596_vm7, %v595_v13, -inf }
 0x25a   : > { %601 = vmax.xlane.f32.xlu1 %v600_v15 }
 0x2df   : > { %v599_v16 = vpop.xlane.xlu0 %598 }
 0x2e0   : > { %v603_v17 = vsub.f32 %v594_v9, %v599_v16 }
 0x2e2   : > { %v605_v18 = vmul.f32 1.442695, %v603_v17 }
 0x2e3   : > { %v602_v19 = vpop.xlane.xlu1 %601 }
 0x2e4   : > { %1065 = vpow2.f32 %v605_v18  ;;  %v604_v20 = vsub.f32 %v595_v13, %v602_v19 }
 0x2e6   : > { %v607_v21 = vmul.f32 1.442695, %v604_v20 }
 0x2e8   : > { %1067 = vpow2.f32 %v607_v21 }
 0x2f1   : > { %v1066_v22 = vpop.eup %1065 }
 0x2f2   : > { %v609_v23 = vsel %vm596_vm7, %v1066_v22, 0.0 }
 0x2f3   : > { %610 = vadd.xlane.f32.xlu0 %v609_v23 }
 0x2f5   : > { %v1068_v24 = vpop.eup %1067 }
 0x2f6   : > { %v612_v25 = vsel %vm596_vm7, %v1068_v24, 0.0 }
 0x2f7   : > { %613 = vadd.xlane.f32.xlu0 %v612_v25 }
 0x37c   : > { %v611_v32 = vpop.xlane.xlu0 %610 }
 0x37d   : > { %1069 = vrcp.f32 %v611_v32 }
 0x380   : > { %v614_v33 = vpop.xlane.xlu0 %613 }
 0x381   : > { %1071 = vrcp.f32 %v614_v33 }
 0x38a   : > { %v1070_v34 = vpop.eup %1069 }
 0x38b   : > { %v617_v37 = vmul.f32 %v1070_v34, %v1066_v22 }
 0x38e   : > { %v1072_v35 = vpop.eup %1071 }
 0x38f   : > { %v618_v36 = vmul.f32 %v1072_v35, %v1068_v24 }
 0x391   : > { %v619_v38 = vpack.c.bf16 %v618_v36, %v617_v37 }
 0x393   : > { %982 = vmatmul.mubr.msk.bf16.vlgmr.msra.gmra.mxu0 %vm596_vm7, %v619_v38 }
 0x453   : > { %v665_v42 = vpop.f32.mrf.mxu0 }
 0x455   : > { %v983_v43 = vpop.f32.mrf.mxu0 }
 0x457   : > { %v668_v44 = vpop.f32.mrf.mxu0 }
 0x458   : > { %v676_v45 = vpack.c.bf16 %v668_v44, %v665_v42 }
 0x459   : > { %v984_v46 = vpop.f32.mrf.mxu0 }
 0x45a   : > { %949 = vmatmul.mubr.msk.bf16.vlgmr.msra.gmra.mxu1 %vm529_vm2, %v676_v45 }
 0x51a   : > { %v762_v48 = vpop.f32.mrf.mxu1 }
 0x51b   : > { %v771_v50 = vadd.f32 %v762_v48, %v672_v47 }
 0x51c   : > { %v764_v51 = vpop.f32.mrf.mxu1 }
 0x51d   : > { %775 = vst [vmem:[#allocation2 + $0x10] sm:$0xff] %v771_v50  ;;  %v772_v53 = vadd.f32 %v764_v51, %v673_v49 }
 0x51e   : > { %v766_v54 = vpop.f32.mrf.mxu1 }
 0x51f   : > { %776 = vst [vmem:[#allocation2] sm:$0xff] %v772_v53  ;;  %v773_v56 = vadd.f32 %v766_v54, %v674_v52  ;;  %782 = sbr.rel (%p950_p8) target bundleno = 1326 (0x52e), region = 64 }
 0x520   : > { %v768_v57 = vpop.f32.mrf.mxu1 }
 0x521   : > { %777 = vst [vmem:[#allocation2 + $0x18] sm:$0xff] %v773_v56  ;;  %v774_v58 = vadd.f32 %v768_v57, %v675_v55 }
 0x523   : > { %778 = vst [vmem:[#allocation2 + $0x8] sm:$0xff] %v774_v58 }
 0x524   : > { %v783_v59 = vld [vmem:[#allocation2 + $0x10] sm:$0xff] }
 0x526   : > { %v784_v60 = vld [vmem:[#allocation2] sm:$0xff] }
 0x527   : > { %v959_v62 = vpack.c.bf16 %v784_v60, %v783_v59 }
 0x528   : > { %v785_v61 = vld [vmem:[#allocation2 + $0x18] sm:$0xff] }
 0x529   : > { %799 = vst [vmem:[%s1234_s21] sm:$0xff] %v959_v62 }
 0x52a   : > { %v786_v63 = vld [vmem:[#allocation2 + $0x8] sm:$0xff] }
 0x52b   : > { %v960_v0 = vpack.c.bf16 %v786_v63, %v785_v61 }
 0x52d   : > { %800 = vst [vmem:[%s1234_s21 + $0x8] sm:$0xff] %v960_v0 }
 0x52e PF: > { %s1355_s17 = sld [smem:[#allocation5_spill]] }
 0x52f   : > { %s1356_s30 = sld [smem:[#allocation3_spill]] }
 0x530   : > { %s1357_s10 = sld [smem:[#allocation4_spill]] }
 0x531   : > { %s1358_s11 = sld [smem:[#allocation6_spill]] }
 0x532   : > { %s1359_s12 = sld [smem:[#allocation7_spill]] }
 0x534   : > { %s19_s13 = sadd.s32 1, %s1355_s17  }
 0x535   : > { %p16_p9 = scmp.ge.s32.totalorder %s19_s13, 10  }
 0x537   :  { %18 = sbr.rel (!%p16_p9) target bundleno = 3 (0x3), region = 106 }

// kernel: falcon_forward.10
= control target key start
LH: loop header
LB: loop body
LE: loop exit
PB: predicated region body
PF: predicated region fallthrough
CT: control target
= control target key end

     0   :  { %s2348_s18 = smov 0   ;;  %s2350_s19 = smov 0   ;;  %s2863_s0 = inlined_call_operand.vmem [shape: bf16[32,256], index: 0, kind: input, shape index: {}]   ;;  %s2864_s1 = inlined_call_operand.vmem [shape: bf16[32,256], index: 1, kind: input, shape index: {}]   ;;  %s2865_s2 = inlined_call_operand.vmem [shape: f32[32,256], index: 2, kind: input, shape index: {}]   ;;  %s2866_s3 = inlined_call_operand.vmem [shape: bf16[256,1024], index: 3, kind: input, shape index: {}]   ;;  %s2867_s4 = inlined_call_operand.vmem [shape: bf16[1024,256], index: 4, kind: input, shape index: {}]   ;;  %s2868_s5 = inlined_call_operand.vmem [shape: f32[32,256], index: 5, kind: output, shape index: {}]  }
   0x1   :  { %s2352_s20 = smov 0   ;;  %s2354_s21 = smov 0  }
   0x2   :  { %s2356_s22 = smov 0  }
   0x3 LB: > { %s24_s23 = sadd.s32 1, %s2312_s21  ;;  %p119_p1 = scmp.ne.s32.totalorder %s2304_s19, %s2300_s18  ;;  %s2316_s22 = sphi %s2356_s22, %s15_s22   ;;  %s2312_s21 = sphi %s2354_s21, %s2872_s21   ;;  %s2308_s20 = sphi %s2352_s20, %s2871_s20   ;;  %s2304_s19 = sphi %s2350_s19, %s2870_s19   ;;  %s2300_s18 = sphi %s2348_s18, %s2869_s18  }
   0x4   : > { %p25_p0 = scmp.ge.s32.totalorder %s24_s23, 2  ;;  %p120_p2 = scmp.eq.s32.totalorder %s2316_s22, 0 }
   0x5   : > { %s112_s25 = sadd.s32 1, %s2304_s19  ;;  %p1859_p5 = scmp.ge.s32.totalorder %s2316_s22, 2 }
   0x6   : > { %s2874_s23 = smov (%p25_p0, %s24_s23), 0  ;;  %p121_p3 = por %p120_p2, %p119_p1 }
   0x7   : > { %s109_s24 = ssub.s32 %s2312_s21, %s2874_s23  ;;  %227 = sbr.rel (%p1859_p5) target bundleno = 48 (0x30), region = 28 }
   0x8   : > { %p110_p4 = scmp.eq.s32.totalorder %s109_s24, 0 }
   0xa   : > { %s2383_s26 = scalar_select %p110_p4, %s2304_s19, %s112_s25  }
   0xc   : > { %230 = sbr.rel (!%p121_p3) target bundleno = 48 (0x30), region = 32  ;;  %s232_s27 = sand.u32 (%p121_p3), 1, %s2304_s19  }
   0xd   : > { %s2006_s28 = sshll.u32 (%p121_p3), %s2312_s21, 4  ;;  %s1860_s29 = sshll.u32 (%p121_p3), %s232_s27, 9 }
   0xe   : > { %s2391_s7 = scalar_lea.vmem (%p121_p3), %s2866_s3, %s2006_s28  ;;  %s2396_s8 = scalar_lea.vmem (%p121_p3), [#allocation3], %s1860_s29 }
   0xf   : > { %v250_v0 = vld [vmem:[%s2391_s7] sm:$0xff] (%p121_p3)  ;;  %v252_v1 = vld [vmem:[%s2391_s7 + $0x8] sm:$0xff] (%p121_p3) }
  0x10   : > { %v254_v2 = vld [vmem:[%s2391_s7 + $0x20] sm:$0xff] (%p121_p3)  ;;  %251 = vst [vmem:[%s2396_s8] sm:$0xff] (%p121_p3), %v250_v0  ;;  %253 = vst [vmem:[%s2396_s8 + $0x8] sm:$0xff] (%p121_p3), %v252_v1  ;;  %v256_v3 = vld [vmem:[%s2391_s7 + $0x28] sm:$0xff] (%p121_p3) }
  0x11   : > { %255 = vst [vmem:[%s2396_s8 + $0x10] sm:$0xff] %v254_v2  ;;  %v258_v4 = vld [vmem:[%s2391_s7 + $0x40] sm:$0xff]  ;;  %v260_v5 = vld [vmem:[%s2391_s7 + $0x48] sm:$0xff]  ;;  %257 = vst [vmem:[%s2396_s8 + $0x18] sm:$0xff] %v256_v3 }
  0x12   : > { %259 = vst [vmem:[%s2396_s8 + $0x20] sm:$0xff] %v258_v4  ;;  %261 = vst [vmem:[%s2396_s8 + $0x28] sm:$0xff] %v260_v5  ;;  %v262_v6 = vld [vmem:[%s2391_s7 + $0x60] sm:$0xff]  ;;  %v264_v7 = vld [vmem:[%s2391_s7 + $0x68] sm:$0xff] }
  0x13   : > { %v266_v8 = vld [vmem:[%s2391_s7 + $0x80] sm:$0xff]  ;;  %263 = vst [vmem:[%s2396_s8 + $0x30] sm:$0xff] %v262_v6  ;;  %265 = vst [vmem:[%s2396_s8 + $0x38] sm:$0xff] %v264_v7  ;;  %v268_v9 = vld [vmem:[%s2391_s7 + $0x88] sm:$0xff] }
  0x14   : > { %267 = vst [vmem:[%s2396_s8 + $0x40] sm:$0xff] %v266_v8  ;;  %v270_v10 = vld [vmem:[%s2391_s7 + $0xa0] sm:$0xff]  ;;  %v272_v11 = vld [vmem:[%s2391_s7 + $0xa8] sm:$0xff]  ;;  %269 = vst [vmem:[%s2396_s8 + $0x48] sm:$0xff] %v268_v9 }
  0x15   : > { %271 = vst [vmem:[%s2396_s8 + $0x50] sm:$0xff] %v270_v10  ;;  %273 = vst [vmem:[%s2396_s8 + $0x58] sm:$0xff] %v272_v11  ;;  %v274_v12 = vld [vmem:[%s2391_s7 + $0xc0] sm:$0xff]  ;;  %v276_v13 = vld [vmem:[%s2391_s7 + $0xc8] sm:$0xff] }
  0x16   : > { %v278_v14 = vld [vmem:[%s2391_s7 + $0xe0] sm:$0xff]  ;;  %275 = vst [vmem:[%s2396_s8 + $0x60] sm:$0xff] %v274_v12  ;;  %277 = vst [vmem:[%s2396_s8 + $0x68] sm:$0xff] %v276_v13  ;;  %v280_v15 = vld [vmem:[%s2391_s7 + $0xe8] sm:$0xff] }
  0x17   : > { %279 = vst [vmem:[%s2396_s8 + $0x70] sm:$0xff] %v278_v14  ;;  %v282_v16 = vld [vmem:[%s2391_s7 + $0x100] sm:$0xff]  ;;  %v284_v17 = vld [vmem:[%s2391_s7 + $0x108] sm:$0xff]  ;;  %281 = vst [vmem:[%s2396_s8 + $0x78] sm:$0xff] %v280_v15 }
  0x18   : > { %283 = vst [vmem:[%s2396_s8 + $0x80] sm:$0xff] %v282_v16  ;;  %285 = vst [vmem:[%s2396_s8 + $0x88] sm:$0xff] %v284_v17  ;;  %v286_v18 = vld [vmem:[%s2391_s7 + $0x120] sm:$0xff]  ;;  %v288_v19 = vld [vmem:[%s2391_s7 + $0x128] sm:$0xff] }
  0x19   : > { %v290_v20 = vld [vmem:[%s2391_s7 + $0x140] sm:$0xff]  ;;  %287 = vst [vmem:[%s2396_s8 + $0x90] sm:$0xff] %v286_v18  ;;  %289 = vst [vmem:[%s2396_s8 + $0x98] sm:$0xff] %v288_v19  ;;  %v292_v21 = vld [vmem:[%s2391_s7 + $0x148] sm:$0xff] }
  0x1a   : > { %291 = vst [vmem:[%s2396_s8 + $0xa0] sm:$0xff] %v290_v20  ;;  %v294_v22 = vld [vmem:[%s2391_s7 + $0x160] sm:$0xff]  ;;  %v296_v23 = vld [vmem:[%s2391_s7 + $0x168] sm:$0xff]  ;;  %293 = vst [vmem:[%s2396_s8 + $0xa8] sm:$0xff] %v292_v21 }
  0x1b   : > { %295 = vst [vmem:[%s2396_s8 + $0xb0] sm:$0xff] %v294_v22  ;;  %297 = vst [vmem:[%s2396_s8 + $0xb8] sm:$0xff] %v296_v23  ;;  %v298_v24 = vld [vmem:[%s2391_s7 + $0x180] sm:$0xff]  ;;  %v300_v25 = vld [vmem:[%s2391_s7 + $0x188] sm:$0xff] }
  0x1c   : > { %v302_v26 = vld [vmem:[%s2391_s7 + $0x1a0] sm:$0xff]  ;;  %299 = vst [vmem:[%s2396_s8 + $0xc0] sm:$0xff] %v298_v24  ;;  %301 = vst [vmem:[%s2396_s8 + $0xc8] sm:$0xff] %v300_v25  ;;  %v304_v27 = vld [vmem:[%s2391_s7 + $0x1a8] sm:$0xff] }
  0x1d   : > { %303 = vst [vmem:[%s2396_s8 + $0xd0] sm:$0xff] %v302_v26  ;;  %v306_v28 = vld [vmem:[%s2391_s7 + $0x1c0] sm:$0xff]  ;;  %v308_v29 = vld [vmem:[%s2391_s7 + $0x1c8] sm:$0xff]  ;;  %305 = vst [vmem:[%s2396_s8 + $0xd8] sm:$0xff] %v304_v27 }
  0x1e   : > { %307 = vst [vmem:[%s2396_s8 + $0xe0] sm:$0xff] %v306_v28  ;;  %309 = vst [vmem:[%s2396_s8 + $0xe8] sm:$0xff] %v308_v29  ;;  %v310_v30 = vld [vmem:[%s2391_s7 + $0x1e0] sm:$0xff]  ;;  %v312_v31 = vld [vmem:[%s2391_s7 + $0x1e8] sm:$0xff] }
  0x1f   : > { %v314_v32 = vld [vmem:[%s2391_s7 + $0x200] sm:$0xff]  ;;  %311 = vst [vmem:[%s2396_s8 + $0xf0] sm:$0xff] %v310_v30  ;;  %313 = vst [vmem:[%s2396_s8 + $0xf8] sm:$0xff] %v312_v31  ;;  %v316_v33 = vld [vmem:[%s2391_s7 + $0x208] sm:$0xff] }
  0x20   : > { %315 = vst [vmem:[%s2396_s8 + $0x100] sm:$0xff] %v314_v32  ;;  %v318_v34 = vld [vmem:[%s2391_s7 + $0x220] sm:$0xff]  ;;  %v320_v35 = vld [vmem:[%s2391_s7 + $0x228] sm:$0xff]  ;;  %317 = vst [vmem:[%s2396_s8 + $0x108] sm:$0xff] %v316_v33 }
  0x21   : > { %319 = vst [vmem:[%s2396_s8 + $0x110] sm:$0xff] %v318_v34  ;;  %321 = vst [vmem:[%s2396_s8 + $0x118] sm:$0xff] %v320_v35  ;;  %v322_v36 = vld [vmem:[%s2391_s7 + $0x240] sm:$0xff]  ;;  %v324_v37 = vld [vmem:[%s2391_s7 + $0x248] sm:$0xff] }
  0x22   : > { %v326_v38 = vld [vmem:[%s2391_s7 + $0x260] sm:$0xff]  ;;  %323 = vst [vmem:[%s2396_s8 + $0x120] sm:$0xff] %v322_v36  ;;  %325 = vst [vmem:[%s2396_s8 + $0x128] sm:$0xff] %v324_v37  ;;  %v328_v39 = vld [vmem:[%s2391_s7 + $0x268] sm:$0xff] }
  0x23   : > { %327 = vst [vmem:[%s2396_s8 + $0x130] sm:$0xff] %v326_v38  ;;  %v330_v40 = vld [vmem:[%s2391_s7 + $0x280] sm:$0xff]  ;;  %v332_v41 = vld [vmem:[%s2391_s7 + $0x288] sm:$0xff]  ;;  %329 = vst [vmem:[%s2396_s8 + $0x138] sm:$0xff] %v328_v39 }
  0x24   : > { %331 = vst [vmem:[%s2396_s8 + $0x140] sm:$0xff] %v330_v40  ;;  %333 = vst [vmem:[%s2396_s8 + $0x148] sm:$0xff] %v332_v41  ;;  %v334_v42 = vld [vmem:[%s2391_s7 + $0x2a0] sm:$0xff]  ;;  %v336_v43 = vld [vmem:[%s2391_s7 + $0x2a8] sm:$0xff] }
  0x25   : > { %v338_v44 = vld [vmem:[%s2391_s7 + $0x2c0] sm:$0xff]  ;;  %335 = vst [vmem:[%s2396_s8 + $0x150] sm:$0xff] %v334_v42  ;;  %337 = vst [vmem:[%s2396_s8 + $0x158] sm:$0xff] %v336_v43  ;;  %v340_v45 = vld [vmem:[%s2391_s7 + $0x2c8] sm:$0xff] }
  0x26   : > { %339 = vst [vmem:[%s2396_s8 + $0x160] sm:$0xff] %v338_v44  ;;  %v342_v46 = vld [vmem:[%s2391_s7 + $0x2e0] sm:$0xff]  ;;  %v344_v47 = vld [vmem:[%s2391_s7 + $0x2e8] sm:$0xff]  ;;  %341 = vst [vmem:[%s2396_s8 + $0x168] sm:$0xff] %v340_v45 }
  0x27   : > { %343 = vst [vmem:[%s2396_s8 + $0x170] sm:$0xff] %v342_v46  ;;  %345 = vst [vmem:[%s2396_s8 + $0x178] sm:$0xff] %v344_v47  ;;  %v346_v48 = vld [vmem:[%s2391_s7 + $0x300] sm:$0xff]  ;;  %v348_v49 = vld [vmem:[%s2391_s7 + $0x308] sm:$0xff] }
  0x28   : > { %v350_v50 = vld [vmem:[%s2391_s7 + $0x320] sm:$0xff]  ;;  %347 = vst [vmem:[%s2396_s8 + $0x180] sm:$0xff] %v346_v48  ;;  %349 = vst [vmem:[%s2396_s8 + $0x188] sm:$0xff] %v348_v49  ;;  %v352_v51 = vld [vmem:[%s2391_s7 + $0x328] sm:$0xff] }
  0x29   : > { %351 = vst [vmem:[%s2396_s8 + $0x190] sm:$0xff] %v350_v50  ;;  %v354_v52 = vld [vmem:[%s2391_s7 + $0x340] sm:$0xff]  ;;  %v356_v53 = vld [vmem:[%s2391_s7 + $0x348] sm:$0xff]  ;;  %353 = vst [vmem:[%s2396_s8 + $0x198] sm:$0xff] %v352_v51 }
  0x2a   : > { %355 = vst [vmem:[%s2396_s8 + $0x1a0] sm:$0xff] %v354_v52  ;;  %357 = vst [vmem:[%s2396_s8 + $0x1a8] sm:$0xff] %v356_v53  ;;  %v358_v54 = vld [vmem:[%s2391_s7 + $0x360] sm:$0xff]  ;;  %v360_v55 = vld [vmem:[%s2391_s7 + $0x368] sm:$0xff] }
  0x2b   : > { %v362_v56 = vld [vmem:[%s2391_s7 + $0x380] sm:$0xff]  ;;  %359 = vst [vmem:[%s2396_s8 + $0x1b0] sm:$0xff] %v358_v54  ;;  %361 = vst [vmem:[%s2396_s8 + $0x1b8] sm:$0xff] %v360_v55  ;;  %v364_v57 = vld [vmem:[%s2391_s7 + $0x388] sm:$0xff] }
  0x2c   : > { %363 = vst [vmem:[%s2396_s8 + $0x1c0] sm:$0xff] %v362_v56  ;;  %v366_v58 = vld [vmem:[%s2391_s7 + $0x3a0] sm:$0xff]  ;;  %v368_v59 = vld [vmem:[%s2391_s7 + $0x3a8] sm:$0xff]  ;;  %365 = vst [vmem:[%s2396_s8 + $0x1c8] sm:$0xff] %v364_v57 }
  0x2d   : > { %367 = vst [vmem:[%s2396_s8 + $0x1d0] sm:$0xff] %v366_v58  ;;  %369 = vst [vmem:[%s2396_s8 + $0x1d8] sm:$0xff] %v368_v59  ;;  %v370_v60 = vld [vmem:[%s2391_s7 + $0x3c0] sm:$0xff]  ;;  %v372_v61 = vld [vmem:[%s2391_s7 + $0x3c8] sm:$0xff] }
  0x2e   : > { %v374_v62 = vld [vmem:[%s2391_s7 + $0x3e0] sm:$0xff]  ;;  %371 = vst [vmem:[%s2396_s8 + $0x1e0] sm:$0xff] %v370_v60  ;;  %373 = vst [vmem:[%s2396_s8 + $0x1e8] sm:$0xff] %v372_v61  ;;  %v376_v63 = vld [vmem:[%s2391_s7 + $0x3e8] sm:$0xff] }
  0x2f   : > { %375 = vst [vmem:[%s2396_s8 + $0x1f0] sm:$0xff] %v374_v62  ;;  %377 = vst [vmem:[%s2396_s8 + $0x1f8] sm:$0xff] %v376_v63 }
  0x30 PF: > { %p1863_p6 = scmp.ge.s32.totalorder %s2316_s22, 1  ;;  %p392_p7 = scmp.lt.s32.totalorder %s2316_s22, 3 }
  0x32   : > { %p393_p8 = pnand %p1863_p6, %p392_p7 }
  0x33   : > { %s399_s9 = sand.u32 (!%p393_p8), 1, %s2300_s18   ;;  %s1865_s10 = sshll.u32 (!%p393_p8), %s2308_s20, 6 }
  0x34   : > { %396 = sbr.rel (%p393_p8) target bundleno = 596 (0x254), region = 59  ;;  %s1864_s11 = sshll.u32 (!%p393_p8), %s399_s9, 9 }
  0x35   : > { %p474_p9 = scmp.lt.s32.totalorder (!%p393_p8), %s1865_s10, 127  ;;  %s2532_s16 = scalar_lea.vmem (!%p393_p8), [#allocation3], %s1864_s11 }
  0x36   : > { %p1868_p10 = scmp.ne.s32.totalorder (!%p393_p8), %s2308_s20, 0 }
  0x39   : > { %s2876_s10 = smov (!%p474_p9, %s1865_s10), 127  ;;  %490 = sbr.rel (%p1868_p10) target bundleno = 72 (0x48), region = 67 }
  0x3a   : > { %s2007_s12 = sshll.u32 %s2876_s10, 3 }
  0x3b   : > { %s2530_s15 = scalar_lea.vmem %s2867_s4, %s2007_s12 }
  0x3e   : > { %v491_v0 = vld [vmem:[%s2865_s2] sm:$0xff]  ;;  %v492_v2 = vld [vmem:[%s2865_s2 + $0x8] sm:$0xff]  ;;  %v493_v5 = vld [vmem:[%s2865_s2 + $0x10] sm:$0xff] }
  0x3f   : > { %v499_v1 = vld [vmem:[%s2864_s1] sm:$0xff]  ;;  %v500_v6 = vld [vmem:[%s2864_s1 + $0x8] sm:$0xff]  ;;  %v494_v7 = vld [vmem:[%s2865_s2 + $0x18] sm:$0xff] }
  0x40   : > { %v503_v3 = vunpack.c.l.bf16 %v499_v1  ;;  %v504_v4 = vunpack.c.h.bf16 %v499_v1  ;;  %v505_v8 = vunpack.c.l.bf16 %v500_v6  ;;  %v506_v9 = vunpack.c.h.bf16 %v500_v6  ;;  %v495_v10 = vld [vmem:[%s2865_s2 + $0x20] sm:$0xff]  ;;  %v501_v11 = vld [vmem:[%s2864_s1 + $0x10] sm:$0xff]  ;;  %v496_v12 = vld [vmem:[%s2865_s2 + $0x28] sm:$0xff] }
  0x41   : > { %v507_v15 = vunpack.c.l.bf16 %v501_v11  ;;  %v508_v16 = vunpack.c.h.bf16 %v501_v11  ;;  %v497_v17 = vld [vmem:[%s2865_s2 + $0x30] sm:$0xff]  ;;  %v502_v18 = vld [vmem:[%s2864_s1 + $0x18] sm:$0xff] }
  0x42   : > { %v511_v13 = vadd.f32 %v503_v3, %v491_v0  ;;  %v512_v14 = vadd.f32 %v504_v4, %v492_v2  ;;  %v498_v19 = vld [vmem:[%s2865_s2 + $0x38] sm:$0xff]  ;;  %v513_v20 = vadd.f32 %v505_v8, %v493_v5  ;;  %v514_v21 = vadd.f32 %v506_v9, %v494_v7 }
  0x43   : > { %v509_v22 = vunpack.c.l.bf16 %v502_v18  ;;  %v510_v23 = vunpack.c.h.bf16 %v502_v18  ;;  %v515_v24 = vadd.f32 %v507_v15, %v495_v10  ;;  %v516_v25 = vadd.f32 %v508_v16, %v496_v12 }
  0x44   : > { %519 = vst [vmem:[#allocation2 + $0x30] sm:$0xff] %v511_v13  ;;  %520 = vst [vmem:[#allocation2] sm:$0xff] %v512_v14 }
  0x45   : > { %521 = vst [vmem:[#allocation2 + $0x18] sm:$0xff] %v513_v20  ;;  %522 = vst [vmem:[#allocation2 + $0x10] sm:$0xff] %v514_v21  ;;  %v517_v26 = vadd.f32 %v509_v22, %v497_v17  ;;  %v518_v27 = vadd.f32 %v510_v23, %v498_v19 }
  0x46   : > { %523 = vst [vmem:[#allocation2 + $0x8] sm:$0xff] %v515_v24  ;;  %524 = vst [vmem:[#allocation2 + $0x20] sm:$0xff] %v516_v25 }
  0x47   : > { %525 = vst [vmem:[#allocation2 + $0x28] sm:$0xff] %v517_v26  ;;  %526 = vst [vmem:[#allocation2 + $0x38] sm:$0xff] %v518_v27 }
  0x48 PF: > { %v2048_v28 = vld [vmem:[%s2532_s16 + $0xe4] ss:$16 sps:$4 sm:$0xff]   ;;  %v2050_v29 = vld [vmem:[%s2532_s16 + $0xec] ss:$16 sps:$4 sm:$0xff]   ;;  %v2052_v30 = vld [vmem:[%s2532_s16 + $0xe0] ss:$16 sps:$4 sm:$0xff]  }
  0x49   : > { %935 = vmatprep.subr.bf16.mxu0 %v2048_v28  ;;  %v2053_v31 = vld [vmem:[%s2532_s16 + $0xe8] ss:$16 sps:$4 sm:$0xff]   ;;  %988 = vmatprep.subr.bf16.mxu1 %v2050_v29  ;;  %v2054_v32 = vld [vmem:[%s2532_s16 + $0xc4] ss:$16 sps:$4 sm:$0xff]   ;;  %v2056_v33 = vld [vmem:[%s2532_s16 + $0xcc] ss:$16 sps:$4 sm:$0xff]  }
  0x4a   : > { %936 = vmatpush1.bf16.msra.mxu0 %v2052_v30  ;;  %989 = vmatpush1.bf16.msra.mxu1 %v2053_v31  ;;  %v2058_v34 = vld [vmem:[%s2532_s16 + $0xc0] ss:$16 sps:$4 sm:$0xff]   ;;  %v2059_v35 = vld [vmem:[%s2532_s16 + $0xc8] ss:$16 sps:$4 sm:$0xff]   ;;  %v2060_v36 = vld [vmem:[%s2532_s16 + $0xa4] ss:$16 sps:$4 sm:$0xff]  }
  0x4b   : > { %937 = vmatprep.subr.bf16.mxu0 %v2054_v32  ;;  %990 = vmatprep.subr.bf16.mxu1 %v2056_v33  ;;  %v2062_v37 = vld [vmem:[%s2532_s16 + $0xac] ss:$16 sps:$4 sm:$0xff]   ;;  %v2064_v38 = vld [vmem:[%s2532_s16 + $0xa0] ss:$16 sps:$4 sm:$0xff]   ;;  %v2065_v39 = vld [vmem:[%s2532_s16 + $0xa8] ss:$16 sps:$4 sm:$0xff]  }
  0x4c   : > { %v2066_v40 = vld [vmem:[%s2532_s16 + $0x84] ss:$16 sps:$4 sm:$0xff]   ;;  %v2068_v41 = vld [vmem:[%s2532_s16 + $0x8c] ss:$16 sps:$4 sm:$0xff]   ;;  %v2070_v42 = vld [vmem:[%s2532_s16 + $0x80] ss:$16 sps:$4 sm:$0xff]  }
  0x4d   : > { %v2071_v43 = vld [vmem:[%s2532_s16 + $0x88] ss:$16 sps:$4 sm:$0xff]   ;;  %v2072_v44 = vld [vmem:[%s2532_s16 + $0x64] ss:$16 sps:$4 sm:$0xff]   ;;  %v2074_v45 = vld [vmem:[%s2532_s16 + $0x6c] ss:$16 sps:$4 sm:$0xff]  }
  0x4e   : > { %938 = vmatpush1.bf16.msra.mxu0 %v2058_v34  ;;  %991 = vmatpush1.bf16.msra.mxu1 %v2059_v35  ;;  %v2076_v46 = vld [vmem:[%s2532_s16 + $0x60] ss:$16 sps:$4 sm:$0xff]   ;;  %v2077_v47 = vld [vmem:[%s2532_s16 + $0x68] ss:$16 sps:$4 sm:$0xff]   ;;  %v2078_v48 = vld [vmem:[%s2532_s16 + $0x44] ss:$16 sps:$4 sm:$0xff]  }
  0x4f   : > { %939 = vmatprep.subr.bf16.mxu0 %v2060_v36  ;;  %992 = vmatprep.subr.bf16.mxu1 %v2062_v37  ;;  %v2080_v49 = vld [vmem:[%s2532_s16 + $0x4c] ss:$16 sps:$4 sm:$0xff]   ;;  %v2082_v50 = vld [vmem:[%s2532_s16 + $0x40] ss:$16 sps:$4 sm:$0xff]   ;;  %v2083_v51 = vld [vmem:[%s2532_s16 + $0x48] ss:$16 sps:$4 sm:$0xff]  }
  0x50   : > { %v2084_v52 = vld [vmem:[%s2532_s16 + $0x24] ss:$16 sps:$4 sm:$0xff]   ;;  %v2086_v53 = vld [vmem:[%s2532_s16 + $0x2c] ss:$16 sps:$4 sm:$0xff]   ;;  %v2088_v54 = vld [vmem:[%s2532_s16 + $0x20] ss:$16 sps:$4 sm:$0xff]  }
  0x51   : > { %v2089_v55 = vld [vmem:[%s2532_s16 + $0x28] ss:$16 sps:$4 sm:$0xff]   ;;  %v2090_v56 = vld [vmem:[%s2532_s16 + $0x4] ss:$16 sps:$4 sm:$0xff]   ;;  %v2092_v57 = vld [vmem:[%s2532_s16 + $0xc] ss:$16 sps:$4 sm:$0xff]  }
  0x52   : > { %940 = vmatpush1.bf16.msra.mxu0 %v2064_v38  ;;  %993 = vmatpush1.bf16.msra.mxu1 %v2065_v39  ;;  %v2094_v58 = vld [vmem:[%s2532_s16] ss:$16 sps:$4 sm:$0xff]   ;;  %v2095_v59 = vld [vmem:[%s2532_s16 + $0x8] ss:$16 sps:$4 sm:$0xff]   ;;  %v2096_v60 = vld [vmem:[%s2532_s16 + $0x1e4] ss:$16 sps:$4 sm:$0xff]  }
  0x53   : > { %941 = vmatprep.subr.bf16.mxu0 %v2066_v40  ;;  %994 = vmatprep.subr.bf16.mxu1 %v2068_v41  ;;  %v2098_v61 = vld [vmem:[%s2532_s16 + $0x1ec] ss:$16 sps:$4 sm:$0xff]   ;;  %v2100_v62 = vld [vmem:[%s2532_s16 + $0x1e0] ss:$16 sps:$4 sm:$0xff]   ;;  %v2101_v63 = vld [vmem:[%s2532_s16 + $0x1e8] ss:$16 sps:$4 sm:$0xff]  }
  0x54   : > { %v2102_v0 = vld [vmem:[%s2532_s16 + $0x1c4] ss:$16 sps:$4 sm:$0xff]   ;;  %v2104_v1 = vld [vmem:[%s2532_s16 + $0x1cc] ss:$16 sps:$4 sm:$0xff]   ;;  %v2106_v2 = vld [vmem:[%s2532_s16 + $0x1c0] ss:$16 sps:$4 sm:$0xff]  }
  0x55   : > { %v2107_v3 = vld [vmem:[%s2532_s16 + $0x1c8] ss:$16 sps:$4 sm:$0xff]   ;;  %v2108_v4 = vld [vmem:[%s2532_s16 + $0x1a4] ss:$16 sps:$4 sm:$0xff]   ;;  %v2110_v5 = vld [vmem:[%s2532_s16 + $0x1ac] ss:$16 sps:$4 sm:$0xff]  }
  0x56   : > { %942 = vmatpush1.bf16.msra.mxu0 %v2070_v42  ;;  %995 = vmatpush1.bf16.msra.mxu1 %v2071_v43  ;;  %v2112_v6 = vld [vmem:[%s2532_s16 + $0x1a0] ss:$16 sps:$4 sm:$0xff]   ;;  %v2113_v7 = vld [vmem:[%s2532_s16 + $0x1a8] ss:$16 sps:$4 sm:$0xff]   ;;  %v2114_v8 = vld [vmem:[%s2532_s16 + $0x184] ss:$16 sps:$4 sm:$0xff]  }
  0x57   : > { %943 = vmatprep.subr.bf16.mxu0 %v2072_v44  ;;  %996 = vmatprep.subr.bf16.mxu1 %v2074_v45  ;;  %v2116_v9 = vld [vmem:[%s2532_s16 + $0x18c] ss:$16 sps:$4 sm:$0xff]   ;;  %v2118_v10 = vld [vmem:[%s2532_s16 + $0x180] ss:$16 sps:$4 sm:$0xff]   ;;  %v2119_v11 = vld [vmem:[%s2532_s16 + $0x188] ss:$16 sps:$4 sm:$0xff]  }
  0x58   : > { %v2146_v12 = vld [vmem:[%s2863_s0 + $0x4] ss:$8 sps:$4 sm:$0xff]   ;;  %v2124_v15 = vld [vmem:[%s2532_s16 + $0x160] ss:$16 sps:$4 sm:$0xff]   ;;  %v2125_v16 = vld [vmem:[%s2532_s16 + $0x168] ss:$16 sps:$4 sm:$0xff]  }
  0x59   : > { %v2120_v13 = vld [vmem:[%s2532_s16 + $0x164] ss:$16 sps:$4 sm:$0xff]   ;;  %v2122_v14 = vld [vmem:[%s2532_s16 + $0x16c] ss:$16 sps:$4 sm:$0xff]   ;;  %967 = vmatprep.mubr.bf16.mxu0 %v2146_v12  ;;  %1020 = vmatprep.mubr.bf16.mxu1 %v2146_v12  ;;  %v2130_v19 = vld [vmem:[%s2532_s16 + $0x140] ss:$16 sps:$4 sm:$0xff]  }
  0x5a   : > { %944 = vmatpush1.bf16.msra.mxu0 %v2076_v46  ;;  %997 = vmatpush1.bf16.msra.mxu1 %v2077_v47  ;;  %v2126_v17 = vld [vmem:[%s2532_s16 + $0x144] ss:$16 sps:$4 sm:$0xff]   ;;  %v2128_v18 = vld [vmem:[%s2532_s16 + $0x14c] ss:$16 sps:$4 sm:$0xff]   ;;  %v2131_v20 = vld [vmem:[%s2532_s16 + $0x148] ss:$16 sps:$4 sm:$0xff]  }
  0x5b   : > { %945 = vmatprep.subr.bf16.mxu0 %v2078_v48  ;;  %998 = vmatprep.subr.bf16.mxu1 %v2080_v49  ;;  %v2132_v21 = vld [vmem:[%s2532_s16 + $0x124] ss:$16 sps:$4 sm:$0xff]   ;;  %v2134_v22 = vld [vmem:[%s2532_s16 + $0x12c] ss:$16 sps:$4 sm:$0xff]   ;;  %v2136_v23 = vld [vmem:[%s2532_s16 + $0x120] ss:$16 sps:$4 sm:$0xff]  }
  0x5c   : > { %v2137_v24 = vld [vmem:[%s2532_s16 + $0x128] ss:$16 sps:$4 sm:$0xff]   ;;  %v2138_v25 = vld [vmem:[%s2532_s16 + $0x104] ss:$16 sps:$4 sm:$0xff]   ;;  %v2140_v26 = vld [vmem:[%s2532_s16 + $0x10c] ss:$16 sps:$4 sm:$0xff]  }
  0x5d   : > { %v2142_v27 = vld [vmem:[%s2532_s16 + $0x100] ss:$16 sps:$4 sm:$0xff]   ;;  %v2143_v28 = vld [vmem:[%s2532_s16 + $0x108] ss:$16 sps:$4 sm:$0xff]   ;;  %v2152_v29 = vld [vmem:[%s2530_s15 + $0x74] ss:$8 sps:$4 sm:$0xff]  }
  0x5e   : > { %946 = vmatpush1.bf16.msra.mxu0 %v2082_v50  ;;  %999 = vmatpush1.bf16.msra.mxu1 %v2083_v51  ;;  %v2144_v30 = vld [vmem:[%s2863_s0] ss:$8 sps:$4 sm:$0xff]   ;;  %v2155_v31 = vld [vmem:[%s2530_s15 + $0x174] ss:$8 sps:$4 sm:$0xff]   ;;  %v2150_v33 = vld [vmem:[%s2530_s15 + $0x70] ss:$8 sps:$4 sm:$0xff]  }
  0x5f   : > { %947 = vmatprep.subr.bf16.mxu0 %v2084_v52  ;;  %1000 = vmatprep.subr.bf16.mxu1 %v2086_v53  ;;  %v2147_v32 = vld [vmem:[%s2863_s0 + $0x14] ss:$8 sps:$4 sm:$0xff]   ;;  %v2153_v34 = vld [vmem:[%s2530_s15 + $0x170] ss:$8 sps:$4 sm:$0xff]   ;;  %v2158_v35 = vld [vmem:[%s2530_s15 + $0x64] ss:$8 sps:$4 sm:$0xff]  }
  0x60   : > { %v2161_v36 = vld [vmem:[%s2530_s15 + $0x164] ss:$8 sps:$4 sm:$0xff]   ;;  %v2156_v37 = vld [vmem:[%s2530_s15 + $0x60] ss:$8 sps:$4 sm:$0xff]   ;;  %v2164_v39 = vld [vmem:[%s2530_s15 + $0x54] ss:$8 sps:$4 sm:$0xff]  }
  0x61   : > { %v2159_v38 = vld [vmem:[%s2530_s15 + $0x160] ss:$8 sps:$4 sm:$0xff]   ;;  %v2167_v40 = vld [vmem:[%s2530_s15 + $0x154] ss:$8 sps:$4 sm:$0xff]   ;;  %v2149_v41 = vld [vmem:[%s2863_s0 + $0x10] ss:$8 sps:$4 sm:$0xff]  }
  0x62   : > { %948 = vmatpush1.bf16.msra.mxu0 %v2088_v54  ;;  %1001 = vmatpush1.bf16.msra.mxu1 %v2089_v55  ;;  %v2162_v42 = vld [vmem:[%s2530_s15 + $0x50] ss:$8 sps:$4 sm:$0xff]   ;;  %v2170_v44 = vld [vmem:[%s2530_s15 + $0x44] ss:$8 sps:$4 sm:$0xff]   ;;  %v2168_v46 = vld [vmem:[%s2530_s15 + $0x40] ss:$8 sps:$4 sm:$0xff]  }
  0x63   : > { %949 = vmatprep.subr.bf16.mxu0 %v2090_v56  ;;  %1002 = vmatprep.subr.bf16.mxu1 %v2092_v57  ;;  %v2165_v43 = vld [vmem:[%s2530_s15 + $0x150] ss:$8 sps:$4 sm:$0xff]   ;;  %v2173_v45 = vld [vmem:[%s2530_s15 + $0x144] ss:$8 sps:$4 sm:$0xff]   ;;  %v2171_v47 = vld [vmem:[%s2530_s15 + $0x140] ss:$8 sps:$4 sm:$0xff]  }
  0x64   : > { %v2176_v48 = vld [vmem:[%s2530_s15 + $0x34] ss:$8 sps:$4 sm:$0xff]   ;;  %v2174_v50 = vld [vmem:[%s2530_s15 + $0x30] ss:$8 sps:$4 sm:$0xff]   ;;  %v2182_v52 = vld [vmem:[%s2530_s15 + $0x24] ss:$8 sps:$4 sm:$0xff]  }
  0x65   : > { %v2179_v49 = vld [vmem:[%s2530_s15 + $0x134] ss:$8 sps:$4 sm:$0xff]   ;;  %v2177_v51 = vld [vmem:[%s2530_s15 + $0x130] ss:$8 sps:$4 sm:$0xff]   ;;  %v2185_v53 = vld [vmem:[%s2530_s15 + $0x124] ss:$8 sps:$4 sm:$0xff]  }
  0x66   : > { %950 = vmatpush1.bf16.msra.mxu0 %v2094_v58  ;;  %1003 = vmatpush1.bf16.msra.mxu1 %v2095_v59  ;;  %v2180_v54 = vld [vmem:[%s2530_s15 + $0x20] ss:$8 sps:$4 sm:$0xff]   ;;  %v2188_v56 = vld [vmem:[%s2530_s15 + $0x14] ss:$8 sps:$4 sm:$0xff]   ;;  %v2186_v58 = vld [vmem:[%s2530_s15 + $0x10] ss:$8 sps:$4 sm:$0xff]  }
  0x67   : > { %951 = vmatprep.subr.bf16.mxu0 %v2096_v60  ;;  %1004 = vmatprep.subr.bf16.mxu1 %v2098_v61  ;;  %v2183_v55 = vld [vmem:[%s2530_s15 + $0x120] ss:$8 sps:$4 sm:$0xff]   ;;  %v2191_v57 = vld [vmem:[%s2530_s15 + $0x114] ss:$8 sps:$4 sm:$0xff]   ;;  %v2189_v59 = vld [vmem:[%s2530_s15 + $0x110] ss:$8 sps:$4 sm:$0xff]  }
  0x68   : > { %v2194_v60 = vld [vmem:[%s2530_s15 + $0x4] ss:$8 sps:$4 sm:$0xff]   ;;  %p2001_p11 = scmp.ne.s32.totalorder %s2308_s20, 1 }
  0x69   : > { %v2197_v61 = vld [vmem:[%s2530_s15 + $0x104] ss:$8 sps:$4 sm:$0xff]  }
  0x6a   : > { %952 = vmatpush2.bf16.msra.mxu0 %v2100_v62  ;;  %1005 = vmatpush2.bf16.msra.mxu1 %v2101_v63  ;;  %v2192_v62 = vld [vmem:[%s2530_s15] ss:$8 sps:$4 sm:$0xff]   ;;  %v2218_v12 = vld [vmem:[%s2530_s15 + $0xc4] ss:$8 sps:$4 sm:$0xff]  }
  0x6b   : > { %953 = vmatprep.subr.bf16.mxu0 %v2102_v0  ;;  %1006 = vmatprep.subr.bf16.mxu1 %v2104_v1  ;;  %v2195_v63 = vld [vmem:[%s2530_s15 + $0x100] ss:$8 sps:$4 sm:$0xff]   ;;  %v2200_v0 = vld [vmem:[%s2530_s15 + $0xf4] ss:$8 sps:$4 sm:$0xff]  }
  0x6c   : > { %v2203_v1 = vld [vmem:[%s2530_s15 + $0x1f4] ss:$8 sps:$4 sm:$0xff]  }
  0x6e   : > { %954 = vmatpush2.bf16.msra.mxu0 %v2106_v2  ;;  %1007 = vmatpush2.bf16.msra.mxu1 %v2107_v3  ;;  %v2198_v2 = vld [vmem:[%s2530_s15 + $0xf0] ss:$8 sps:$4 sm:$0xff]  }
  0x6f   : > { %955 = vmatprep.subr.bf16.mxu0 %v2108_v4  ;;  %1008 = vmatprep.subr.bf16.mxu1 %v2110_v5  ;;  %v2201_v3 = vld [vmem:[%s2530_s15 + $0x1f0] ss:$8 sps:$4 sm:$0xff]   ;;  %v2206_v4 = vld [vmem:[%s2530_s15 + $0xe4] ss:$8 sps:$4 sm:$0xff]  }
  0x70   : > { %v2209_v5 = vld [vmem:[%s2530_s15 + $0x1e4] ss:$8 sps:$4 sm:$0xff]  }
  0x72   : > { %956 = vmatpush2.bf16.msra.mxu0 %v2112_v6  ;;  %1009 = vmatpush2.bf16.msra.mxu1 %v2113_v7  ;;  %v2204_v6 = vld [vmem:[%s2530_s15 + $0xe0] ss:$8 sps:$4 sm:$0xff]  }
  0x73   : > { %957 = vmatprep.subr.bf16.mxu0 %v2114_v8  ;;  %1010 = vmatprep.subr.bf16.mxu1 %v2116_v9  ;;  %v2207_v7 = vld [vmem:[%s2530_s15 + $0x1e0] ss:$8 sps:$4 sm:$0xff]   ;;  %v2212_v8 = vld [vmem:[%s2530_s15 + $0xd4] ss:$8 sps:$4 sm:$0xff]  }
  0x74   : > { %v2215_v9 = vld [vmem:[%s2530_s15 + $0x1d4] ss:$8 sps:$4 sm:$0xff]  }
  0x76   : > { %958 = vmatpush2.bf16.msra.mxu0 %v2118_v10  ;;  %1011 = vmatpush2.bf16.msra.mxu1 %v2119_v11  ;;  %v2210_v10 = vld [vmem:[%s2530_s15 + $0xd0] ss:$8 sps:$4 sm:$0xff]  }
  0x77   : > { %959 = vmatprep.subr.bf16.mxu0 %v2120_v13  ;;  %1012 = vmatprep.subr.bf16.mxu1 %v2122_v14  ;;  %v2213_v11 = vld [vmem:[%s2530_s15 + $0x1d0] ss:$8 sps:$4 sm:$0xff]   ;;  %v2221_v13 = vld [vmem:[%s2530_s15 + $0x1c4] ss:$8 sps:$4 sm:$0xff]   ;;  %v2216_v14 = vld [vmem:[%s2530_s15 + $0xc0] ss:$8 sps:$4 sm:$0xff]  }
  0x7a   : > { %960 = vmatpush2.bf16.msra.mxu0 %v2124_v15  ;;  %1013 = vmatpush2.bf16.msra.mxu1 %v2125_v16  ;;  %v2219_v15 = vld [vmem:[%s2530_s15 + $0x1c0] ss:$8 sps:$4 sm:$0xff]   ;;  %v2224_v16 = vld [vmem:[%s2530_s15 + $0xb4] ss:$8 sps:$4 sm:$0xff]  }
  0x7b   : > { %961 = vmatprep.subr.bf16.mxu0 %v2126_v17  ;;  %1014 = vmatprep.subr.bf16.mxu1 %v2128_v18  ;;  %v2227_v17 = vld [vmem:[%s2530_s15 + $0x1b4] ss:$8 sps:$4 sm:$0xff]   ;;  %v2222_v18 = vld [vmem:[%s2530_s15 + $0xb0] ss:$8 sps:$4 sm:$0xff]  }
  0x7e   : > { %962 = vmatpush2.bf16.msra.mxu0 %v2130_v19  ;;  %1015 = vmatpush2.bf16.msra.mxu1 %v2131_v20  ;;  %v2225_v19 = vld [vmem:[%s2530_s15 + $0x1b0] ss:$8 sps:$4 sm:$0xff]   ;;  %v2230_v20 = vld [vmem:[%s2530_s15 + $0xa4] ss:$8 sps:$4 sm:$0xff]  }
  0x7f   : > { %963 = vmatprep.subr.bf16.mxu0 %v2132_v21  ;;  %1016 = vmatprep.subr.bf16.mxu1 %v2134_v22  ;;  %v2233_v21 = vld [vmem:[%s2530_s15 + $0x1a4] ss:$8 sps:$4 sm:$0xff]   ;;  %v2228_v22 = vld [vmem:[%s2530_s15 + $0xa0] ss:$8 sps:$4 sm:$0xff]  }
  0x82   : > { %964 = vmatpush2.bf16.msra.mxu0 %v2136_v23  ;;  %1017 = vmatpush2.bf16.msra.mxu1 %v2137_v24  ;;  %v2231_v23 = vld [vmem:[%s2530_s15 + $0x1a0] ss:$8 sps:$4 sm:$0xff]   ;;  %v2236_v24 = vld [vmem:[%s2530_s15 + $0x94] ss:$8 sps:$4 sm:$0xff]  }
  0x83   : > { %965 = vmatprep.subr.bf16.mxu0 %v2138_v25  ;;  %1018 = vmatprep.subr.bf16.mxu1 %v2140_v26  ;;  %v2239_v25 = vld [vmem:[%s2530_s15 + $0x194] ss:$8 sps:$4 sm:$0xff]   ;;  %v2234_v26 = vld [vmem:[%s2530_s15 + $0x90] ss:$8 sps:$4 sm:$0xff]  }
  0x86   : > { %966 = vmatpush2.bf16.msra.mxu0 %v2142_v27  ;;  %1019 = vmatpush2.bf16.msra.mxu1 %v2143_v28  ;;  %v2237_v27 = vld [vmem:[%s2530_s15 + $0x190] ss:$8 sps:$4 sm:$0xff]   ;;  %v2242_v28 = vld [vmem:[%s2530_s15 + $0x84] ss:$8 sps:$4 sm:$0xff]  }
  0x87   : > { %1585 = vmatprep.subr.bf16.mxu0 %v2152_v29  ;;  %1638 = vmatprep.subr.bf16.mxu1 %v2155_v31  ;;  %v2245_v29 = vld [vmem:[%s2530_s15 + $0x184] ss:$8 sps:$4 sm:$0xff]   ;;  %v2243_v31 = vld [vmem:[%s2530_s15 + $0x180] ss:$8 sps:$4 sm:$0xff]  }
  0x89   : > { %968 = vmatmul.mubr.bf16.vlgmr.msra.gmra.mxu0 %v2144_v30  ;;  %1021 = vmatmul.mubr.bf16.vlgmr.msra.gmra.mxu1 %v2144_v30  ;;  %v2240_v30 = vld [vmem:[%s2530_s15 + $0x80] ss:$8 sps:$4 sm:$0xff]  }
  0x8a   : > { %977 = vmatprep.mubr.bf16.mxu0 %v2147_v32  ;;  %1030 = vmatprep.mubr.bf16.mxu1 %v2147_v32 }
  0x8b   : > { %1586 = vmatpush1.bf16.msra.mxu0 %v2150_v33  ;;  %1639 = vmatpush1.bf16.msra.mxu1 %v2153_v34 }
  0x8c   : > { %1587 = vmatprep.subr.bf16.mxu0 %v2158_v35  ;;  %1640 = vmatprep.subr.bf16.mxu1 %v2161_v36 }
  0x8f   : > { %1588 = vmatpush1.bf16.msra.mxu0 %v2156_v37  ;;  %1641 = vmatpush1.bf16.msra.mxu1 %v2159_v38 }
  0x90   : > { %1589 = vmatprep.subr.bf16.mxu0 %v2164_v39  ;;  %1642 = vmatprep.subr.bf16.mxu1 %v2167_v40 }
  0x91   : > { %978 = vmatmul.mubr.bf16.gmra.mxu0 %v2149_v41  ;;  %1031 = vmatmul.mubr.bf16.gmra.mxu1 %v2149_v41 }
  0x93   : > { %1590 = vmatpush1.bf16.msra.mxu0 %v2162_v42  ;;  %1643 = vmatpush1.bf16.msra.mxu1 %v2165_v43 }
  0x94   : > { %1591 = vmatprep.subr.bf16.mxu0 %v2170_v44  ;;  %1644 = vmatprep.subr.bf16.mxu1 %v2173_v45 }
  0x97   : > { %1592 = vmatpush1.bf16.msra.mxu0 %v2168_v46  ;;  %1645 = vmatpush1.bf16.msra.mxu1 %v2171_v47 }
  0x98   : > { %1593 = vmatprep.subr.bf16.mxu0 %v2176_v48  ;;  %1646 = vmatprep.subr.bf16.mxu1 %v2179_v49 }
  0x9b   : > { %1594 = vmatpush1.bf16.msra.mxu0 %v2174_v50  ;;  %1647 = vmatpush1.bf16.msra.mxu1 %v2177_v51 }
  0x9c   : > { %1595 = vmatprep.subr.bf16.mxu0 %v2182_v52  ;;  %1648 = vmatprep.subr.bf16.mxu1 %v2185_v53 }
  0x9f   : > { %1596 = vmatpush1.bf16.msra.mxu0 %v2180_v54  ;;  %1649 = vmatpush1.bf16.msra.mxu1 %v2183_v55 }
  0xa0   : > { %1597 = vmatprep.subr.bf16.mxu0 %v2188_v56  ;;  %1650 = vmatprep.subr.bf16.mxu1 %v2191_v57 }
  0xa3   : > { %1598 = vmatpush1.bf16.msra.mxu0 %v2186_v58  ;;  %1651 = vmatpush1.bf16.msra.mxu1 %v2189_v59 }
  0xa4   : > { %1599 = vmatprep.subr.bf16.mxu0 %v2194_v60  ;;  %1652 = vmatprep.subr.bf16.mxu1 %v2197_v61 }
  0xa7   : > { %1600 = vmatpush1.bf16.msra.mxu0 %v2192_v62  ;;  %1653 = vmatpush1.bf16.msra.mxu1 %v2195_v63 }
  0xa8   : > { %1601 = vmatprep.subr.bf16.mxu0 %v2200_v0  ;;  %1654 = vmatprep.subr.bf16.mxu1 %v2203_v1 }
  0xab   : > { %1602 = vmatpush2.bf16.msra.mxu0 %v2198_v2  ;;  %1655 = vmatpush2.bf16.msra.mxu1 %v2201_v3 }
  0xac   : > { %1603 = vmatprep.subr.bf16.mxu0 %v2206_v4  ;;  %1656 = vmatprep.subr.bf16.mxu1 %v2209_v5 }
  0xaf   : > { %1604 = vmatpush2.bf16.msra.mxu0 %v2204_v6  ;;  %1657 = vmatpush2.bf16.msra.mxu1 %v2207_v7 }
  0xb0   : > { %1605 = vmatprep.subr.bf16.mxu0 %v2212_v8  ;;  %1658 = vmatprep.subr.bf16.mxu1 %v2215_v9 }
  0xb3   : > { %1606 = vmatpush2.bf16.msra.mxu0 %v2210_v10  ;;  %1659 = vmatpush2.bf16.msra.mxu1 %v2213_v11 }
  0xb4   : > { %1607 = vmatprep.subr.bf16.mxu0 %v2218_v12  ;;  %1660 = vmatprep.subr.bf16.mxu1 %v2221_v13 }
  0xb7   : > { %1608 = vmatpush2.bf16.msra.mxu0 %v2216_v14  ;;  %1661 = vmatpush2.bf16.msra.mxu1 %v2219_v15 }
  0xb8   : > { %1609 = vmatprep.subr.bf16.mxu0 %v2224_v16  ;;  %1662 = vmatprep.subr.bf16.mxu1 %v2227_v17 }
  0xbb   : > { %1610 = vmatpush2.bf16.msra.mxu0 %v2222_v18  ;;  %1663 = vmatpush2.bf16.msra.mxu1 %v2225_v19 }
  0xbc   : > { %1611 = vmatprep.subr.bf16.mxu0 %v2230_v20  ;;  %1664 = vmatprep.subr.bf16.mxu1 %v2233_v21 }
  0xbf   : > { %1612 = vmatpush2.bf16.msra.mxu0 %v2228_v22  ;;  %1665 = vmatpush2.bf16.msra.mxu1 %v2231_v23 }
  0xc0   : > { %1613 = vmatprep.subr.bf16.mxu0 %v2236_v24  ;;  %1666 = vmatprep.subr.bf16.mxu1 %v2239_v25 }
  0xc3   : > { %1614 = vmatpush2.bf16.msra.mxu0 %v2234_v26  ;;  %1667 = vmatpush2.bf16.msra.mxu1 %v2237_v27 }
  0xc4   : > { %1615 = vmatprep.subr.bf16.mxu0 %v2242_v28  ;;  %1668 = vmatprep.subr.bf16.mxu1 %v2245_v29 }
  0xc7   : > { %1616 = vmatpush2.bf16.msra.mxu0 %v2240_v30  ;;  %1669 = vmatpush2.bf16.msra.mxu1 %v2243_v31 }
 0x149   : > { %v2711_v32 = vpop.f32.mrf.mxu0  ;;  %v2713_v33 = vpop.f32.mrf.mxu1 }
 0x14a   : > { %v1041_v34 = vmul.f32 %v2711_v32, %v2711_v32  ;;  %v1043_v35 = vmul.f32 %v2713_v33, %v2713_v33 }
 0x14b   : > { %v2719_v36 = vpop.f32.mrf.mxu0  ;;  %v2721_v37 = vpop.f32.mrf.mxu1 }
 0x14c   : > { %v1057_v38 = vmul.f32 %v1041_v34, %v2711_v32  ;;  %v1059_v39 = vmul.f32 %v1043_v35, %v2713_v33  ;;  %v1042_v40 = vmul.f32 %v2719_v36, %v2719_v36  ;;  %v1044_v41 = vmul.f32 %v2721_v37, %v2721_v37 }
 0x14d   : > { %v2729_v42 = vpop.f32.mrf.mxu0  ;;  %v2731_v43 = vpop.f32.mrf.mxu1 }
 0x14e   : > { %v1073_v44 = vmul.f32 0.044715, %v1057_v38  ;;  %v1075_v45 = vmul.f32 0.044715, %v1059_v39  ;;  %v1058_v46 = vmul.f32 %v1042_v40, %v2719_v36  ;;  %v1060_v47 = vmul.f32 %v1044_v41, %v2721_v37 }
 0x14f   : > { %v1045_v48 = vmul.f32 %v2729_v42, %v2729_v42  ;;  %v1047_v49 = vmul.f32 %v2731_v43, %v2731_v43  ;;  %v2739_v50 = vpop.f32.mrf.mxu0  ;;  %v2741_v51 = vpop.f32.mrf.mxu1 }
 0x150   : > { %v1089_v52 = vadd.f32 %v1073_v44, %v2711_v32  ;;  %v1091_v53 = vadd.f32 %v1075_v45, %v2713_v33  ;;  %v1074_v54 = vmul.f32 0.044715, %v1058_v46  ;;  %v1076_v55 = vmul.f32 0.044715, %v1060_v47 }
 0x151   : > { %v1061_v56 = vmul.f32 %v1045_v48, %v2729_v42  ;;  %v1063_v57 = vmul.f32 %v1047_v49, %v2731_v43  ;;  %v1046_v58 = vmul.f32 %v2739_v50, %v2739_v50  ;;  %v1048_v59 = vmul.f32 %v2741_v51, %v2741_v51  ;;  %v2751_v60 = vpop.f32.mrf.mxu0  ;;  %v2753_v61 = vpop.f32.mrf.mxu1 }
 0x152   : > { %v1105_v62 = vmul.f32 0.7978846, %v1089_v52  ;;  %v1107_v63 = vmul.f32 0.7978846, %v1091_v53  ;;  %v1090_v0 = vadd.f32 %v1074_v54, %v2719_v36  ;;  %v1092_v1 = vadd.f32 %v1076_v55, %v2721_v37 }
 0x153   : > { %v1077_v2 = vmul.f32 0.044715, %v1061_v56  ;;  %v1079_v3 = vmul.f32 0.044715, %v1063_v57  ;;  %v1062_v4 = vmul.f32 %v1046_v58, %v2739_v50  ;;  %v1064_v5 = vmul.f32 %v1048_v59, %v2741_v51  ;;  %v2759_v6 = vpop.f32.mrf.mxu0  ;;  %v2761_v7 = vpop.f32.mrf.mxu1 }
 0x154   : > { %2246 = vtanh.f32 %v1105_v62  ;;  %v1106_v8 = vmul.f32 0.7978846, %v1090_v0  ;;  %v1108_v9 = vmul.f32 0.7978846, %v1092_v1  ;;  %v1049_v10 = vmul.f32 %v2751_v60, %v2751_v60 }
 0x155   : > { %2248 = vtanh.f32 %v1107_v63  ;;  %v1093_v11 = vadd.f32 %v1077_v2, %v2729_v42  ;;  %v1095_v12 = vadd.f32 %v1079_v3, %v2731_v43  ;;  %v1078_v13 = vmul.f32 0.044715, %v1062_v4  ;;  %v2770_v17 = vpop.f32.mrf.mxu0  ;;  %v2773_v21 = vpop.f32.mrf.mxu1 }
 0x156   : > { %2250 = vtanh.f32 %v1106_v8  ;;  %v1080_v14 = vmul.f32 0.044715, %v1064_v5  ;;  %v1065_v15 = vmul.f32 %v1049_v10, %v2751_v60  ;;  %v1051_v16 = vmul.f32 %v2753_v61, %v2753_v61 }
 0x157   : > { %2252 = vtanh.f32 %v1108_v9  ;;  %v1109_v18 = vmul.f32 0.7978846, %v1093_v11  ;;  %v1111_v19 = vmul.f32 0.7978846, %v1095_v12  ;;  %v1094_v20 = vadd.f32 %v1078_v13, %v2739_v50  ;;  %v2784_v34 = vpop.f32.mrf.mxu0  ;;  %v2789_v40 = vpop.f32.mrf.mxu1 }
 0x158   : > { %v1096_v22 = vadd.f32 %v1080_v14, %v2741_v51  ;;  %v1081_v23 = vmul.f32 0.044715, %v1065_v15  ;;  %v1067_v24 = vmul.f32 %v1051_v16, %v2753_v61  ;;  %v1050_v25 = vmul.f32 %v2759_v6, %v2759_v6 }
 0x159   : > { %2254 = vtanh.f32 %v1109_v18  ;;  %v1110_v26 = vmul.f32 0.7978846, %v1094_v20  ;;  %v1052_v27 = vmul.f32 %v2761_v7, %v2761_v7  ;;  %v1053_v28 = vmul.f32 %v2770_v17, %v2770_v17 }
 0x15a   : > { %2256 = vtanh.f32 %v1111_v19  ;;  %v1112_v29 = vmul.f32 0.7978846, %v1096_v22  ;;  %v1097_v30 = vadd.f32 %v1081_v23, %v2751_v60  ;;  %v1083_v31 = vmul.f32 0.044715, %v1067_v24 }
 0x15b   : > { %2258 = vtanh.f32 %v1110_v26  ;;  %v1066_v35 = vmul.f32 %v1050_v25, %v2759_v6  ;;  %v1068_v38 = vmul.f32 %v1052_v27, %v2761_v7  ;;  %v1069_v39 = vmul.f32 %v1053_v28, %v2770_v17 }
 0x15c   : > { %2260 = vtanh.f32 %v1112_v29  ;;  %v1113_v41 = vmul.f32 0.7978846, %v1097_v30  ;;  %v1099_v44 = vadd.f32 %v1083_v31, %v2753_v61  ;;  %v1055_v45 = vmul.f32 %v2773_v21, %v2773_v21 }
 0x15d   : > { %v1082_v46 = vmul.f32 0.044715, %v1066_v35  ;;  %v1084_v47 = vmul.f32 0.044715, %v1068_v38  ;;  %v1085_v48 = vmul.f32 0.044715, %v1069_v39  ;;  %v1054_v49 = vmul.f32 %v2784_v34, %v2784_v34 }
 0x15e   : > { %v1115_v52 = vmul.f32 0.7978846, %v1099_v44  ;;  %v1071_v53 = vmul.f32 %v1055_v45, %v2773_v21  ;;  %v1056_v54 = vmul.f32 %v2789_v40, %v2789_v40  ;;  %2262 = vtanh.f32 %v1113_v41 }
 0x15f   : > { %v1098_v55 = vadd.f32 %v1082_v46, %v2759_v6  ;;  %v1100_v56 = vadd.f32 %v1084_v47, %v2761_v7  ;;  %v1101_v57 = vadd.f32 %v1085_v48, %v2770_v17  ;;  %v1070_v58 = vmul.f32 %v1054_v49, %v2784_v34 }
 0x160   : > { %v1087_v59 = vmul.f32 0.044715, %v1071_v53  ;;  %v1072_v62 = vmul.f32 %v1056_v54, %v2789_v40  ;;  %2264 = vtanh.f32 %v1115_v52 }
 0x161   : > { %v2247_v63 = vpop.eup %2246  ;;  %v1114_v0 = vmul.f32 0.7978846, %v1098_v55  ;;  %v1116_v1 = vmul.f32 0.7978846, %v1100_v56  ;;  %v1117_v2 = vmul.f32 0.7978846, %v1101_v57 }
 0x162   : > { %v2249_v3 = vpop.eup %2248  ;;  %v1103_v4 = vadd.f32 %v1087_v59, %v2773_v21  ;;  %v1086_v5 = vmul.f32 0.044715, %v1070_v58  ;;  %v1088_v8 = vmul.f32 0.044715, %v1072_v62  ;;  %v1137_v11 = vadd.f32 1.0, %v2247_v63 }
 0x163   : > { %v2251_v9 = vpop.eup %2250  ;;  %2266 = vtanh.f32 %v1114_v0  ;;  %v1139_v20 = vadd.f32 1.0, %v2249_v3 }
 0x164   : > { %v2253_v10 = vpop.eup %2252  ;;  %2268 = vtanh.f32 %v1116_v1  ;;  %v1119_v12 = vmul.f32 0.7978846, %v1103_v4  ;;  %v1138_v13 = vadd.f32 1.0, %v2251_v9  ;;  %v1102_v14 = vadd.f32 %v1086_v5, %v2784_v34 }
 0x165   : > { %2270 = vtanh.f32 %v1117_v2  ;;  %v1140_v16 = vadd.f32 1.0, %v2253_v10  ;;  %v1104_v18 = vadd.f32 %v1088_v8, %v2789_v40  ;;  %v1153_v25 = vmul.f32 0.5, %v1137_v11 }
 0x166   : > { %v2255_v15 = vpop.eup %2254  ;;  %2272 = vtanh.f32 %v1119_v12  ;;  %v1118_v23 = vmul.f32 0.7978846, %v1102_v14  ;;  %v1154_v29 = vmul.f32 0.5, %v1138_v13  ;;  %v1155_v41 = vmul.f32 0.5, %v1139_v20 }
 0x167   : > { %v2257_v19 = vpop.eup %2256  ;;  %v1141_v22 = vadd.f32 1.0, %v2255_v15  ;;  %v1120_v27 = vmul.f32 0.7978846, %v1104_v18  ;;  %v1156_v35 = vmul.f32 0.5, %v1140_v16  ;;  %v1169_v53 = vmul.f32 %v1153_v25, %v2711_v32 }
 0x168   : > { %v2259_v24 = vpop.eup %2258  ;;  %v1143_v26 = vadd.f32 1.0, %v2257_v19  ;;  %2274 = vtanh.f32 %v1118_v23  ;;  %v1170_v47 = vmul.f32 %v1154_v29, %v2719_v36  ;;  %v1171_v57 = vmul.f32 %v1155_v41, %v2713_v33 }
 0x169   : > { %v2261_v28 = vpop.eup %2260  ;;  %v1157_v30 = vmul.f32 0.5, %v1141_v22  ;;  %v1142_v31 = vadd.f32 1.0, %v2259_v24  ;;  %2276 = vtanh.f32 %v1120_v27  ;;  %v1172_v54 = vmul.f32 %v1156_v35, %v2721_v37 }
 0x16a   : > { %v1159_v38 = vmul.f32 0.5, %v1143_v26  ;;  %v1144_v39 = vadd.f32 1.0, %v2261_v28 }
 0x16b   : > { %v1158_v44 = vmul.f32 0.5, %v1142_v31  ;;  %v1173_v45 = vmul.f32 %v1157_v30, %v2729_v42  ;;  %v2263_v52 = vpop.eup %2262 }
 0x16c   : > { %v1160_v46 = vmul.f32 0.5, %v1144_v39  ;;  %v1175_v48 = vmul.f32 %v1159_v38, %v2731_v43  ;;  %v1145_v37 = vadd.f32 1.0, %v2263_v52  ;;  %v1187_v38 = vld [vmem:[#allocation2 + $0x18] sm:$0xff] }
 0x16d   : > { %v1174_v49 = vmul.f32 %v1158_v44, %v2739_v50  ;;  %v2265_v56 = vpop.eup %2264  ;;  %v1193_v42 = vpack.c.bf16 %v1173_v45, %v1169_v53  ;;  %v1188_v45 = vld [vmem:[#allocation2 + $0x10] sm:$0xff]  ;;  %v1189_v53 = vld [vmem:[#allocation2 + $0x8] sm:$0xff] }
 0x16e   : > { %v1176_v55 = vmul.f32 %v1160_v46, %v2741_v51  ;;  %v1195_v36 = vpack.c.bf16 %v1175_v48, %v1171_v57  ;;  %v1147_v2 = vadd.f32 1.0, %v2265_v56  ;;  %v1161_v10 = vmul.f32 0.5, %v1145_v37  ;;  %v1190_v57 = vld [vmem:[#allocation2 + $0x20] sm:$0xff] }
 0x16f   : > { %v1194_v58 = vpack.c.bf16 %v1174_v49, %v1170_v47 }
 0x170   : > { %v2267_v59 = vpop.eup %2266  ;;  %v1196_v62 = vpack.c.bf16 %v1176_v55, %v1172_v54  ;;  %v1163_v13 = vmul.f32 0.5, %v1147_v2  ;;  %v1177_v22 = vmul.f32 %v1161_v10, %v2751_v60  ;;  %v1186_v60 = vld [vmem:[#allocation2] sm:$0xff] }
 0x171   : > { %v2269_v63 = vpop.eup %2268  ;;  %1617 = vmatprep.mubr.bf16.mxu0 %v1194_v58  ;;  %v1146_v0 = vadd.f32 1.0, %v2267_v59 }
 0x172   : > { %v2271_v43 = vpop.eup %2270  ;;  %1670 = vmatprep.mubr.bf16.mxu1 %v1196_v62  ;;  %1618 = vmatmul.mubr.bf16.vlgmr.msra.gmra.mxu0 %v1193_v42  ;;  %v1148_v1 = vadd.f32 1.0, %v2269_v63  ;;  %v1179_v25 = vmul.f32 %v1163_v13, %v2753_v61  ;;  %v1191_v63 = vld [vmem:[#allocation2 + $0x28] sm:$0xff] }
 0x173   : > { %v2273_v50 = vpop.eup %2272  ;;  %v1149_v32 = vadd.f32 1.0, %v2271_v43  ;;  %1671 = vmatmul.mubr.bf16.vlgmr.msra.gmra.mxu1 %v1195_v36  ;;  %v1162_v5 = vmul.f32 0.5, %v1146_v0 }
 0x174   : > { %v1151_v51 = vadd.f32 1.0, %v2273_v50  ;;  %v1164_v11 = vmul.f32 0.5, %v1148_v1 }
 0x175   : > { %v2275_v3 = vpop.eup %2274  ;;  %v1165_v33 = vmul.f32 0.5, %v1149_v32  ;;  %v1178_v18 = vmul.f32 %v1162_v5, %v2759_v6  ;;  %v1192_v32 = vld [vmem:[#allocation2 + $0x38] sm:$0xff] }
 0x176   : > { %v2277_v4 = vpop.eup %2276  ;;  %v1167_v8 = vmul.f32 0.5, %v1151_v51  ;;  %v1150_v9 = vadd.f32 1.0, %v2275_v3  ;;  %v1180_v23 = vmul.f32 %v1164_v11, %v2761_v7 }
 0x177   : > { %v1152_v12 = vadd.f32 1.0, %v2277_v4  ;;  %v1181_v15 = vmul.f32 %v1165_v33, %v2770_v17 }
 0x178   : > { %v1166_v14 = vmul.f32 0.5, %v1150_v9  ;;  %v1183_v19 = vmul.f32 %v1167_v8, %v2773_v21  ;;  %v1185_v21 = vld [vmem:[#allocation2 + $0x30] sm:$0xff] }
 0x179   : > { %v1168_v16 = vmul.f32 0.5, %v1152_v12  ;;  %v1197_v28 = vpack.c.bf16 %v1181_v15, %v1177_v22 }
 0x17a   : > { %v1182_v20 = vmul.f32 %v1166_v14, %v2784_v34  ;;  %v1199_v17 = vpack.c.bf16 %v1183_v19, %v1179_v25 }
 0x17b   : > { %v1184_v24 = vmul.f32 %v1168_v16, %v2789_v40 }
 0x17c   : > { %v1198_v26 = vpack.c.bf16 %v1182_v20, %v1178_v18 }
 0x17d   : > { %v1200_v27 = vpack.c.bf16 %v1184_v24, %v1180_v23 }
 0x17e   : > { %1627 = vmatprep.mubr.bf16.mxu0 %v1198_v26 }
 0x17f   : > { %1680 = vmatprep.mubr.bf16.mxu1 %v1200_v27  ;;  %1628 = vmatmul.mubr.bf16.gmra.mxu0 %v1197_v28 }
 0x180   : > { %1681 = vmatmul.mubr.bf16.gmra.mxu1 %v1199_v17 }
 0x232   : > { %v1619_v6 = vpop.f32.mrf.mxu0 }
 0x233   : > { %v1672_v29 = vpop.f32.mrf.mxu1 }
 0x234   : > { %v1673_v34 = vadd.f32 %v1672_v29, %v1619_v6  ;;  %v1621_v30 = vpop.f32.mrf.mxu0 }
 0x235   : > { %v1674_v31 = vpop.f32.mrf.mxu1 }
 0x236   : > { %v1691_v7 = vadd.f32 %v1673_v34, %v1185_v21  ;;  %v1675_v35 = vadd.f32 %v1674_v31, %v1621_v30  ;;  %v1623_v40 = vpop.f32.mrf.mxu0 }
 0x237   : > { %v1676_v61 = vpop.f32.mrf.mxu1 }
 0x238   : > { %1699 = vst [vmem:[#allocation2 + $0x30] sm:$0xff] %v1691_v7  ;;  %v1692_v39 = vadd.f32 %v1675_v35, %v1186_v60  ;;  %v1677_v41 = vadd.f32 %v1676_v61, %v1623_v40  ;;  %v1625_v44 = vpop.f32.mrf.mxu0 }
 0x239   : > { %v1678_v46 = vpop.f32.mrf.mxu1 }
 0x23a   : > { %1700 = vst [vmem:[#allocation2] sm:$0xff] %v1692_v39  ;;  %v1693_v47 = vadd.f32 %v1677_v41, %v1187_v38  ;;  %v1679_v48 = vadd.f32 %v1678_v46, %v1625_v44 }
 0x23c   : > { %1701 = vst [vmem:[#allocation2 + $0x18] sm:$0xff] %v1693_v47  ;;  %v1694_v49 = vadd.f32 %v1679_v48, %v1188_v45 }
 0x23e   : > { %1702 = vst [vmem:[#allocation2 + $0x10] sm:$0xff] %v1694_v49 }
 0x23f   : > { %v1629_v52 = vpop.f32.mrf.mxu0 }
 0x240   : > { %v1682_v54 = vpop.f32.mrf.mxu1 }
 0x241   : > { %v1683_v55 = vadd.f32 %v1682_v54, %v1629_v52  ;;  %v1631_v56 = vpop.f32.mrf.mxu0 }
 0x242   : > { %v1684_v58 = vpop.f32.mrf.mxu1 }
 0x243   : > { %v1695_v59 = vadd.f32 %v1683_v55, %v1189_v53  ;;  %v1685_v42 = vadd.f32 %v1684_v58, %v1631_v56  ;;  %v1633_v62 = vpop.f32.mrf.mxu0 }
 0x244   : > { %v1686_v36 = vpop.f32.mrf.mxu1 }
 0x245   : > { %1703 = vst [vmem:[#allocation2 + $0x8] sm:$0xff] %v1695_v59  ;;  %v1696_v43 = vadd.f32 %v1685_v42, %v1190_v57  ;;  %v1687_v50 = vadd.f32 %v1686_v36, %v1633_v62  ;;  %v1635_v0 = vpop.f32.mrf.mxu0 }
 0x246   : > { %v1688_v37 = vpop.f32.mrf.mxu1 }
 0x247   : > { %1704 = vst [vmem:[#allocation2 + $0x20] sm:$0xff] %v1696_v43  ;;  %v1697_v1 = vadd.f32 %v1687_v50, %v1191_v63  ;;  %v1689_v51 = vadd.f32 %v1688_v37, %v1635_v0  ;;  %1710 = sbr.rel (%p2001_p11) target bundleno = 596 (0x254), region = 71 }
 0x249   : > { %1705 = vst [vmem:[#allocation2 + $0x28] sm:$0xff] %v1697_v1  ;;  %v1698_v2 = vadd.f32 %v1689_v51, %v1192_v32 }
 0x24b   : > { %1706 = vst [vmem:[#allocation2 + $0x38] sm:$0xff] %v1698_v2 }
 0x24c   : > { %v1711_v3 = vld [vmem:[#allocation2 + $0x30] sm:$0xff]  ;;  %v1712_v33 = vld [vmem:[#allocation2] sm:$0xff]  ;;  %v1713_v4 = vld [vmem:[#allocation2 + $0x18] sm:$0xff] }
 0x24d   : > { %1719 = vst [vmem:[%s2868_s5] sm:$0xff] %v1711_v3  ;;  %1720 = vst [vmem:[%s2868_s5 + $0x8] sm:$0xff] %v1712_v33  ;;  %v1714_v5 = vld [vmem:[#allocation2 + $0x10] sm:$0xff]  ;;  %v1715_v8 = vld [vmem:[#allocation2 + $0x8] sm:$0xff] }
 0x24e   : > { %1721 = vst [vmem:[%s2868_s5 + $0x10] sm:$0xff] %v1713_v4  ;;  %v1716_v9 = vld [vmem:[#allocation2 + $0x20] sm:$0xff]  ;;  %1722 = vst [vmem:[%s2868_s5 + $0x18] sm:$0xff] %v1714_v5 }
 0x24f   : > { %1723 = vst [vmem:[%s2868_s5 + $0x20] sm:$0xff] %v1715_v8  ;;  %1724 = vst [vmem:[%s2868_s5 + $0x28] sm:$0xff] %v1716_v9 }
 0x250   : > { %v1717_v10 = vld [vmem:[#allocation2 + $0x28] sm:$0xff] }
 0x251   : > { %1725 = vst [vmem:[%s2868_s5 + $0x30] sm:$0xff] %v1717_v10 }
 0x252   : > { %v1718_v11 = vld [vmem:[#allocation2 + $0x38] sm:$0xff] }
 0x253   : > { %1726 = vst [vmem:[%s2868_s5 + $0x38] sm:$0xff] %v1718_v11 }
 0x254 PF: > { %s15_s22 = sadd.s32 1, %s2316_s22   ;;  %s2869_s18 = smov %s2304_s19 }
 0x255   : > { %p12_p12 = scmp.ge.s32.totalorder %s15_s22, 4   ;;  %s2870_s19 = smov %s2383_s26 }
 0x256   : > { %s2871_s20 = smov %s2312_s21  ;;  %s2872_s21 = smov %s2874_s23 }
 0x257   :  { %14 = sbr.rel (!%p12_p12) target bundleno = 3 (0x3), region = 118 }

// kernel: falcon_forward.8
= control target key start
LH: loop header
LB: loop body
LE: loop exit
PB: predicated region body
PF: predicated region fallthrough
CT: control target
= control target key end

     0   :  { %s2235_s30 = smov 0   ;;  %s2622_s0 = inlined_call_operand.vmem [shape: f32[2,16,256], index: 0, kind: input, shape index: {}]   ;;  %s2623_s1 = inlined_call_operand.vmem [shape: f32[1,256], index: 1, kind: input, shape index: {}]   ;;  %s2624_s2 = inlined_call_operand.vmem [shape: f32[1,256], index: 2, kind: input, shape index: {}]   ;;  %s2625_s3 = inlined_call_operand.vmem [shape: bf16[4,256,64], index: 3, kind: input, shape index: {}]   ;;  %s2626_s4 = inlined_call_operand.vmem [shape: bf16[256,64], index: 4, kind: input, shape index: {}]   ;;  %s2627_s5 = inlined_call_operand.vmem [shape: bf16[256,64], index: 5, kind: input, shape index: {}]   ;;  %s2628_s6 = inlined_call_operand.vmem [shape: bf16[2,16,256], index: 6, kind: output, shape index: {0}]   ;;  %s2629_s7 = inlined_call_operand.vmem [shape: bf16[2,4,16,64], index: 7, kind: output, shape index: {1}]   ;;  %s2630_s8 = inlined_call_operand.vmem [shape: bf16[2,16,64], index: 8, kind: output, shape index: {2}]   ;;  %s2631_s9 = inlined_call_operand.vmem [shape: bf16[2,16,64], index: 9, kind: output, shape index: {3}]  }
   0x1 LB: > { %s1689_s10 = sadd.s32 4294967295, %s2183_s30   ;;  %p1693_p0 = scmp.ge.s32.totalorder %s2183_s30, 1  ;;  %s2183_s30 = sphi %s2235_s30, %s20_s30  }
   0x2   : > { %p294_p1 = scmp.lt.s32.totalorder %s2183_s30, 3 }
   0x4   : > { %p295_p2 = pnand %p1693_p0, %p294_p1 }
   0x5   : > { %p345_p3 = scmp.lt.s32.totalorder (!%p295_p2), %s1689_s10, 1 }
   0x6   : > { %298 = sbr.rel (%p295_p2) target bundleno = 601 (0x259), region = 44 }
   0xb   : > { %s2633_s10 = smov (!%p345_p3, %s1689_s10), 1  ;;  %v2077_v6 = vld [vmem:[%s2626_s4 + $0x78] sm:$0xff]   ;;  %v2081_v24 = vld [vmem:[%s2626_s4 + $0x70] sm:$0xff]   ;;  %v2085_v28 = vld [vmem:[%s2626_s4 + $0x68] sm:$0xff]   ;;  %v410_v58 = vlaneseq  ;;  %vm631_vm0 = vcmask 519168  }
   0xc   : > { %s1918_s11 = sshll.u32 %s2633_s10, 5  ;;  %v2078_v7 = vld [vmem:[%s2627_s5 + $0x78] sm:$0xff]   ;;  %1937 = vmatprep.subr.bf16.mxu0 %v2077_v6  ;;  %v2082_v25 = vld [vmem:[%s2627_s5 + $0x70] sm:$0xff]   ;;  %v2086_v29 = vld [vmem:[%s2627_s5 + $0x68] sm:$0xff]   ;;  %s1919_s15 = sshll.u32 %s2633_s10, 4 }
   0xd   : > { %s349_s14 = scalar_lea.vmem %s2622_s0, %s1918_s11  ;;  %v2079_v8 = vld [vmem:[%s2626_s4 + $0x38] sm:$0xff]   ;;  %1959 = vmatprep.subr.bf16.mxu1 %v2078_v7  ;;  %v2083_v26 = vld [vmem:[%s2626_s4 + $0x30] sm:$0xff]   ;;  %v2087_v30 = vld [vmem:[%s2626_s4 + $0x28] sm:$0xff]   ;;  %v411_v61 = vshrl.u32 %v410_v58, 7  ;;  %s354_s18 = scalar_lea.vmem %s2628_s6, %s1919_s15 }
   0xe   : > { %v371_v0 = vld [vmem:[%s349_s14] sm:$0xff]  ;;  %v372_v1 = vld [vmem:[%s349_s14 + $0x8] sm:$0xff]  ;;  %v373_v2 = vld [vmem:[%s349_s14 + $0x10] sm:$0xff]  ;;  %1938 = vmatpush3.bf16.msra.mxu0 %v2079_v8  ;;  %s1921_s17 = sshll.u32 %s2633_s10, 3  ;;  %s2601_s26 = scalar_lea.vmem %s2629_s7, %s1918_s11 }
   0xf   : > { %v375_v3 = vadd.f32 %v372_v1, %v371_v0  ;;  %v374_v4 = vld [vmem:[%s349_s14 + $0x18] sm:$0xff]  ;;  %v2084_v27 = vld [vmem:[%s2627_s5 + $0x30] sm:$0xff]   ;;  %1939 = vmatprep.subr.bf16.mxu0 %v2081_v24  ;;  %v2088_v31 = vld [vmem:[%s2627_s5 + $0x28] sm:$0xff]   ;;  %v412_v62 = vsub.s32 0, %v411_v61  ;;  %v416_v63 = vsub.s32 1, %v411_v61  ;;  %s364_s20 = scalar_lea.vmem %s2630_s8, %s1921_s17  ;;  %s369_s23 = scalar_lea.vmem %s2631_s9, %s1921_s17 }
  0x10   : > { %v378_v5 = vadd.f32 %v374_v4, %v373_v2  ;;  %v2080_v9 = vld [vmem:[%s2627_s5 + $0x38] sm:$0xff]   ;;  %v2089_v32 = vld [vmem:[%s2626_s4 + $0x60] sm:$0xff]   ;;  %v2097_v40 = vld [vmem:[%s2626_s4 + $0x50] sm:$0xff]  }
  0x11   : > { %376 = vadd.xlane.f32.xlu0 %v375_v3  ;;  %1960 = vmatpush3.bf16.msra.mxu1 %v2080_v9  ;;  %v2090_v33 = vld [vmem:[%s2627_s5 + $0x60] sm:$0xff]   ;;  %v2093_v36 = vld [vmem:[%s2626_s4 + $0x58] sm:$0xff]   ;;  %v2098_v41 = vld [vmem:[%s2627_s5 + $0x50] sm:$0xff]  }
  0x12   : > { %1961 = vmatprep.subr.bf16.mxu1 %v2082_v25  ;;  %1940 = vmatpush3.bf16.msra.mxu0 %v2083_v26  ;;  %v2091_v34 = vld [vmem:[%s2626_s4 + $0x20] sm:$0xff]   ;;  %v2094_v37 = vld [vmem:[%s2627_s5 + $0x58] sm:$0xff]   ;;  %v2099_v42 = vld [vmem:[%s2626_s4 + $0x10] sm:$0xff]  }
  0x13   : > { %1941 = vmatprep.subr.bf16.mxu0 %v2085_v28  ;;  %v2092_v35 = vld [vmem:[%s2627_s5 + $0x20] sm:$0xff]   ;;  %v2095_v38 = vld [vmem:[%s2626_s4 + $0x18] sm:$0xff]   ;;  %v2100_v43 = vld [vmem:[%s2627_s5 + $0x10] sm:$0xff]  }
  0x14   : > { %v2096_v39 = vld [vmem:[%s2627_s5 + $0x18] sm:$0xff]   ;;  %v2101_v44 = vld [vmem:[%s2626_s4 + $0x48] sm:$0xff]   ;;  %v2105_v48 = vld [vmem:[%s2626_s4 + $0x40] sm:$0xff]  }
  0x15   : > { %379 = vadd.xlane.f32.xlu0 %v378_v5  ;;  %1962 = vmatpush3.bf16.msra.mxu1 %v2084_v27  ;;  %v2102_v45 = vld [vmem:[%s2627_s5 + $0x48] sm:$0xff]   ;;  %v2106_v49 = vld [vmem:[%s2627_s5 + $0x40] sm:$0xff]   ;;  %v2109_v52 = vld [vmem:[%s2625_s3 + $0x78] sm:$0xff]  }
  0x16   : > { %1963 = vmatprep.subr.bf16.mxu1 %v2086_v29  ;;  %1942 = vmatpush3.bf16.msra.mxu0 %v2087_v30  ;;  %v2103_v46 = vld [vmem:[%s2626_s4 + $0x8] sm:$0xff]   ;;  %v2107_v50 = vld [vmem:[%s2626_s4] sm:$0xff]   ;;  %v2110_v53 = vld [vmem:[%s2625_s3 + $0xf8] sm:$0xff]  }
  0x17   : > { %1943 = vmatprep.subr.bf16.mxu0 %v2089_v32  ;;  %v2104_v47 = vld [vmem:[%s2627_s5 + $0x8] sm:$0xff]   ;;  %v2108_v51 = vld [vmem:[%s2627_s5] sm:$0xff]   ;;  %v2113_v26 = vld [vmem:[%s2625_s3 + $0x70] sm:$0xff]  }
  0x18   : > { %v2114_v27 = vld [vmem:[%s2625_s3 + $0xf0] sm:$0xff]   ;;  %v2117_v30 = vld [vmem:[%s2625_s3 + $0x68] sm:$0xff]  }
  0x19   : > { %1964 = vmatpush3.bf16.msra.mxu1 %v2088_v31  ;;  %v2115_v28 = vld [vmem:[%s2625_s3 + $0x30] sm:$0xff]   ;;  %v2118_v31 = vld [vmem:[%s2625_s3 + $0xe8] sm:$0xff]  }
  0x1a   : > { %1965 = vmatprep.subr.bf16.mxu1 %v2090_v33  ;;  %1944 = vmatpush3.bf16.msra.mxu0 %v2091_v34  ;;  %v2116_v29 = vld [vmem:[%s2625_s3 + $0xb0] sm:$0xff]   ;;  %v2119_v32 = vld [vmem:[%s2625_s3 + $0x28] sm:$0xff]   ;;  %v2121_v34 = vld [vmem:[%s2625_s3 + $0x60] sm:$0xff]  }
  0x1b   : > { %1945 = vmatprep.subr.bf16.mxu0 %v2093_v36  ;;  %v2120_v33 = vld [vmem:[%s2625_s3 + $0xa8] sm:$0xff]   ;;  %v2123_v36 = vld [vmem:[%s2625_s3 + $0x20] sm:$0xff]   ;;  %v2145_v58 = vld [vmem:[%s2625_s3 + $0x170] sm:$0xff]  }
  0x1c   : > { %v2148_v61 = vld [vmem:[%s2625_s3 + $0x1b0] sm:$0xff]  }
  0x1d   : > { %1966 = vmatpush3.bf16.msra.mxu1 %v2092_v35  ;;  %v2122_v35 = vld [vmem:[%s2625_s3 + $0xe0] sm:$0xff]  }
  0x1e   : > { %1967 = vmatprep.subr.bf16.mxu1 %v2094_v37  ;;  %1946 = vmatpush3.bf16.msra.mxu0 %v2095_v38  ;;  %v2124_v37 = vld [vmem:[%s2625_s3 + $0xa0] sm:$0xff]   ;;  %v2125_v38 = vld [vmem:[%s2625_s3 + $0x58] sm:$0xff]  }
  0x1f   : > { %1947 = vmatprep.subr.bf16.mxu0 %v2097_v40  ;;  %v2127_v40 = vld [vmem:[%s2625_s3 + $0x18] sm:$0xff]  }
  0x21   : > { %1968 = vmatpush3.bf16.msra.mxu1 %v2096_v39  ;;  %v2126_v39 = vld [vmem:[%s2625_s3 + $0xd8] sm:$0xff]  }
  0x22   : > { %1969 = vmatprep.subr.bf16.mxu1 %v2098_v41  ;;  %1948 = vmatpush3.bf16.msra.mxu0 %v2099_v42  ;;  %v2128_v41 = vld [vmem:[%s2625_s3 + $0x98] sm:$0xff]   ;;  %v2129_v42 = vld [vmem:[%s2625_s3 + $0x50] sm:$0xff]  }
  0x23   : > { %1949 = vmatprep.subr.bf16.mxu0 %v2101_v44  ;;  %v2131_v44 = vld [vmem:[%s2625_s3 + $0x10] sm:$0xff]  }
  0x25   : > { %1970 = vmatpush3.bf16.msra.mxu1 %v2100_v43  ;;  %v2130_v43 = vld [vmem:[%s2625_s3 + $0xd0] sm:$0xff]  }
  0x26   : > { %1971 = vmatprep.subr.bf16.mxu1 %v2102_v45  ;;  %1950 = vmatpush3.bf16.msra.mxu0 %v2103_v46  ;;  %v2132_v45 = vld [vmem:[%s2625_s3 + $0x90] sm:$0xff]   ;;  %v2133_v46 = vld [vmem:[%s2625_s3 + $0x48] sm:$0xff]  }
  0x27   : > { %1951 = vmatprep.subr.bf16.mxu0 %v2105_v48  ;;  %v2135_v48 = vld [vmem:[%s2625_s3 + $0x8] sm:$0xff]  }
  0x29   : > { %1972 = vmatpush3.bf16.msra.mxu1 %v2104_v47  ;;  %v2134_v47 = vld [vmem:[%s2625_s3 + $0xc8] sm:$0xff]  }
  0x2a   : > { %1973 = vmatprep.subr.bf16.mxu1 %v2106_v49  ;;  %1952 = vmatpush3.bf16.msra.mxu0 %v2107_v50  ;;  %v2136_v49 = vld [vmem:[%s2625_s3 + $0x88] sm:$0xff]   ;;  %v2137_v50 = vld [vmem:[%s2625_s3 + $0x40] sm:$0xff]  }
  0x2b   : > { %1981 = vmatprep.subr.bf16.mxu0 %v2109_v52  ;;  %v2139_v52 = vld [vmem:[%s2625_s3] sm:$0xff]  }
  0x2d   : > { %1974 = vmatpush3.bf16.msra.mxu1 %v2108_v51  ;;  %v2138_v51 = vld [vmem:[%s2625_s3 + $0xc0] sm:$0xff]  }
  0x2e   : > { %2003 = vmatprep.subr.bf16.mxu1 %v2110_v53  ;;  %v2140_v53 = vld [vmem:[%s2625_s3 + $0x80] sm:$0xff]  }
  0x9a   : > { %v377_v10 = vpop.xlane.xlu0 %376 }
  0x9b   : > { %v382_v11 = vmul.f32 0.00390625, %v377_v10 }
  0x9d   : > { %v2263_v12 = vsub.f32 %v371_v0, %v382_v11  ;;  %v2265_v13 = vsub.f32 %v372_v1, %v382_v11  ;;  %v408_v0 = vld [vmem:[%s2623_s1] sm:$0x3] }
  0x9e   : > { %v380_v14 = vpop.xlane.xlu0 %379  ;;  %v424_v1 = vld [vmem:[%s2624_s2] sm:$0x3]  ;;  %v417_v3 = vrot.slane %v408_v0, %v416_v63 }
  0x9f   : > { %v383_v15 = vmul.f32 0.00390625, %v380_v14  ;;  %v388_v16 = vmul.f32 %v2263_v12, %v2263_v12  ;;  %v389_v17 = vmul.f32 %v2265_v13, %v2265_v13  ;;  %v429_v7 = vrot.slane %v424_v1, %v412_v62 }
  0xa0   : > { %v433_v8 = vrot.slane %v424_v1, %v416_v63  ;;  %v2150_v63 = vld [vmem:[%s2625_s3 + $0x1e8] sm:$0xff]  }
  0xa1   : > { %v2271_v18 = vsub.f32 %v373_v2, %v383_v15  ;;  %v2273_v19 = vsub.f32 %v374_v4, %v383_v15  ;;  %v392_v20 = vadd.f32 %v389_v17, %v388_v16  ;;  %v413_v2 = vrot.slane %v408_v0, %v412_v62  ;;  %v2149_v62 = vld [vmem:[%s2625_s3 + $0x168] sm:$0xff]  }
  0xa2   : > { %v2151_v0 = vld [vmem:[%s2625_s3 + $0x128] sm:$0xff]  }
  0xa3   : > { %393 = vadd.xlane.f32.xlu1 %v392_v20  ;;  %v390_v21 = vmul.f32 %v2271_v18, %v2271_v18  ;;  %v391_v22 = vmul.f32 %v2273_v19, %v2273_v19  ;;  %v2152_v1 = vld [vmem:[%s2625_s3 + $0x1a8] sm:$0xff]  }
  0xa5   : > { %v395_v23 = vadd.f32 %v391_v22, %v390_v21 }
  0xa7   : > { %396 = vadd.xlane.f32.xlu1 %v395_v23 }
 0x12c   : > { %v394_v54 = vpop.xlane.xlu1 %393 }
 0x12d   : > { %v398_v55 = vmul.f32 0.00390625, %v394_v54  ;;  %v2141_v54 = vld [vmem:[%s2625_s3 + $0x178] sm:$0xff]  }
 0x12f   : > { %v400_v56 = vadd.f32 1e-05, %v398_v55  ;;  %v2142_v55 = vld [vmem:[%s2625_s3 + $0x1f8] sm:$0xff]  }
 0x130   : > { %v397_v57 = vpop.xlane.xlu1 %396 }
 0x131   : > { %2173 = vrsqrt.f32 %v400_v56  ;;  %v399_v59 = vmul.f32 0.00390625, %v397_v57  ;;  %v2143_v56 = vld [vmem:[%s2625_s3 + $0x138] sm:$0xff]  }
 0x132   : > { %v2144_v57 = vld [vmem:[%s2625_s3 + $0x1b8] sm:$0xff]  }
 0x133   : > { %v401_v60 = vadd.f32 1e-05, %v399_v59  ;;  %v2146_v59 = vld [vmem:[%s2625_s3 + $0x1f0] sm:$0xff]  }
 0x135   : > { %2175 = vrsqrt.f32 %v401_v60  ;;  %v2147_v60 = vld [vmem:[%s2625_s3 + $0x130] sm:$0xff]  }
 0x13e   : > { %v2174_v4 = vpop.eup %2173 }
 0x13f   : > { %v404_v5 = vmul.f32 %v2174_v4, %v2263_v12  ;;  %v405_v6 = vmul.f32 %v2174_v4, %v2265_v13  ;;  %v2155_v4 = vld [vmem:[%s2625_s3 + $0x120] sm:$0xff]  }
 0x141   : > { %v420_v9 = vmul.f32 %v413_v2, %v404_v5  ;;  %v421_v10 = vmul.f32 %v417_v3, %v405_v6  ;;  %v2156_v5 = vld [vmem:[%s2625_s3 + $0x1a0] sm:$0xff]   ;;  %v2157_v6 = vld [vmem:[%s2625_s3 + $0x158] sm:$0xff]  }
 0x142   : > { %v2176_v11 = vpop.eup %2175 }
 0x143   : > { %v406_v14 = vmul.f32 %v2176_v11, %v2271_v18  ;;  %v407_v15 = vmul.f32 %v2176_v11, %v2273_v19  ;;  %v437_v16 = vadd.f32 %v433_v8, %v421_v10  ;;  %v436_v17 = vadd.f32 %v429_v7, %v420_v9  ;;  %v2111_v18 = vld [vmem:[%s2625_s3 + $0x38] sm:$0xff]   ;;  %v2161_v10 = vld [vmem:[%s2625_s3 + $0x150] sm:$0xff]  }
 0x144   : > { %v2112_v19 = vld [vmem:[%s2625_s3 + $0xb8] sm:$0xff]   ;;  %v2162_v11 = vld [vmem:[%s2625_s3 + $0x1d0] sm:$0xff]  }
 0x145   : > { %v422_v20 = vmul.f32 %v413_v2, %v406_v14  ;;  %v423_v12 = vmul.f32 %v417_v3, %v407_v15  ;;  %v1923_v21 = vpack.c.bf16 %v437_v16, %v436_v17  ;;  %v2153_v2 = vld [vmem:[%s2625_s3 + $0x160] sm:$0xff]   ;;  %v2160_v9 = vld [vmem:[%s2625_s3 + $0x198] sm:$0xff]   ;;  %v2163_v14 = vld [vmem:[%s2625_s3 + $0x110] sm:$0xff]  }
 0x146   : > { %v2154_v3 = vld [vmem:[%s2625_s3 + $0x1e0] sm:$0xff]   ;;  %v2164_v15 = vld [vmem:[%s2625_s3 + $0x190] sm:$0xff]  }
 0x147   : > { %v438_v13 = vadd.f32 %v429_v7, %v422_v20  ;;  %v439_v22 = vadd.f32 %v433_v8, %v423_v12  ;;  %452 = vst [vmem:[%s354_s18] sm:$0xff] %v1923_v21  ;;  %v2158_v7 = vld [vmem:[%s2625_s3 + $0x1d8] sm:$0xff]   ;;  %v2167_v20 = vld [vmem:[%s2625_s3 + $0x108] sm:$0xff]   ;;  %v2169_v21 = vld [vmem:[%s2625_s3 + $0x140] sm:$0xff]  }
 0x148   : > { %v2159_v8 = vld [vmem:[%s2625_s3 + $0x118] sm:$0xff]   ;;  %v2168_v12 = vld [vmem:[%s2625_s3 + $0x188] sm:$0xff]  }
 0x149   : > { %v1924_v23 = vpack.c.bf16 %v439_v22, %v438_v13  ;;  %v2383_v24 = vpack.c.bf16 %v439_v22, %v437_v16  ;;  %v2385_v25 = vpack.c.bf16 %v438_v13, %v436_v17  ;;  %v2165_v16 = vld [vmem:[%s2625_s3 + $0x148] sm:$0xff]   ;;  %v2170_v13 = vld [vmem:[%s2625_s3 + $0x1c0] sm:$0xff]  }
 0x14a   : > { %v2166_v17 = vld [vmem:[%s2625_s3 + $0x1c8] sm:$0xff]   ;;  %v2171_v22 = vld [vmem:[%s2625_s3 + $0x100] sm:$0xff]  }
 0x14b   : > { %453 = vst [vmem:[%s354_s18 + $0x8] sm:$0xff] %v1924_v23  ;;  %614 = vmatprep.mubr.bf16.mxu0 %v2383_v24  ;;  %794 = vmatprep.mubr.bf16.mxu1 %v2383_v24  ;;  %v2172_v23 = vld [vmem:[%s2625_s3 + $0x180] sm:$0xff]  }
 0x14c   : > { %615 = vmatmul.mubr.bf16.vlgmr.msra.gmra.mxu0 %v2385_v25  ;;  %795 = vmatmul.mubr.bf16.vlgmr.msra.gmra.mxu1 %v2385_v25 }
 0x14d   : > { %1982 = vmatpush3.bf16.msra.mxu0 %v2111_v18  ;;  %2004 = vmatpush3.bf16.msra.mxu1 %v2112_v19 }
 0x14e   : > { %973 = vmatprep.mubr.bf16.mxu0 %v2383_v24  ;;  %1153 = vmatprep.mubr.bf16.mxu1 %v2383_v24 }
 0x14f   : > { %1983 = vmatprep.subr.bf16.mxu0 %v2113_v26  ;;  %2005 = vmatprep.subr.bf16.mxu1 %v2114_v27 }
 0x151   : > { %1984 = vmatpush3.bf16.msra.mxu0 %v2115_v28  ;;  %2006 = vmatpush3.bf16.msra.mxu1 %v2116_v29 }
 0x152   : > { %1985 = vmatprep.subr.bf16.mxu0 %v2117_v30  ;;  %2007 = vmatprep.subr.bf16.mxu1 %v2118_v31 }
 0x155   : > { %1986 = vmatpush3.bf16.msra.mxu0 %v2119_v32  ;;  %2008 = vmatpush3.bf16.msra.mxu1 %v2120_v33 }
 0x156   : > { %1987 = vmatprep.subr.bf16.mxu0 %v2121_v34  ;;  %2009 = vmatprep.subr.bf16.mxu1 %v2122_v35 }
 0x159   : > { %1988 = vmatpush3.bf16.msra.mxu0 %v2123_v36  ;;  %2010 = vmatpush3.bf16.msra.mxu1 %v2124_v37 }
 0x15a   : > { %1989 = vmatprep.subr.bf16.mxu0 %v2125_v38  ;;  %2011 = vmatprep.subr.bf16.mxu1 %v2126_v39 }
 0x15d   : > { %1990 = vmatpush3.bf16.msra.mxu0 %v2127_v40  ;;  %2012 = vmatpush3.bf16.msra.mxu1 %v2128_v41 }
 0x15e   : > { %1991 = vmatprep.subr.bf16.mxu0 %v2129_v42  ;;  %2013 = vmatprep.subr.bf16.mxu1 %v2130_v43 }
 0x161   : > { %1992 = vmatpush3.bf16.msra.mxu0 %v2131_v44  ;;  %2014 = vmatpush3.bf16.msra.mxu1 %v2132_v45 }
 0x162   : > { %1993 = vmatprep.subr.bf16.mxu0 %v2133_v46  ;;  %2015 = vmatprep.subr.bf16.mxu1 %v2134_v47 }
 0x165   : > { %1994 = vmatpush3.bf16.msra.mxu0 %v2135_v48  ;;  %2016 = vmatpush3.bf16.msra.mxu1 %v2136_v49 }
 0x166   : > { %1995 = vmatprep.subr.bf16.mxu0 %v2137_v50  ;;  %2017 = vmatprep.subr.bf16.mxu1 %v2138_v51 }
 0x169   : > { %1996 = vmatpush3.bf16.msra.mxu0 %v2139_v52  ;;  %2018 = vmatpush3.bf16.msra.mxu1 %v2140_v53 }
 0x16a   : > { %2025 = vmatprep.subr.bf16.mxu0 %v2141_v54  ;;  %2047 = vmatprep.subr.bf16.mxu1 %v2142_v55 }
 0x16c   : > { %974 = vmatmul.mubr.bf16.vlgmr.msra.gmra.mxu0 %v2385_v25  ;;  %1154 = vmatmul.mubr.bf16.vlgmr.msra.gmra.mxu1 %v2385_v25 }
 0x16d   : > { %2026 = vmatpush3.bf16.msra.mxu0 %v2143_v56  ;;  %1334 = vmatprep.mubr.bf16.mxu0 %v2383_v24 }
 0x16e   : > { %2048 = vmatpush3.bf16.msra.mxu1 %v2144_v57  ;;  %1515 = vmatprep.mubr.bf16.mxu1 %v2383_v24 }
 0x16f   : > { %2027 = vmatprep.subr.bf16.mxu0 %v2145_v58  ;;  %2049 = vmatprep.subr.bf16.mxu1 %v2146_v59 }
 0x171   : > { %2028 = vmatpush3.bf16.msra.mxu0 %v2147_v60 }
 0x172   : > { %2050 = vmatpush3.bf16.msra.mxu1 %v2148_v61  ;;  %2029 = vmatprep.subr.bf16.mxu0 %v2149_v62 }
 0x173   : > { %2051 = vmatprep.subr.bf16.mxu1 %v2150_v63 }
 0x175   : > { %2030 = vmatpush3.bf16.msra.mxu0 %v2151_v0 }
 0x176   : > { %2052 = vmatpush3.bf16.msra.mxu1 %v2152_v1  ;;  %2031 = vmatprep.subr.bf16.mxu0 %v2153_v2 }
 0x177   : > { %2053 = vmatprep.subr.bf16.mxu1 %v2154_v3 }
 0x179   : > { %2032 = vmatpush3.bf16.msra.mxu0 %v2155_v4 }
 0x17a   : > { %2054 = vmatpush3.bf16.msra.mxu1 %v2156_v5  ;;  %2033 = vmatprep.subr.bf16.mxu0 %v2157_v6 }
 0x17b   : > { %2055 = vmatprep.subr.bf16.mxu1 %v2158_v7 }
 0x17d   : > { %2034 = vmatpush3.bf16.msra.mxu0 %v2159_v8 }
 0x17e   : > { %2056 = vmatpush3.bf16.msra.mxu1 %v2160_v9  ;;  %2035 = vmatprep.subr.bf16.mxu0 %v2161_v10 }
 0x17f   : > { %2057 = vmatprep.subr.bf16.mxu1 %v2162_v11 }
 0x181   : > { %2036 = vmatpush3.bf16.msra.mxu0 %v2163_v14 }
 0x182   : > { %2058 = vmatpush3.bf16.msra.mxu1 %v2164_v15  ;;  %2037 = vmatprep.subr.bf16.mxu0 %v2165_v16 }
 0x183   : > { %2059 = vmatprep.subr.bf16.mxu1 %v2166_v17 }
 0x185   : > { %2038 = vmatpush3.bf16.msra.mxu0 %v2167_v20 }
 0x186   : > { %2060 = vmatpush3.bf16.msra.mxu1 %v2168_v12  ;;  %2039 = vmatprep.subr.bf16.mxu0 %v2169_v21 }
 0x187   : > { %2061 = vmatprep.subr.bf16.mxu1 %v2170_v13 }
 0x189   : > { %2040 = vmatpush3.bf16.msra.mxu0 %v2171_v22 }
 0x18a   : > { %2062 = vmatpush3.bf16.msra.mxu1 %v2172_v23 }
 0x18c   : > { %1335 = vmatmul.mubr.bf16.vlgmr.msra.gmra.mxu0 %v2385_v25 }
 0x18d   : > { %1516 = vmatmul.mubr.bf16.vlgmr.msra.gmra.mxu1 %v2385_v25 }
 0x20c   : > { %v1953_v24 = vpop.f32.mrf.mxu0  ;;  %v1975_v18 = vpop.f32.mrf.mxu1 }
 0x20e   : > { %v1954_v19 = vpop.f32.mrf.mxu0  ;;  %v1976_v26 = vpop.f32.mrf.mxu1 }
 0x20f   : > { %v1955_v27 = vadd.f32 %v1954_v19, %v1953_v24  ;;  %v1977_v28 = vadd.f32 %v1976_v26, %v1975_v18 }
 0x210   : > { %v1956_v29 = vpop.f32.mrf.mxu0  ;;  %v1978_v30 = vpop.f32.mrf.mxu1 }
 0x211   : > { %v1925_v31 = vpack.c.bf16 %v1955_v27, %v1955_v27  ;;  %v1927_v25 = vpack.c.bf16 %v1977_v28, %v1977_v28 }
 0x212   : > { %v1957_v32 = vpop.f32.mrf.mxu0  ;;  %v1979_v33 = vpop.f32.mrf.mxu1 }
 0x213   : > { %632 = vst.msk [vmem:[%s364_s20] sm:$0xf] %vm631_vm0, %v1925_v31  ;;  %811 = vst.msk [vmem:[%s369_s23] sm:$0xf] %vm631_vm0, %v1927_v25  ;;  %v1958_v34 = vadd.f32 %v1957_v32, %v1956_v29  ;;  %v1980_v35 = vadd.f32 %v1979_v33, %v1978_v30 }
 0x215   : > { %v1926_v36 = vpack.c.bf16 %v1958_v34, %v1958_v34  ;;  %v1928_v37 = vpack.c.bf16 %v1980_v35, %v1980_v35 }
 0x217   : > { %633 = vst.msk [vmem:[%s364_s20 + $0x4] sm:$0xf] %vm631_vm0, %v1926_v36  ;;  %812 = vst.msk [vmem:[%s369_s23 + $0x4] sm:$0xf] %vm631_vm0, %v1928_v37 }
 0x22c   : > { %v1997_v38 = vpop.f32.mrf.mxu0  ;;  %v2019_v39 = vpop.f32.mrf.mxu1 }
 0x22e   : > { %v1998_v40 = vpop.f32.mrf.mxu0  ;;  %v2020_v41 = vpop.f32.mrf.mxu1 }
 0x22f   : > { %v1999_v42 = vadd.f32 %v1998_v40, %v1997_v38  ;;  %v2021_v43 = vadd.f32 %v2020_v41, %v2019_v39 }
 0x230   : > { %v2000_v44 = vpop.f32.mrf.mxu0  ;;  %v2022_v45 = vpop.f32.mrf.mxu1 }
 0x231   : > { %v1929_v46 = vpack.c.bf16 %v1999_v42, %v1999_v42  ;;  %v1931_v47 = vpack.c.bf16 %v2021_v43, %v2021_v43 }
 0x232   : > { %v2001_v48 = vpop.f32.mrf.mxu0  ;;  %v2023_v49 = vpop.f32.mrf.mxu1 }
 0x233   : > { %990 = vst.msk [vmem:[%s2601_s26] sm:$0xf] %vm631_vm0, %v1929_v46  ;;  %1810 = vst.msk [vmem:[%s2601_s26 + $0x8] sm:$0xf] %vm631_vm0, %v1931_v47  ;;  %v2002_v50 = vadd.f32 %v2001_v48, %v2000_v44  ;;  %v2024_v51 = vadd.f32 %v2023_v49, %v2022_v45 }
 0x235   : > { %v1930_v52 = vpack.c.bf16 %v2002_v50, %v2002_v50  ;;  %v1932_v53 = vpack.c.bf16 %v2024_v51, %v2024_v51 }
 0x237   : > { %991 = vst.msk [vmem:[%s2601_s26 + $0x4] sm:$0xf] %vm631_vm0, %v1930_v52  ;;  %1811 = vst.msk [vmem:[%s2601_s26 + $0xc] sm:$0xf] %vm631_vm0, %v1932_v53 }
 0x24c   : > { %v2041_v54 = vpop.f32.mrf.mxu0 }
 0x24d   : > { %v2063_v55 = vpop.f32.mrf.mxu1 }
 0x24e   : > { %v2042_v56 = vpop.f32.mrf.mxu0 }
 0x24f   : > { %v2043_v57 = vadd.f32 %v2042_v56, %v2041_v54  ;;  %v2064_v58 = vpop.f32.mrf.mxu1 }
 0x250   : > { %v2065_v59 = vadd.f32 %v2064_v58, %v2063_v55  ;;  %v2044_v60 = vpop.f32.mrf.mxu0 }
 0x251   : > { %v1933_v61 = vpack.c.bf16 %v2043_v57, %v2043_v57  ;;  %v2066_v62 = vpop.f32.mrf.mxu1 }
 0x252   : > { %v1935_v63 = vpack.c.bf16 %v2065_v59, %v2065_v59  ;;  %v2045_v0 = vpop.f32.mrf.mxu0 }
 0x253   : > { %1862 = vst.msk [vmem:[%s2601_s26 + $0x10] sm:$0xf] %vm631_vm0, %v1933_v61  ;;  %v2046_v1 = vadd.f32 %v2045_v0, %v2044_v60  ;;  %v2067_v2 = vpop.f32.mrf.mxu1 }
 0x254   : > { %1914 = vst.msk [vmem:[%s2601_s26 + $0x18] sm:$0xf] %vm631_vm0, %v1935_v63  ;;  %v2068_v3 = vadd.f32 %v2067_v2, %v2066_v62 }
 0x255   : > { %v1934_v4 = vpack.c.bf16 %v2046_v1, %v2046_v1 }
 0x256   : > { %v1936_v5 = vpack.c.bf16 %v2068_v3, %v2068_v3 }
 0x257   : > { %1863 = vst.msk [vmem:[%s2601_s26 + $0x14] sm:$0xf] %vm631_vm0, %v1934_v4 }
 0x258   : > { %1915 = vst.msk [vmem:[%s2601_s26 + $0x1c] sm:$0xf] %vm631_vm0, %v1936_v5 }
 0x259 PF: > { %s20_s30 = sadd.s32 1, %s2183_s30  }
 0x25a   : > { %p17_p4 = scmp.ge.s32.totalorder %s20_s30, 4  }
 0x25c   :  { %19 = sbr.rel (!%p17_p4) target bundleno = 1 (0x1), region = 116 }

// kernel: falcon_forward.15
= control target key start
LH: loop header
LB: loop body
LE: loop exit
PB: predicated region body
PF: predicated region fallthrough
CT: control target
= control target key end

     0   :  { %s474_s1 = inlined_call_operand.vmem [shape: bf16[256,256], index: 1, kind: input, shape index: {}]   ;;  %s475_s0 = inlined_call_operand.vmem [shape: f32[8,256], index: 0, kind: input, shape index: {}]   ;;  %s476_s2 = inlined_call_operand.vmem [shape: f32[8,256], index: 2, kind: output, shape index: {}]  }
   0x1   :  { %v303_v0 = vld [vmem:[%s474_s1 + $0x74] ss:$8 sps:$4 sm:$0xff]   ;;  %v305_v1 = vld [vmem:[%s474_s1 + $0x70] ss:$8 sps:$4 sm:$0xff]   ;;  %v306_v2 = vld [vmem:[%s474_s1 + $0x64] ss:$8 sps:$4 sm:$0xff]  }
   0x2   :  { %215 = vmatprep.subr.bf16.mxu0 %v303_v0  ;;  %v308_v3 = vld [vmem:[%s474_s1 + $0x60] ss:$8 sps:$4 sm:$0xff]   ;;  %v309_v4 = vld [vmem:[%s474_s1 + $0x54] ss:$8 sps:$4 sm:$0xff]   ;;  %v311_v5 = vld [vmem:[%s474_s1 + $0x50] ss:$8 sps:$4 sm:$0xff]  }
   0x3   :  { %216 = vmatpush1.bf16.msra.mxu0 %v305_v1  ;;  %v312_v6 = vld [vmem:[%s474_s1 + $0x44] ss:$8 sps:$4 sm:$0xff]   ;;  %v314_v7 = vld [vmem:[%s474_s1 + $0x40] ss:$8 sps:$4 sm:$0xff]   ;;  %v315_v8 = vld [vmem:[%s474_s1 + $0x34] ss:$8 sps:$4 sm:$0xff]  }
   0x4   :  { %217 = vmatprep.subr.bf16.mxu0 %v306_v2  ;;  %v317_v9 = vld [vmem:[%s474_s1 + $0x30] ss:$8 sps:$4 sm:$0xff]   ;;  %v318_v10 = vld [vmem:[%s474_s1 + $0x24] ss:$8 sps:$4 sm:$0xff]   ;;  %v320_v11 = vld [vmem:[%s474_s1 + $0x20] ss:$8 sps:$4 sm:$0xff]  }
   0x5   :  { %v321_v12 = vld [vmem:[%s474_s1 + $0x14] ss:$8 sps:$4 sm:$0xff]   ;;  %v20_v13 = vld [vmem:[%s475_s0 + $0x8] sm:$0xff]  ;;  %v323_v15 = vld [vmem:[%s474_s1 + $0x10] ss:$8 sps:$4 sm:$0xff]  }
   0x6   :  { %v22_v14 = vpack.c.bf16 %v20_v13, %v20_v13  ;;  %v324_v16 = vld [vmem:[%s474_s1 + $0x4] ss:$8 sps:$4 sm:$0xff]   ;;  %v326_v17 = vld [vmem:[%s474_s1] ss:$8 sps:$4 sm:$0xff]   ;;  %v327_v18 = vld [vmem:[%s474_s1 + $0xf4] ss:$8 sps:$4 sm:$0xff]  }
   0x7   :  { %218 = vmatpush1.bf16.msra.mxu0 %v308_v3  ;;  %v329_v19 = vld [vmem:[%s474_s1 + $0xf0] ss:$8 sps:$4 sm:$0xff]   ;;  %v330_v20 = vld [vmem:[%s474_s1 + $0xe4] ss:$8 sps:$4 sm:$0xff]   ;;  %v332_v21 = vld [vmem:[%s474_s1 + $0xe0] ss:$8 sps:$4 sm:$0xff]  }
   0x8   :  { %219 = vmatprep.subr.bf16.mxu0 %v309_v4  ;;  %247 = vmatprep.mubr.bf16.mxu0 %v22_v14  ;;  %v333_v22 = vld [vmem:[%s474_s1 + $0xd4] ss:$8 sps:$4 sm:$0xff]   ;;  %v335_v23 = vld [vmem:[%s474_s1 + $0xd0] ss:$8 sps:$4 sm:$0xff]   ;;  %v336_v24 = vld [vmem:[%s474_s1 + $0xc4] ss:$8 sps:$4 sm:$0xff]  }
   0x9   :  { %v338_v25 = vld [vmem:[%s474_s1 + $0xc0] ss:$8 sps:$4 sm:$0xff]   ;;  %v339_v26 = vld [vmem:[%s474_s1 + $0xb4] ss:$8 sps:$4 sm:$0xff]   ;;  %v341_v27 = vld [vmem:[%s474_s1 + $0xb0] ss:$8 sps:$4 sm:$0xff]  }
   0xa   :  { %v342_v28 = vld [vmem:[%s474_s1 + $0xa4] ss:$8 sps:$4 sm:$0xff]   ;;  %v344_v29 = vld [vmem:[%s474_s1 + $0xa0] ss:$8 sps:$4 sm:$0xff]   ;;  %v345_v30 = vld [vmem:[%s474_s1 + $0x94] ss:$8 sps:$4 sm:$0xff]  }
   0xb   :  { %220 = vmatpush1.bf16.msra.mxu0 %v311_v5  ;;  %v347_v31 = vld [vmem:[%s474_s1 + $0x90] ss:$8 sps:$4 sm:$0xff]   ;;  %v348_v32 = vld [vmem:[%s474_s1 + $0x84] ss:$8 sps:$4 sm:$0xff]   ;;  %v350_v33 = vld [vmem:[%s474_s1 + $0x80] ss:$8 sps:$4 sm:$0xff]  }
   0xc   :  { %221 = vmatprep.subr.bf16.mxu0 %v312_v6  ;;  %v19_v34 = vld [vmem:[%s475_s0] sm:$0xff] }
   0xd   :  { %v21_v35 = vpack.c.bf16 %v19_v34, %v19_v34 }
   0xf   :  { %222 = vmatpush1.bf16.msra.mxu0 %v314_v7 }
  0x10   :  { %223 = vmatprep.subr.bf16.mxu0 %v315_v8 }
  0x13   :  { %224 = vmatpush1.bf16.msra.mxu0 %v317_v9 }
  0x14   :  { %225 = vmatprep.subr.bf16.mxu0 %v318_v10 }
  0x17   :  { %226 = vmatpush1.bf16.msra.mxu0 %v320_v11 }
  0x18   :  { %227 = vmatprep.subr.bf16.mxu0 %v321_v12 }
  0x1b   :  { %228 = vmatpush1.bf16.msra.mxu0 %v323_v15 }
  0x1c   :  { %229 = vmatprep.subr.bf16.mxu0 %v324_v16 }
  0x1f   :  { %230 = vmatpush1.bf16.msra.mxu0 %v326_v17 }
  0x20   :  { %231 = vmatprep.subr.bf16.mxu0 %v327_v18 }
  0x23   :  { %232 = vmatpush2.bf16.msra.mxu0 %v329_v19 }
  0x24   :  { %233 = vmatprep.subr.bf16.mxu0 %v330_v20 }
  0x27   :  { %234 = vmatpush2.bf16.msra.mxu0 %v332_v21 }
  0x28   :  { %235 = vmatprep.subr.bf16.mxu0 %v333_v22 }
  0x2b   :  { %236 = vmatpush2.bf16.msra.mxu0 %v335_v23 }
  0x2c   :  { %237 = vmatprep.subr.bf16.mxu0 %v336_v24 }
  0x2f   :  { %238 = vmatpush2.bf16.msra.mxu0 %v338_v25 }
  0x30   :  { %239 = vmatprep.subr.bf16.mxu0 %v339_v26 }
  0x33   :  { %240 = vmatpush2.bf16.msra.mxu0 %v341_v27 }
  0x34   :  { %241 = vmatprep.subr.bf16.mxu0 %v342_v28 }
  0x37   :  { %242 = vmatpush2.bf16.msra.mxu0 %v344_v29 }
  0x38   :  { %243 = vmatprep.subr.bf16.mxu0 %v345_v30 }
  0x3b   :  { %244 = vmatpush2.bf16.msra.mxu0 %v347_v31 }
  0x3c   :  { %245 = vmatprep.subr.bf16.mxu0 %v348_v32 }
  0x3f   :  { %246 = vmatpush2.bf16.msra.mxu0 %v350_v33 }
  0x42   :  { %248 = vmatmul.mubr.bf16.vlgmr.msra.gmra.mxu0 %v21_v35 }
 0x102   :  { %v249_v36 = vpop.f32.mrf.mxu0 }
 0x103   :  { %265 = vst [vmem:[%s476_s2] sm:$0xff] %v249_v36 }
 0x104   :  { %v251_v37 = vpop.f32.mrf.mxu0 }
 0x105   :  { %266 = vst [vmem:[%s476_s2 + $0x8] sm:$0xff] %v251_v37 }
 0x106   :  { %v253_v38 = vpop.f32.mrf.mxu0 }
 0x108   :  { %v254_v39 = vpop.f32.mrf.mxu0 }

</bundles_post_ra>
